<compile_context>
chip_gen: v5e
topology: v5e:2x2
jax: 0.10.0
libtpu: 0.0.40
codegen_flags: <defaults>
</compile_context>

<pallas_src>
import functools

import jax
import jax.numpy as jnp
from jax.experimental import pallas as pl
from jax.experimental.pallas import tpu as pltpu


def decoder_gru_kernel(h_ref,        # (B_blk, tau, 256)  bf16
                       wi_ref,       # (256, 48)  bf16   [Wir | Wiz | Win]
                       bi_ref,       # (1, 48)    f32    [b_ir+b_hr | b_iz+b_hz | b_in]
                       whh_ref,      # (16, 48)   f32    [Whr | Whz | Whn]
                       bhn_ref,      # (1, 16)    f32
                       wmlp_ref,     # (tau*16, OUT_pad)  bf16
                       bmlp_ref,     # (1, OUT_pad)       f32
                       out_ref,      # (B_blk, OUT_pad)   f32
                       xhat_ref):    # scratch: (B_blk, tau*16) f32
    b_blk, tau, in_dim = h_ref.shape
    hidden = whh_ref.shape[0]

    # --- (1) Hoisted input projection: one big bf16 MXU matmul for all steps. ---
    # (B, tau, 256) -> (B*tau, 256): lane dim unchanged, tau (=8) merges into the
    # sublane dim, so the reshape is layout-trivial.
    x_all = h_ref[...].reshape(b_blk * tau, in_dim)
    gi_all = (jnp.dot(x_all, wi_ref[...], preferred_element_type=jnp.float32)
              + bi_ref[...])                                    # (B*tau, 48) f32
    gi3 = gi_all.reshape(b_blk, tau, 3 * hidden)                # per-step view

    whh = whh_ref[...]                                          # (16, 48) f32
    bhn_b = jnp.broadcast_to(bhn_ref[...], (b_blk, hidden))     # hoisted broadcast

    # --- (2) Serial recurrence: one (B,16)x(16,48) matmul per step, hidden state
    #         carried as an SSA value, per-step output written to VMEM scratch. ---
    h_t = jnp.zeros((b_blk, hidden), jnp.float32)
    for t in range(tau):
        gi = gi3[:, t, :]                                       # (B, 48)
        gh = jnp.dot(h_t, whh, preferred_element_type=jnp.float32)  # (B, 48)
        rz = jax.nn.sigmoid(gi[:, :2 * hidden] + gh[:, :2 * hidden])
        r = rz[:, :hidden]
        z = rz[:, hidden:]
        n = jnp.tanh(gi[:, 2 * hidden:] + r * (gh[:, 2 * hidden:] + bhn_b))
        h_t = n + z * (h_t - n)                                 # == (1-z)*n + z*h_t
        xhat_ref[:, t * hidden:(t + 1) * hidden] = h_t

    # --- (3) Single K=tau*16 MLP matmul, lane-dense (128-padded) output. ---
    x_hat = xhat_ref[...].astype(jnp.bfloat16)                  # (B, tau*16)
    out = (jnp.dot(x_hat, wmlp_ref[...], preferred_element_type=jnp.float32)
           + bmlp_ref[...])                                     # (B, OUT_pad) f32
    out_ref[...] = out.astype(out_ref.dtype)


def decoder_gru_forward(h, params, *, tau, pred_steps, num_nodes, block_b=512):
    """h: (B, tau, 256) float32. Returns (B, pred_steps, num_nodes, 5) float32.

    block_b: max batch rows per grid step. 512 fits all generations under the
    48 MiB VMEM limit set below; on v5e/v6e (128 MiB VMEM) 1024 also works.
    """
    B, tau_in, in_dim = h.shape
    assert tau_in == tau
    hidden = 16
    out_feat = num_nodes * 5 * pred_steps
    out_pad = ((out_feat + 127) // 128) * 128                   # lane-dense output

    w_ih, w_hh = params["w_ih"], params["w_hh"]
    b_ih, b_hh = params["b_ih"], params["b_hh"]

    # PyTorch GRU packs gates [r; z; n] along dim 0 of w_ih/w_hh.
    wi_all = w_ih.T.astype(jnp.bfloat16)                        # (256, 48)
    whh_all = w_hh.T.astype(jnp.float32)                        # (16, 48)
    bi_all = jnp.concatenate([
        b_ih[0:hidden] + b_hh[0:hidden],                        # b_r (ir + hr)
        b_ih[hidden:2 * hidden] + b_hh[hidden:2 * hidden],      # b_z (iz + hz)
        b_ih[2 * hidden:3 * hidden],                            # b_in
    ]).reshape(1, 3 * hidden).astype(jnp.float32)
    b_hn = b_hh[2 * hidden:3 * hidden].reshape(1, hidden).astype(jnp.float32)

    # Linear(16*tau -> out_feat): columns of x_hat are [h_0 | ... | h_{tau-1}],
    # matching the row-major flatten of (B, tau, 16) in the PyTorch forward.
    wmlp = jnp.pad(params["w_mlp"].T,
                   ((0, 0), (0, out_pad - out_feat))).astype(jnp.bfloat16)
    bmlp = jnp.pad(params["b_mlp"],
                   (0, out_pad - out_feat)).reshape(1, out_pad).astype(jnp.float32)

    # Batch blocking: right-size blk_b to minimize padding; prefer >=2 blocks so
    # the "parallel" axis can shard across v7x's two TensorCores.
    num_blocks = max(1, (B + block_b - 1) // block_b)
    if num_blocks == 1 and B > 8:
        num_blocks = 2
    blk_b = (B + num_blocks - 1) // num_blocks
    blk_b = ((blk_b + 7) // 8) * 8                              # sublane multiple
    Bp = num_blocks * blk_b

    # Cast the big input to bf16 at the boundary (halves HBM traffic); pad only
    # if the padded batch differs. No transpose: native (B, tau, 256) layout.
    h_in = h.astype(jnp.bfloat16)
    if Bp != B:
        h_in = jnp.pad(h_in, ((0, Bp - B), (0, 0), (0, 0)))

    grid = (Bp // blk_b,)

    out = pl.pallas_call(
        decoder_gru_kernel,
        out_shape=jax.ShapeDtypeStruct((Bp, out_pad), jnp.float32),
        grid_spec=pltpu.PrefetchScalarGridSpec(
            num_scalar_prefetch=0,
            grid=grid,
            in_specs=[
                pl.BlockSpec((blk_b, tau, in_dim), lambda i: (i, 0, 0)),
                pl.BlockSpec((in_dim, 3 * hidden), lambda i: (0, 0)),
                pl.BlockSpec((1, 3 * hidden), lambda i: (0, 0)),
                pl.BlockSpec((hidden, 3 * hidden), lambda i: (0, 0)),
                pl.BlockSpec((1, hidden), lambda i: (0, 0)),
                pl.BlockSpec((tau * hidden, out_pad), lambda i: (0, 0)),
                pl.BlockSpec((1, out_pad), lambda i: (0, 0)),
            ],
            out_specs=pl.BlockSpec((blk_b, out_pad), lambda i: (i, 0)),
            scratch_shapes=[pltpu.VMEM((blk_b, tau * hidden), jnp.float32)],
        ),
        compiler_params=pltpu.CompilerParams(
            dimension_semantics=("parallel",),
            vmem_limit_bytes=48 * 1024 * 1024,                  # v7x-safe (64 MiB phys)
        ),
    )(h_in, wi_all, bi_all, whh_all, b_hn, wmlp, bmlp)

    out = out[:B, :out_feat]
    return out.reshape(B, pred_steps, num_nodes, 5)


def make_params(key, tau, pred_steps, num_nodes):
    """Deterministic synthetic weights with PyTorch-default-like uniform init."""
    hidden = 16
    in_sz = 256
    out_feat = num_nodes * 5 * pred_steps
    ks = jax.random.split(key, 6)
    s_gru = 1.0 / jnp.sqrt(hidden)
    s_lin = 1.0 / jnp.sqrt(hidden * tau)
    return {
        "w_ih": jax.random.uniform(ks[0], (3 * hidden, in_sz), jnp.float32, -s_gru, s_gru),
        "w_hh": jax.random.uniform(ks[1], (3 * hidden, hidden), jnp.float32, -s_gru, s_gru),
        "b_ih": jax.random.uniform(ks[2], (3 * hidden,), jnp.float32, -s_gru, s_gru),
        "b_hh": jax.random.uniform(ks[3], (3 * hidden,), jnp.float32, -s_gru, s_gru),
        "w_mlp": jax.random.uniform(ks[4], (out_feat, hidden * tau), jnp.float32, -s_lin, s_lin),
        "b_mlp": jax.random.uniform(ks[5], (out_feat,), jnp.float32, -s_lin, s_lin),
    }


def reference_forward(h, params, *, tau, pred_steps, num_nodes):
    """Pure-JAX f32 reference replicating PyTorch GRU + Linear semantics."""
    B = h.shape[0]
    hidden = 16
    w_ih, w_hh, b_ih, b_hh = params["w_ih"], params["w_hh"], params["b_ih"], params["b_hh"]
    hs = jnp.zeros((B, hidden), jnp.float32)
    outs = []
    for t in range(tau):
        x_t = h[:, t, :]
        gi = x_t @ w_ih.T + b_ih
        gh = hs @ w_hh.T + b_hh
        r = jax.nn.sigmoid(gi[:, 0:16] + gh[:, 0:16])
        z = jax.nn.sigmoid(gi[:, 16:32] + gh[:, 16:32])
        n = jnp.tanh(gi[:, 32:48] + r * gh[:, 32:48])
        hs = (1.0 - z) * n + z * hs
        outs.append(hs)
    x_hat = jnp.stack(outs, axis=1).reshape(B, tau * hidden)
    x_hat = x_hat @ params["w_mlp"].T + params["b_mlp"]
    return x_hat.reshape(B, pred_steps, num_nodes, 5)


if __name__ == "__main__":
    tau, pred_steps, num_nodes = 8, 3, 4
    B = 2

    key = jax.random.PRNGKey(0)
    k_h, k_p = jax.random.split(key)
    h = jax.random.normal(k_h, (B, tau, 256), dtype=jnp.float32)
    params = make_params(k_p, tau, pred_steps, num_nodes)

    fwd = functools.partial(decoder_gru_forward, tau=tau,
                            pred_steps=pred_steps, num_nodes=num_nodes)
    out = fwd(h, params)
    out = jax.block_until_ready(out)

    ref = reference_forward(h, params, tau=tau, pred_steps=pred_steps, num_nodes=num_nodes)
    assert out.shape == (B, pred_steps, num_nodes, 5)
    # bf16 input/weight path -> relaxed tolerance vs. f32 reference.
    assert jnp.allclose(out, ref, atol=3e-2, rtol=3e-2), "mismatch vs JAX reference"

    print("KERNEL_OK")
</pallas_src>

<mosaic_0001>
module attributes {stable_mosaic.version = 11 : i64} {
  func.func @decoder_gru_kernel(%arg0: i32, %arg1: memref<8x8x256xbf16, #tpu.memory_space<vmem>>, %arg2: memref<256x48xbf16, #tpu.memory_space<vmem>>, %arg3: memref<1x48xf32, #tpu.memory_space<vmem>>, %arg4: memref<16x48xf32, #tpu.memory_space<vmem>>, %arg5: memref<1x16xf32, #tpu.memory_space<vmem>>, %arg6: memref<128x128xbf16, #tpu.memory_space<vmem>>, %arg7: memref<1x128xf32, #tpu.memory_space<vmem>>, %arg8: memref<8x128xf32, #tpu.memory_space<vmem>>, %arg9: memref<8x128xf32, #tpu.memory_space<vmem>>) attributes {dimension_semantics = [#tpu.dimension_semantics<parallel>], iteration_bounds = array<i64: 1>, scalar_prefetch = 0 : i64, scratch_operands = 1 : i64, tpu.core_type = #tpu.core_type<tc>, window_params = [{transform_indices = @transform_0, window_bounds = array<i64: 8, 8, 256>}, {pipeline_mode = #tpu.pipeline_mode<synchronous>, transform_indices = @transform_1, window_bounds = array<i64: 256, 48>}, {pipeline_mode = #tpu.pipeline_mode<synchronous>, transform_indices = @transform_2, window_bounds = array<i64: 1, 48>}, {pipeline_mode = #tpu.pipeline_mode<synchronous>, transform_indices = @transform_3, window_bounds = array<i64: 16, 48>}, {pipeline_mode = #tpu.pipeline_mode<synchronous>, transform_indices = @transform_4, window_bounds = array<i64: 1, 16>}, {pipeline_mode = #tpu.pipeline_mode<synchronous>, transform_indices = @transform_5, window_bounds = array<i64: 128, 128>}, {pipeline_mode = #tpu.pipeline_mode<synchronous>, transform_indices = @transform_6, window_bounds = array<i64: 1, 128>}, {transform_indices = @transform_7, window_bounds = array<i64: 8, 128>}]} {
    %c0 = arith.constant 0 : index
    %c0_0 = arith.constant 0 : index
    %c0_1 = arith.constant 0 : index
    %0 = vector.load %arg1[%c0, %c0_0, %c0_1] : memref<8x8x256xbf16, #tpu.memory_space<vmem>>, vector<8x8x256xbf16>
    %1 = vector.shape_cast %0 : vector<8x8x256xbf16> to vector<64x256xbf16>
    %c0_2 = arith.constant 0 : index
    %c0_3 = arith.constant 0 : index
    %2 = vector.load %arg2[%c0_2, %c0_3] : memref<256x48xbf16, #tpu.memory_space<vmem>>, vector<256x48xbf16>
    %cst = arith.constant dense<0.000000e+00> : vector<64x48xf32>
    %3 = tpu.matmul %1, %2, %cst {dimension_numbers = #tpu.dot_dimension_numbers<[1], [0], [0], [1], [0, 0, 1, 1], [], []>} : vector<64x256xbf16>, vector<256x48xbf16>, vector<64x48xf32> -> vector<64x48xf32>
    %c0_4 = arith.constant 0 : index
    %c0_5 = arith.constant 0 : index
    %4 = vector.load %arg3[%c0_4, %c0_5] : memref<1x48xf32, #tpu.memory_space<vmem>>, vector<1x48xf32>
    %5 = vector.broadcast %4 : vector<1x48xf32> to vector<64x48xf32>
    %6 = arith.addf %3, %5 : vector<64x48xf32>
    %7 = vector.shape_cast %6 : vector<64x48xf32> to vector<8x8x48xf32>
    %c0_6 = arith.constant 0 : index
    %c0_7 = arith.constant 0 : index
    %8 = vector.load %arg4[%c0_6, %c0_7] : memref<16x48xf32, #tpu.memory_space<vmem>>, vector<16x48xf32>
    %c0_8 = arith.constant 0 : index
    %c0_9 = arith.constant 0 : index
    %9 = vector.load %arg5[%c0_8, %c0_9] : memref<1x16xf32, #tpu.memory_space<vmem>>, vector<1x16xf32>
    %10 = vector.shape_cast %9 : vector<1x16xf32> to vector<1x16xf32>
    %11 = vector.broadcast %10 : vector<1x16xf32> to vector<8x16xf32>
    %cst_10 = arith.constant 0.000000e+00 : f32
    %12 = vector.broadcast %cst_10 : f32 to vector<8x16xf32>
    %13 = vector.extract_strided_slice %7 {offsets = [0, 0, 0], sizes = [8, 1, 48], strides = [1, 1, 1]} : vector<8x8x48xf32> to vector<8x1x48xf32>
    %14 = vector.shape_cast %13 : vector<8x1x48xf32> to vector<8x48xf32>
    %cst_11 = arith.constant dense<0.000000e+00> : vector<8x48xf32>
    %15 = tpu.matmul %12, %8, %cst_11 {dimension_numbers = #tpu.dot_dimension_numbers<[1], [0], [0], [1], [0, 0, 1, 1], [], []>} : vector<8x16xf32>, vector<16x48xf32>, vector<8x48xf32> -> vector<8x48xf32>
    %16 = vector.extract_strided_slice %14 {offsets = [0, 0], sizes = [8, 32], strides = [1, 1]} : vector<8x48xf32> to vector<8x32xf32>
    %17 = vector.extract_strided_slice %15 {offsets = [0, 0], sizes = [8, 32], strides = [1, 1]} : vector<8x48xf32> to vector<8x32xf32>
    %18 = arith.addf %16, %17 : vector<8x32xf32>
    %19 = arith.negf %18 : vector<8x32xf32>
    %20 = math.exp %19 : vector<8x32xf32>
    %cst_12 = arith.constant 1.000000e+00 : f32
    %21 = vector.broadcast %cst_12 : f32 to vector<8x32xf32>
    %22 = arith.addf %21, %20 : vector<8x32xf32>
    %23 = arith.divf %21, %22 : vector<8x32xf32>
    %24 = vector.extract_strided_slice %23 {offsets = [0, 0], sizes = [8, 16], strides = [1, 1]} : vector<8x32xf32> to vector<8x16xf32>
    %25 = vector.extract_strided_slice %23 {offsets = [0, 16], sizes = [8, 16], strides = [1, 1]} : vector<8x32xf32> to vector<8x16xf32>
    %26 = vector.extract_strided_slice %14 {offsets = [0, 32], sizes = [8, 16], strides = [1, 1]} : vector<8x48xf32> to vector<8x16xf32>
    %27 = vector.extract_strided_slice %15 {offsets = [0, 32], sizes = [8, 16], strides = [1, 1]} : vector<8x48xf32> to vector<8x16xf32>
    %28 = arith.addf %27, %11 : vector<8x16xf32>
    %29 = arith.mulf %24, %28 : vector<8x16xf32>
    %30 = arith.addf %26, %29 : vector<8x16xf32>
    %31 = math.tanh %30 : vector<8x16xf32>
    %32 = arith.subf %12, %31 : vector<8x16xf32>
    %33 = arith.mulf %25, %32 : vector<8x16xf32>
    %34 = arith.addf %31, %33 : vector<8x16xf32>
    %c0_13 = arith.constant 0 : index
    %c0_14 = arith.constant 0 : index
    %35 = vector.load %arg9[%c0_13, %c0_14] : memref<8x128xf32, #tpu.memory_space<vmem>>, vector<8x16xf32>
    tpu.vector_store %arg9[%c0_13, %c0_14], %34 {strides = array<i32>} : memref<8x128xf32, #tpu.memory_space<vmem>>, vector<8x16xf32>,
    %36 = vector.extract_strided_slice %7 {offsets = [0, 1, 0], sizes = [8, 1, 48], strides = [1, 1, 1]} : vector<8x8x48xf32> to vector<8x1x48xf32>
    %37 = vector.shape_cast %36 : vector<8x1x48xf32> to vector<8x48xf32>
    %cst_15 = arith.constant dense<0.000000e+00> : vector<8x48xf32>
    %38 = tpu.matmul %34, %8, %cst_15 {dimension_numbers = #tpu.dot_dimension_numbers<[1], [0], [0], [1], [0, 0, 1, 1], [], []>} : vector<8x16xf32>, vector<16x48xf32>, vector<8x48xf32> -> vector<8x48xf32>
    %39 = vector.extract_strided_slice %37 {offsets = [0, 0], sizes = [8, 32], strides = [1, 1]} : vector<8x48xf32> to vector<8x32xf32>
    %40 = vector.extract_strided_slice %38 {offsets = [0, 0], sizes = [8, 32], strides = [1, 1]} : vector<8x48xf32> to vector<8x32xf32>
    %41 = arith.addf %39, %40 : vector<8x32xf32>
    %42 = arith.negf %41 : vector<8x32xf32>
    %43 = math.exp %42 : vector<8x32xf32>
    %cst_16 = arith.constant 1.000000e+00 : f32
    %44 = vector.broadcast %cst_16 : f32 to vector<8x32xf32>
    %45 = arith.addf %44, %43 : vector<8x32xf32>
    %46 = arith.divf %44, %45 : vector<8x32xf32>
    %47 = vector.extract_strided_slice %46 {offsets = [0, 0], sizes = [8, 16], strides = [1, 1]} : vector<8x32xf32> to vector<8x16xf32>
    %48 = vector.extract_strided_slice %46 {offsets = [0, 16], sizes = [8, 16], strides = [1, 1]} : vector<8x32xf32> to vector<8x16xf32>
    %49 = vector.extract_strided_slice %37 {offsets = [0, 32], sizes = [8, 16], strides = [1, 1]} : vector<8x48xf32> to vector<8x16xf32>
    %50 = vector.extract_strided_slice %38 {offsets = [0, 32], sizes = [8, 16], strides = [1, 1]} : vector<8x48xf32> to vector<8x16xf32>
    %51 = arith.addf %50, %11 : vector<8x16xf32>
    %52 = arith.mulf %47, %51 : vector<8x16xf32>
    %53 = arith.addf %49, %52 : vector<8x16xf32>
    %54 = math.tanh %53 : vector<8x16xf32>
    %55 = arith.subf %34, %54 : vector<8x16xf32>
    %56 = arith.mulf %48, %55 : vector<8x16xf32>
    %57 = arith.addf %54, %56 : vector<8x16xf32>
    %c0_17 = arith.constant 0 : index
    %c16 = arith.constant 16 : index
    %58 = vector.load %arg9[%c0_17, %c16] : memref<8x128xf32, #tpu.memory_space<vmem>>, vector<8x16xf32>
    tpu.vector_store %arg9[%c0_17, %c16], %57 {strides = array<i32>} : memref<8x128xf32, #tpu.memory_space<vmem>>, vector<8x16xf32>,
    %59 = vector.extract_strided_slice %7 {offsets = [0, 2, 0], sizes = [8, 1, 48], strides = [1, 1, 1]} : vector<8x8x48xf32> to vector<8x1x48xf32>
    %60 = vector.shape_cast %59 : vector<8x1x48xf32> to vector<8x48xf32>
    %cst_18 = arith.constant dense<0.000000e+00> : vector<8x48xf32>
    %61 = tpu.matmul %57, %8, %cst_18 {dimension_numbers = #tpu.dot_dimension_numbers<[1], [0], [0], [1], [0, 0, 1, 1], [], []>} : vector<8x16xf32>, vector<16x48xf32>, vector<8x48xf32> -> vector<8x48xf32>
    %62 = vector.extract_strided_slice %60 {offsets = [0, 0], sizes = [8, 32], strides = [1, 1]} : vector<8x48xf32> to vector<8x32xf32>
    %63 = vector.extract_strided_slice %61 {offsets = [0, 0], sizes = [8, 32], strides = [1, 1]} : vector<8x48xf32> to vector<8x32xf32>
    %64 = arith.addf %62, %63 : vector<8x32xf32>
    %65 = arith.negf %64 : vector<8x32xf32>
    %66 = math.exp %65 : vector<8x32xf32>
    %cst_19 = arith.constant 1.000000e+00 : f32
    %67 = vector.broadcast %cst_19 : f32 to vector<8x32xf32>
    %68 = arith.addf %67, %66 : vector<8x32xf32>
    %69 = arith.divf %67, %68 : vector<8x32xf32>
    %70 = vector.extract_strided_slice %69 {offsets = [0, 0], sizes = [8, 16], strides = [1, 1]} : vector<8x32xf32> to vector<8x16xf32>
    %71 = vector.extract_strided_slice %69 {offsets = [0, 16], sizes = [8, 16], strides = [1, 1]} : vector<8x32xf32> to vector<8x16xf32>
    %72 = vector.extract_strided_slice %60 {offsets = [0, 32], sizes = [8, 16], strides = [1, 1]} : vector<8x48xf32> to vector<8x16xf32>
    %73 = vector.extract_strided_slice %61 {offsets = [0, 32], sizes = [8, 16], strides = [1, 1]} : vector<8x48xf32> to vector<8x16xf32>
    %74 = arith.addf %73, %11 : vector<8x16xf32>
    %75 = arith.mulf %70, %74 : vector<8x16xf32>
    %76 = arith.addf %72, %75 : vector<8x16xf32>
    %77 = math.tanh %76 : vector<8x16xf32>
    %78 = arith.subf %57, %77 : vector<8x16xf32>
    %79 = arith.mulf %71, %78 : vector<8x16xf32>
    %80 = arith.addf %77, %79 : vector<8x16xf32>
    %c0_20 = arith.constant 0 : index
    %c32 = arith.constant 32 : index
    %81 = vector.load %arg9[%c0_20, %c32] : memref<8x128xf32, #tpu.memory_space<vmem>>, vector<8x16xf32>
    tpu.vector_store %arg9[%c0_20, %c32], %80 {strides = array<i32>} : memref<8x128xf32, #tpu.memory_space<vmem>>, vector<8x16xf32>,
    %82 = vector.extract_strided_slice %7 {offsets = [0, 3, 0], sizes = [8, 1, 48], strides = [1, 1, 1]} : vector<8x8x48xf32> to vector<8x1x48xf32>
    %83 = vector.shape_cast %82 : vector<8x1x48xf32> to vector<8x48xf32>
    %cst_21 = arith.constant dense<0.000000e+00> : vector<8x48xf32>
    %84 = tpu.matmul %80, %8, %cst_21 {dimension_numbers = #tpu.dot_dimension_numbers<[1], [0], [0], [1], [0, 0, 1, 1], [], []>} : vector<8x16xf32>, vector<16x48xf32>, vector<8x48xf32> -> vector<8x48xf32>
    %85 = vector.extract_strided_slice %83 {offsets = [0, 0], sizes = [8, 32], strides = [1, 1]} : vector<8x48xf32> to vector<8x32xf32>
    %86 = vector.extract_strided_slice %84 {offsets = [0, 0], sizes = [8, 32], strides = [1, 1]} : vector<8x48xf32> to vector<8x32xf32>
    %87 = arith.addf %85, %86 : vector<8x32xf32>
    %88 = arith.negf %87 : vector<8x32xf32>
    %89 = math.exp %88 : vector<8x32xf32>
    %cst_22 = arith.constant 1.000000e+00 : f32
    %90 = vector.broadcast %cst_22 : f32 to vector<8x32xf32>
    %91 = arith.addf %90, %89 : vector<8x32xf32>
    %92 = arith.divf %90, %91 : vector<8x32xf32>
    %93 = vector.extract_strided_slice %92 {offsets = [0, 0], sizes = [8, 16], strides = [1, 1]} : vector<8x32xf32> to vector<8x16xf32>
    %94 = vector.extract_strided_slice %92 {offsets = [0, 16], sizes = [8, 16], strides = [1, 1]} : vector<8x32xf32> to vector<8x16xf32>
    %95 = vector.extract_strided_slice %83 {offsets = [0, 32], sizes = [8, 16], strides = [1, 1]} : vector<8x48xf32> to vector<8x16xf32>
    %96 = vector.extract_strided_slice %84 {offsets = [0, 32], sizes = [8, 16], strides = [1, 1]} : vector<8x48xf32> to vector<8x16xf32>
    %97 = arith.addf %96, %11 : vector<8x16xf32>
    %98 = arith.mulf %93, %97 : vector<8x16xf32>
    %99 = arith.addf %95, %98 : vector<8x16xf32>
    %100 = math.tanh %99 : vector<8x16xf32>
    %101 = arith.subf %80, %100 : vector<8x16xf32>
    %102 = arith.mulf %94, %101 : vector<8x16xf32>
    %103 = arith.addf %100, %102 : vector<8x16xf32>
    %c0_23 = arith.constant 0 : index
    %c48 = arith.constant 48 : index
    %104 = vector.load %arg9[%c0_23, %c48] : memref<8x128xf32, #tpu.memory_space<vmem>>, vector<8x16xf32>
    tpu.vector_store %arg9[%c0_23, %c48], %103 {strides = array<i32>} : memref<8x128xf32, #tpu.memory_space<vmem>>, vector<8x16xf32>,
    %105 = vector.extract_strided_slice %7 {offsets = [0, 4, 0], sizes = [8, 1, 48], strides = [1, 1, 1]} : vector<8x8x48xf32> to vector<8x1x48xf32>
    %106 = vector.shape_cast %105 : vector<8x1x48xf32> to vector<8x48xf32>
    %cst_24 = arith.constant dense<0.000000e+00> : vector<8x48xf32>
    %107 = tpu.matmul %103, %8, %cst_24 {dimension_numbers = #tpu.dot_dimension_numbers<[1], [0], [0], [1], [0, 0, 1, 1], [], []>} : vector<8x16xf32>, vector<16x48xf32>, vector<8x48xf32> -> vector<8x48xf32>
    %108 = vector.extract_strided_slice %106 {offsets = [0, 0], sizes = [8, 32], strides = [1, 1]} : vector<8x48xf32> to vector<8x32xf32>
    %109 = vector.extract_strided_slice %107 {offsets = [0, 0], sizes = [8, 32], strides = [1, 1]} : vector<8x48xf32> to vector<8x32xf32>
    %110 = arith.addf %108, %109 : vector<8x32xf32>
    %111 = arith.negf %110 : vector<8x32xf32>
    %112 = math.exp %111 : vector<8x32xf32>
    %cst_25 = arith.constant 1.000000e+00 : f32
    %113 = vector.broadcast %cst_25 : f32 to vector<8x32xf32>
    %114 = arith.addf %113, %112 : vector<8x32xf32>
    %115 = arith.divf %113, %114 : vector<8x32xf32>
    %116 = vector.extract_strided_slice %115 {offsets = [0, 0], sizes = [8, 16], strides = [1, 1]} : vector<8x32xf32> to vector<8x16xf32>
    %117 = vector.extract_strided_slice %115 {offsets = [0, 16], sizes = [8, 16], strides = [1, 1]} : vector<8x32xf32> to vector<8x16xf32>
    %118 = vector.extract_strided_slice %106 {offsets = [0, 32], sizes = [8, 16], strides = [1, 1]} : vector<8x48xf32> to vector<8x16xf32>
    %119 = vector.extract_strided_slice %107 {offsets = [0, 32], sizes = [8, 16], strides = [1, 1]} : vector<8x48xf32> to vector<8x16xf32>
    %120 = arith.addf %119, %11 : vector<8x16xf32>
    %121 = arith.mulf %116, %120 : vector<8x16xf32>
    %122 = arith.addf %118, %121 : vector<8x16xf32>
    %123 = math.tanh %122 : vector<8x16xf32>
    %124 = arith.subf %103, %123 : vector<8x16xf32>
    %125 = arith.mulf %117, %124 : vector<8x16xf32>
    %126 = arith.addf %123, %125 : vector<8x16xf32>
    %c0_26 = arith.constant 0 : index
    %c64 = arith.constant 64 : index
    %127 = vector.load %arg9[%c0_26, %c64] : memref<8x128xf32, #tpu.memory_space<vmem>>, vector<8x16xf32>
    tpu.vector_store %arg9[%c0_26, %c64], %126 {strides = array<i32>} : memref<8x128xf32, #tpu.memory_space<vmem>>, vector<8x16xf32>,
    %128 = vector.extract_strided_slice %7 {offsets = [0, 5, 0], sizes = [8, 1, 48], strides = [1, 1, 1]} : vector<8x8x48xf32> to vector<8x1x48xf32>
    %129 = vector.shape_cast %128 : vector<8x1x48xf32> to vector<8x48xf32>
    %cst_27 = arith.constant dense<0.000000e+00> : vector<8x48xf32>
    %130 = tpu.matmul %126, %8, %cst_27 {dimension_numbers = #tpu.dot_dimension_numbers<[1], [0], [0], [1], [0, 0, 1, 1], [], []>} : vector<8x16xf32>, vector<16x48xf32>, vector<8x48xf32> -> vector<8x48xf32>
    %131 = vector.extract_strided_slice %129 {offsets = [0, 0], sizes = [8, 32], strides = [1, 1]} : vector<8x48xf32> to vector<8x32xf32>
    %132 = vector.extract_strided_slice %130 {offsets = [0, 0], sizes = [8, 32], strides = [1, 1]} : vector<8x48xf32> to vector<8x32xf32>
    %133 = arith.addf %131, %132 : vector<8x32xf32>
    %134 = arith.negf %133 : vector<8x32xf32>
    %135 = math.exp %134 : vector<8x32xf32>
    %cst_28 = arith.constant 1.000000e+00 : f32
    %136 = vector.broadcast %cst_28 : f32 to vector<8x32xf32>
    %137 = arith.addf %136, %135 : vector<8x32xf32>
    %138 = arith.divf %136, %137 : vector<8x32xf32>
    %139 = vector.extract_strided_slice %138 {offsets = [0, 0], sizes = [8, 16], strides = [1, 1]} : vector<8x32xf32> to vector<8x16xf32>
    %140 = vector.extract_strided_slice %138 {offsets = [0, 16], sizes = [8, 16], strides = [1, 1]} : vector<8x32xf32> to vector<8x16xf32>
    %141 = vector.extract_strided_slice %129 {offsets = [0, 32], sizes = [8, 16], strides = [1, 1]} : vector<8x48xf32> to vector<8x16xf32>
    %142 = vector.extract_strided_slice %130 {offsets = [0, 32], sizes = [8, 16], strides = [1, 1]} : vector<8x48xf32> to vector<8x16xf32>
    %143 = arith.addf %142, %11 : vector<8x16xf32>
    %144 = arith.mulf %139, %143 : vector<8x16xf32>
    %145 = arith.addf %141, %144 : vector<8x16xf32>
    %146 = math.tanh %145 : vector<8x16xf32>
    %147 = arith.subf %126, %146 : vector<8x16xf32>
    %148 = arith.mulf %140, %147 : vector<8x16xf32>
    %149 = arith.addf %146, %148 : vector<8x16xf32>
    %c0_29 = arith.constant 0 : index
    %c80 = arith.constant 80 : index
    %150 = vector.load %arg9[%c0_29, %c80] : memref<8x128xf32, #tpu.memory_space<vmem>>, vector<8x16xf32>
    tpu.vector_store %arg9[%c0_29, %c80], %149 {strides = array<i32>} : memref<8x128xf32, #tpu.memory_space<vmem>>, vector<8x16xf32>,
    %151 = vector.extract_strided_slice %7 {offsets = [0, 6, 0], sizes = [8, 1, 48], strides = [1, 1, 1]} : vector<8x8x48xf32> to vector<8x1x48xf32>
    %152 = vector.shape_cast %151 : vector<8x1x48xf32> to vector<8x48xf32>
    %cst_30 = arith.constant dense<0.000000e+00> : vector<8x48xf32>
    %153 = tpu.matmul %149, %8, %cst_30 {dimension_numbers = #tpu.dot_dimension_numbers<[1], [0], [0], [1], [0, 0, 1, 1], [], []>} : vector<8x16xf32>, vector<16x48xf32>, vector<8x48xf32> -> vector<8x48xf32>
    %154 = vector.extract_strided_slice %152 {offsets = [0, 0], sizes = [8, 32], strides = [1, 1]} : vector<8x48xf32> to vector<8x32xf32>
    %155 = vector.extract_strided_slice %153 {offsets = [0, 0], sizes = [8, 32], strides = [1, 1]} : vector<8x48xf32> to vector<8x32xf32>
    %156 = arith.addf %154, %155 : vector<8x32xf32>
    %157 = arith.negf %156 : vector<8x32xf32>
    %158 = math.exp %157 : vector<8x32xf32>
    %cst_31 = arith.constant 1.000000e+00 : f32
    %159 = vector.broadcast %cst_31 : f32 to vector<8x32xf32>
    %160 = arith.addf %159, %158 : vector<8x32xf32>
    %161 = arith.divf %159, %160 : vector<8x32xf32>
    %162 = vector.extract_strided_slice %161 {offsets = [0, 0], sizes = [8, 16], strides = [1, 1]} : vector<8x32xf32> to vector<8x16xf32>
    %163 = vector.extract_strided_slice %161 {offsets = [0, 16], sizes = [8, 16], strides = [1, 1]} : vector<8x32xf32> to vector<8x16xf32>
    %164 = vector.extract_strided_slice %152 {offsets = [0, 32], sizes = [8, 16], strides = [1, 1]} : vector<8x48xf32> to vector<8x16xf32>
    %165 = vector.extract_strided_slice %153 {offsets = [0, 32], sizes = [8, 16], strides = [1, 1]} : vector<8x48xf32> to vector<8x16xf32>
    %166 = arith.addf %165, %11 : vector<8x16xf32>
    %167 = arith.mulf %162, %166 : vector<8x16xf32>
    %168 = arith.addf %164, %167 : vector<8x16xf32>
    %169 = math.tanh %168 : vector<8x16xf32>
    %170 = arith.subf %149, %169 : vector<8x16xf32>
    %171 = arith.mulf %163, %170 : vector<8x16xf32>
    %172 = arith.addf %169, %171 : vector<8x16xf32>
    %c0_32 = arith.constant 0 : index
    %c96 = arith.constant 96 : index
    %173 = vector.load %arg9[%c0_32, %c96] : memref<8x128xf32, #tpu.memory_space<vmem>>, vector<8x16xf32>
    tpu.vector_store %arg9[%c0_32, %c96], %172 {strides = array<i32>} : memref<8x128xf32, #tpu.memory_space<vmem>>, vector<8x16xf32>,
    %174 = vector.extract_strided_slice %7 {offsets = [0, 7, 0], sizes = [8, 1, 48], strides = [1, 1, 1]} : vector<8x8x48xf32> to vector<8x1x48xf32>
    %175 = vector.shape_cast %174 : vector<8x1x48xf32> to vector<8x48xf32>
    %cst_33 = arith.constant dense<0.000000e+00> : vector<8x48xf32>
    %176 = tpu.matmul %172, %8, %cst_33 {dimension_numbers = #tpu.dot_dimension_numbers<[1], [0], [0], [1], [0, 0, 1, 1], [], []>} : vector<8x16xf32>, vector<16x48xf32>, vector<8x48xf32> -> vector<8x48xf32>
    %177 = vector.extract_strided_slice %175 {offsets = [0, 0], sizes = [8, 32], strides = [1, 1]} : vector<8x48xf32> to vector<8x32xf32>
    %178 = vector.extract_strided_slice %176 {offsets = [0, 0], sizes = [8, 32], strides = [1, 1]} : vector<8x48xf32> to vector<8x32xf32>
    %179 = arith.addf %177, %178 : vector<8x32xf32>
    %180 = arith.negf %179 : vector<8x32xf32>
    %181 = math.exp %180 : vector<8x32xf32>
    %cst_34 = arith.constant 1.000000e+00 : f32
    %182 = vector.broadcast %cst_34 : f32 to vector<8x32xf32>
    %183 = arith.addf %182, %181 : vector<8x32xf32>
    %184 = arith.divf %182, %183 : vector<8x32xf32>
    %185 = vector.extract_strided_slice %184 {offsets = [0, 0], sizes = [8, 16], strides = [1, 1]} : vector<8x32xf32> to vector<8x16xf32>
    %186 = vector.extract_strided_slice %184 {offsets = [0, 16], sizes = [8, 16], strides = [1, 1]} : vector<8x32xf32> to vector<8x16xf32>
    %187 = vector.extract_strided_slice %175 {offsets = [0, 32], sizes = [8, 16], strides = [1, 1]} : vector<8x48xf32> to vector<8x16xf32>
    %188 = vector.extract_strided_slice %176 {offsets = [0, 32], sizes = [8, 16], strides = [1, 1]} : vector<8x48xf32> to vector<8x16xf32>
    %189 = arith.addf %188, %11 : vector<8x16xf32>
    %190 = arith.mulf %185, %189 : vector<8x16xf32>
    %191 = arith.addf %187, %190 : vector<8x16xf32>
    %192 = math.tanh %191 : vector<8x16xf32>
    %193 = arith.subf %172, %192 : vector<8x16xf32>
    %194 = arith.mulf %186, %193 : vector<8x16xf32>
    %195 = arith.addf %192, %194 : vector<8x16xf32>
    %c0_35 = arith.constant 0 : index
    %c112 = arith.constant 112 : index
    %196 = vector.load %arg9[%c0_35, %c112] : memref<8x128xf32, #tpu.memory_space<vmem>>, vector<8x16xf32>
    tpu.vector_store %arg9[%c0_35, %c112], %195 {strides = array<i32>} : memref<8x128xf32, #tpu.memory_space<vmem>>, vector<8x16xf32>,
    %c0_36 = arith.constant 0 : index
    %c0_37 = arith.constant 0 : index
    %197 = vector.load %arg9[%c0_36, %c0_37] : memref<8x128xf32, #tpu.memory_space<vmem>>, vector<8x128xf32>
    %198 = arith.truncf %197 : vector<8x128xf32> to vector<8x128xbf16>
    %c0_38 = arith.constant 0 : index
    %c0_39 = arith.constant 0 : index
    %199 = vector.load %arg6[%c0_38, %c0_39] : memref<128x128xbf16, #tpu.memory_space<vmem>>, vector<128x128xbf16>
    %cst_40 = arith.constant dense<0.000000e+00> : vector<8x128xf32>
    %200 = tpu.matmul %198, %199, %cst_40 {dimension_numbers = #tpu.dot_dimension_numbers<[1], [0], [0], [1], [0, 0, 1, 1], [], []>} : vector<8x128xbf16>, vector<128x128xbf16>, vector<8x128xf32> -> vector<8x128xf32>
    %c0_41 = arith.constant 0 : index
    %c0_42 = arith.constant 0 : index
    %201 = vector.load %arg7[%c0_41, %c0_42] : memref<1x128xf32, #tpu.memory_space<vmem>>, vector<1x128xf32>
    %202 = vector.broadcast %201 : vector<1x128xf32> to vector<8x128xf32>
    %203 = arith.addf %200, %202 : vector<8x128xf32>
    %c0_43 = arith.constant 0 : index
    %c0_44 = arith.constant 0 : index
    %204 = vector.load %arg8[%c0_43, %c0_44] : memref<8x128xf32, #tpu.memory_space<vmem>>, vector<8x128xf32>
    tpu.vector_store %arg8[%c0_43, %c0_44], %203 {strides = array<i32>} : memref<8x128xf32, #tpu.memory_space<vmem>>, vector<8x128xf32>,
    return
  }
  func.func @transform_0(%arg0: i32) -> (i32, i32, i32) {
    %c0_i32 = arith.constant 0 : i32
    %c0_i32_0 = arith.constant 0 : i32
    %c0_i32_1 = arith.constant 0 : i32
    return %arg0, %c0_i32, %c0_i32_0 : i32, i32, i32
  }
  func.func @transform_1(%arg0: i32) -> (i32, i32) {
    %c0_i32 = arith.constant 0 : i32
    %c0_i32_0 = arith.constant 0 : i32
    %c0_i32_1 = arith.constant 0 : i32
    return %c0_i32, %c0_i32_0 : i32, i32
  }
  func.func @transform_2(%arg0: i32) -> (i32, i32) {
    %c0_i32 = arith.constant 0 : i32
    %c0_i32_0 = arith.constant 0 : i32
    %c0_i32_1 = arith.constant 0 : i32
    return %c0_i32, %c0_i32_0 : i32, i32
  }
  func.func @transform_3(%arg0: i32) -> (i32, i32) {
    %c0_i32 = arith.constant 0 : i32
    %c0_i32_0 = arith.constant 0 : i32
    %c0_i32_1 = arith.constant 0 : i32
    return %c0_i32, %c0_i32_0 : i32, i32
  }
  func.func @transform_4(%arg0: i32) -> (i32, i32) {
    %c0_i32 = arith.constant 0 : i32
    %c0_i32_0 = arith.constant 0 : i32
    %c0_i32_1 = arith.constant 0 : i32
    return %c0_i32, %c0_i32_0 : i32, i32
  }
  func.func @transform_5(%arg0: i32) -> (i32, i32) {
    %c0_i32 = arith.constant 0 : i32
    %c0_i32_0 = arith.constant 0 : i32
    %c0_i32_1 = arith.constant 0 : i32
    return %c0_i32, %c0_i32_0 : i32, i32
  }
  func.func @transform_6(%arg0: i32) -> (i32, i32) {
    %c0_i32 = arith.constant 0 : i32
    %c0_i32_0 = arith.constant 0 : i32
    %c0_i32_1 = arith.constant 0 : i32
    return %c0_i32, %c0_i32_0 : i32, i32
  }
  func.func @transform_7(%arg0: i32) -> (i32, i32) {
    %c0_i32 = arith.constant 0 : i32
    %c0_i32_0 = arith.constant 0 : i32
    return %arg0, %c0_i32 : i32, i32
  }
}

</mosaic_0001>

<bundles_post_ra>
// kernel: tpu_custom_call.1
= control target key start
LH: loop header
LB: loop body
LE: loop exit
PB: predicated region body
PF: predicated region fallthrough
CT: control target
= control target key end

     0   :  { %v4596_v6 = vmov 0.0   ;;  %s4597_s17 = smov 32   ;;  %s6882_s0 = inlined_call_operand.vmem [shape: bf16[8,8,256], index: 0, kind: input, shape index: {}]   ;;  %s6883_s1 = inlined_call_operand.vmem [shape: bf16[256,48], index: 1, kind: input, shape index: {}]   ;;  %s6884_s2 = inlined_call_operand.vmem [shape: f32[1,48], index: 2, kind: input, shape index: {}]   ;;  %s6885_s3 = inlined_call_operand.vmem [shape: f32[16,48], index: 3, kind: input, shape index: {}]   ;;  %s6886_s4 = inlined_call_operand.vmem [shape: f32[1,16], index: 4, kind: input, shape index: {}]   ;;  %s6887_s5 = inlined_call_operand.vmem [shape: bf16[128,128], index: 5, kind: input, shape index: {}]   ;;  %s6888_s6 = inlined_call_operand.vmem [shape: f32[1,128], index: 6, kind: input, shape index: {}]   ;;  %s6889_s7 = inlined_call_operand.hbm [shape: f32[8,128], index: 7, kind: output, shape index: {}]  }
   0x1   :  { %v4648_v0 = vld [vmem:[%s6885_s3 + $0x8] sm:$0xff]  ;;  %v4155_v1 = vld [vmem:[%s6883_s1 + $0x38] sm:$0xff]  ;;  %v4656_v2 = vld [vmem:[%s6885_s3] sm:$0xff] }
   0x2   :  { %288 = vmatpush.msra.mxu2 %v4648_v0  ;;  %v4163_v3 = vld [vmem:[%s6883_s1 + $0x78] sm:$0xff]  ;;  %699 = vmatpush.msra.mxu3 %v4648_v0  ;;  %v4154_v4 = vld [vmem:[%s6883_s1 + $0x30] sm:$0xff]  ;;  %v4181_v7 = vld [vmem:[%s6886_s4] ss:$0 sm:$0xff] }
   0x3   :  { %207 = vmatpush.bf16.msra.mxu0 %v4155_v1  ;;  %236 = vmatpush.bf16.msra.mxu1 %v4163_v3  ;;  %v4162_v5 = vld [vmem:[%s6883_s1 + $0x70] sm:$0xff]  ;;  %v4153_v8 = vld [vmem:[%s6883_s1 + $0x28] sm:$0xff] }
   0x4   :  { %289 = vmatpush.msra.mxu2 %v4656_v2  ;;  %700 = vmatpush.msra.mxu3 %v4656_v2  ;;  %v4161_v9 = vld [vmem:[%s6883_s1 + $0x68] sm:$0xff] }
   0x5   :  { %290 = vmatmul.f32.vlgmr.msra.gmra.mxu2 %v4596_v6  ;;  %470 = vrot.lane.b32.xlu0 %v4181_v7, %s4597_s17 }
   0x6   :  { %1153 = vmatpush.msrb.mxu2 %v4648_v0  ;;  %1603 = vmatpush.msrb.mxu3 %v4648_v0 }
   0x7   :  { %208 = vmatpush.bf16.msra.mxu0 %v4154_v4  ;;  %237 = vmatpush.bf16.msra.mxu1 %v4162_v5 }
   0x8   :  { %1154 = vmatpush.msrb.mxu2 %v4656_v2  ;;  %1604 = vmatpush.msrb.mxu3 %v4656_v2 }
   0xa   :  { %2057 = vmatpush.msra.mxu2 %v4648_v0 }
   0xb   :  { %12 = vsyncpa [#allocation4], 0  ;;  %209 = vmatpush.bf16.msra.mxu0 %v4153_v8  ;;  %v4152_v10 = vld [vmem:[%s6883_s1 + $0x20] sm:$0xff]  ;;  %238 = vmatpush.bf16.msra.mxu1 %v4161_v9  ;;  %v4151_v12 = vld [vmem:[%s6883_s1 + $0x18] sm:$0xff]  ;;  %s4598_s24 = smov 96   ;;  %s4600_s26 = smov 16  }
   0xc   :  { %2058 = vmatpush.msra.mxu2 %v4656_v2  ;;  %v4160_v11 = vld [vmem:[%s6883_s1 + $0x60] sm:$0xff]  ;;  %v4159_v13 = vld [vmem:[%s6883_s1 + $0x58] sm:$0xff]  ;;  %v4150_v14 = vld [vmem:[%s6883_s1 + $0x10] sm:$0xff]  ;;  %s4603_s30 = smov 80   ;;  %s4604_s25 = smov [#allocation3]  }
   0xd   :  { %v4158_v15 = vld [vmem:[%s6883_s1 + $0x50] sm:$0xff]  ;;  %v4149_v16 = vld [vmem:[%s6883_s1 + $0x8] sm:$0xff]  ;;  %v4148_v18 = vld [vmem:[%s6883_s1] sm:$0xff] }
   0xe   :  { %v4157_v17 = vld [vmem:[%s6883_s1 + $0x48] sm:$0xff]  ;;  %v3943_v19 = vld [vmem:[%s6882_s0] sm:$0xf]  ;;  %v4140_v22 = vld [vmem:[%s6882_s0 + $0x4] sm:$0xf] }
   0xf   :  { %210 = vmatpush.bf16.msra.mxu0 %v4152_v10  ;;  %239 = vmatpush.bf16.msra.mxu1 %v4160_v11  ;;  %v4141_v20 = vld [vmem:[%s6882_s0 + $0x4] sm:$0xf0]  ;;  %v4156_v21 = vld [vmem:[%s6883_s1 + $0x40] sm:$0xff]  ;;  %v3945_v23 = vld [vmem:[%s6882_s0 + $0x8] sm:$0xf0] }
  0x10   :  { %v3944_v24 = vor.u32 %v4141_v20, %v3943_v19  ;;  %v3948_v25 = vor.u32 %v4140_v22, %v3945_v23  ;;  %v3951_v26 = vld [vmem:[%s6882_s0 + $0x10] sm:$0xf]  ;;  %v4143_v27 = vld [vmem:[%s6882_s0 + $0x14] sm:$0xf0]  ;;  %v4142_v28 = vld [vmem:[%s6882_s0 + $0x14] sm:$0xf] }
  0x11   :  { %v3953_v29 = vld [vmem:[%s6882_s0 + $0x18] sm:$0xf0]  ;;  %v3952_v30 = vor.u32 %v4143_v27, %v3951_v26  ;;  %v3959_v32 = vld [vmem:[%s6882_s0 + $0x20] sm:$0xf]  ;;  %v4145_v33 = vld [vmem:[%s6882_s0 + $0x24] sm:$0xf0] }
  0x12   :  { %v3956_v31 = vor.u32 %v4142_v28, %v3953_v29  ;;  %v4144_v34 = vld [vmem:[%s6882_s0 + $0x24] sm:$0xf]  ;;  %v3961_v35 = vld [vmem:[%s6882_s0 + $0x28] sm:$0xf0]  ;;  %v3960_v36 = vor.u32 %v4145_v33, %v3959_v32  ;;  %v3967_v38 = vld [vmem:[%s6882_s0 + $0x30] sm:$0xf] }
  0x13   :  { %211 = vmatpush.bf16.msra.mxu0 %v4151_v12  ;;  %240 = vmatpush.bf16.msra.mxu1 %v4159_v13  ;;  %v3964_v37 = vor.u32 %v4144_v34, %v3961_v35  ;;  %v4147_v39 = vld [vmem:[%s6882_s0 + $0x34] sm:$0xf0]  ;;  %v4146_v40 = vld [vmem:[%s6882_s0 + $0x34] sm:$0xf]  ;;  %v3969_v41 = vld [vmem:[%s6882_s0 + $0x38] sm:$0xf0] }
  0x14   :  { %v3968_v42 = vor.u32 %v4147_v39, %v3967_v38  ;;  %v3972_v43 = vor.u32 %v4146_v40, %v3969_v41  ;;  %v4182_v62 = vld [vmem:[%s6884_s2] ss:$0 sm:$0xff]  ;;  %s4599_s2 = smov 112  }
  0x17   :  { %212 = vmatpush.bf16.msra.mxu0 %v4150_v14  ;;  %241 = vmatpush.bf16.msra.mxu1 %v4158_v15 }
  0x1b   :  { %213 = vmatpush.bf16.msra.mxu0 %v4149_v16  ;;  %242 = vmatpush.bf16.msra.mxu1 %v4157_v17 }
  0x1f   :  { %214 = vmatpush.bf16.msra.mxu0 %v4148_v18  ;;  %243 = vmatpush.bf16.msra.mxu1 %v4156_v21 }
  0x22   :  { %215 = vmatmul.bf16.vlgmr.msra.gmra.mxu0 %v3944_v24  ;;  %244 = vmatmul.bf16.vlgmr.msra.gmra.mxu1 %v3948_v25 }
  0x32   :  { %220 = vmatmul.bf16.gmra.mxu0 %v3952_v30  ;;  %249 = vmatmul.bf16.gmra.mxu1 %v3956_v31 }
  0x42   :  { %225 = vmatmul.bf16.gmra.mxu0 %v3960_v36  ;;  %254 = vmatmul.bf16.gmra.mxu1 %v3964_v37 }
  0x52   :  { %230 = vmatmul.bf16.gmra.mxu0 %v3968_v42  ;;  %259 = vmatmul.bf16.gmra.mxu1 %v3972_v43 }
  0x77   :  { %v4765_v44 = vpop.permute.xlu0 %470 }
  0x88   :  { %v4767_v45 = vpop.f32.mrf.mxu2 }
  0x89   :  { %v473_v46 = vadd.f32 %v4765_v44, %v4767_v45  ;;  %v295_v12 = vrot.slane %v4767_v45, 1  ;;  %v296_v20 = vrot.slane %v4767_v45, 2  ;;  %v297_v22 = vrot.slane %v4767_v45, 3 }
  0x8a   :  { %v299_v27 = vrot.slane %v4767_v45, 5  ;;  %v298_v37 = vrot.slane %v4767_v45, 4  ;;  %v300_v43 = vrot.slane %v4767_v45, 6 }
  0x8b   :  { %482 = vrot.lane.b32.xlu1 %v473_v46, %s4598_s24  ;;  %v477_v47 = vrot.slane %v473_v46, 3  ;;  %v475_v48 = vrot.slane %v473_v46, 1  ;;  %v476_v49 = vrot.slane %v473_v46, 2  ;;  %v478_v50 = vrot.slane %v473_v46, 4 }
  0x8c   :  { %v479_v51 = vrot.slane %v473_v46, 5  ;;  %v480_v52 = vrot.slane %v473_v46, 6  ;;  %v481_v53 = vrot.slane %v473_v46, 7 }
  0x8d   :  { %488 = vrot.lane.b32.xlu2 %v477_v47, %s4598_s24  ;;  %484 = vrot.lane.b32.xlu0 %v475_v48, %s4598_s24 }
  0x93   :  { %486 = vrot.lane.b32.xlu1 %v476_v49, %s4598_s24 }
  0x95   :  { %490 = vrot.lane.b32.xlu2 %v478_v50, %s4598_s24  ;;  %492 = vrot.lane.b32.xlu0 %v479_v51, %s4598_s24  ;;  %v301_v50 = vrot.slane %v4767_v45, 7 }
  0x9b   :  { %494 = vrot.lane.b32.xlu1 %v480_v52, %s4598_s24 }
  0x9d   :  { %496 = vrot.lane.b32.xlu2 %v481_v53, %s4598_s24 }
  0x9f   :  { %v216_v54 = vpop.f32.mrf.mxu0  ;;  %v245_v55 = vpop.f32.mrf.mxu1 }
  0xa0   :  { %v217_v3 = vadd.f32 %v4182_v62, %v216_v54 }
  0xa2   :  { %v4782_v4 = vadd.f32 %v245_v55, %v217_v3 }
  0xa4   :  { %v310_v9 = vadd.f32 %v4767_v45, %v4782_v4 }
  0xa6   :  { %v4037_v14 = vmul.f32 -1.442695, %v310_v9 }
  0xa7   :  { %v218_v56 = vpop.f32.mrf.mxu0  ;;  %v247_v57 = vpop.f32.mrf.mxu1 }
  0xa8   :  { %v219_v5 = vadd.f32 %v4182_v62, %v218_v56  ;;  %4184 = vpow2.f32 %v4037_v14 }
  0xaa   :  { %v4784_v8 = vadd.f32 %v247_v57, %v219_v5 }
  0xac   :  { %v311_v15 = vadd.f32 %v295_v12, %v4784_v8 }
  0xae   :  { %v4038_v23 = vmul.f32 -1.442695, %v311_v15  ;;  %v4185_v32 = vpop.eup %4184 }
  0xaf   :  { %v221_v58 = vpop.f32.mrf.mxu0  ;;  %v250_v59 = vpop.f32.mrf.mxu1  ;;  %v4807_v40 = vadd.f32 1.0, %v4185_v32 }
  0xb0   :  { %v222_v10 = vadd.f32 %v4182_v62, %v221_v58  ;;  %4186 = vpow2.f32 %v4038_v23 }
  0xb1   :  { %v361_v23 = vand.u32 2147483648, %v4807_v40  ;;  %vm355_vm1 = vweird.f32 %v4807_v40 }
  0xb2   :  { %v4790_v16 = vadd.f32 %v250_v59, %v222_v10 }
  0xb4   :  { %v312_v24 = vadd.f32 %v296_v20, %v4790_v16 }
  0xb6   :  { %v4039_v31 = vmul.f32 -1.442695, %v312_v24  ;;  %v4187_v41 = vpop.eup %4186  ;;  %v359_v24 = vand.u32 2147483647, %v4807_v40 }
  0xb7   :  { %v223_v60 = vpop.f32.mrf.mxu0  ;;  %v252_v61 = vpop.f32.mrf.mxu1  ;;  %v4815_v48 = vadd.f32 1.0, %v4187_v41 }
  0xb8   :  { %v224_v11 = vadd.f32 %v4182_v62, %v223_v60  ;;  %4188 = vpow2.f32 %v4039_v31  ;;  %vm360_vm4 = vcmp.eq.f32.partialorder %v359_v24, 8.507059e+37 }
  0xb9   :  { %vm370_vm5 = vweird.f32 %v4815_v48 }
  0xba   :  { %v4792_v18 = vadd.f32 %v252_v61, %v224_v11 }
  0xbc   :  { %v313_v26 = vadd.f32 %v297_v22, %v4792_v18 }
  0xbe   :  { %v4040_v34 = vmul.f32 -1.442695, %v313_v26  ;;  %v4189_v51 = vpop.eup %4188 }
  0xbf   :  { %v226_v63 = vpop.f32.mrf.mxu0  ;;  %v255_v1 = vpop.f32.mrf.mxu1  ;;  %v4820_v56 = vadd.f32 1.0, %v4189_v51 }
  0xc0   :  { %v227_v25 = vadd.f32 %v4182_v62, %v226_v63  ;;  %4190 = vpow2.f32 %v4040_v34 }
  0xc1   :  { %vm385_vm8 = vweird.f32 %v4820_v56 }
  0xc2   :  { %v4802_v33 = vadd.f32 %v255_v1, %v227_v25 }
  0xc4   :  { %v314_v42 = vadd.f32 %v298_v37, %v4802_v33 }
  0xc6   :  { %v4041_v49 = vmul.f32 -1.442695, %v314_v42  ;;  %v4191_v52 = vpop.eup %4190 }
  0xc7   :  { %v228_v6 = vpop.f32.mrf.mxu0  ;;  %v257_v7 = vpop.f32.mrf.mxu1  ;;  %v4822_v58 = vadd.f32 1.0, %v4191_v52 }
  0xc8   :  { %v229_v13 = vadd.f32 %v4182_v62, %v228_v6 }
  0xc9   :  { %v404_v51 = vand.u32 2147483647, %v4822_v58  ;;  %v406_v52 = vand.u32 2147483648, %v4822_v58  ;;  %vm400_vm12 = vweird.f32 %v4822_v58 }
  0xca   :  { %v4795_v21 = vadd.f32 %v257_v7, %v229_v13 }
  0xcc   :  { %v315_v29 = vadd.f32 %v299_v27, %v4795_v21 }
  0xce   :  { %v4042_v38 = vmul.f32 -1.442695, %v315_v29  ;;  %v376_v29 = vand.u32 2147483648, %v4815_v48 }
  0xcf   :  { %v231_v17 = vpop.f32.mrf.mxu0  ;;  %v260_v19 = vpop.f32.mrf.mxu1 }
  0xd0   :  { %v232_v28 = vadd.f32 %v4182_v62, %v231_v17  ;;  %4192 = vpow2.f32 %v4042_v38 }
  0xd1   :  { %4194 = vrcp.f32 %v4807_v40 }
  0xd2   :  { %v4804_v35 = vadd.f32 %v260_v19, %v232_v28  ;;  %4196 = vrcp.f32 %v4815_v48  ;;  %v374_v28 = vand.u32 2147483647, %v4815_v48 }
  0xd3   :  { %4198 = vpow2.f32 %v4041_v49 }
  0xd4   :  { %v316_v47 = vadd.f32 %v300_v43, %v4804_v35  ;;  %vm4878_vm7 = vcmp.eq.f32.partialorder %v374_v28, 8.507059e+37  ;;  %v377_v43 = vor.u32 1.1754944e-38, %v376_v29 }
  0xd6   :  { %v4043_v54 = vmul.f32 -1.442695, %v316_v47  ;;  %v4193_v55 = vpop.eup %4192 }
  0xd7   :  { %v233_v30 = vpop.f32.mrf.mxu0  ;;  %v262_v39 = vpop.f32.mrf.mxu1  ;;  %v4824_v60 = vadd.f32 1.0, %v4193_v55  ;;  %v391_v55 = vand.u32 2147483648, %v4820_v56 }
  0xd8   :  { %v234_v36 = vadd.f32 %v4182_v62, %v233_v30  ;;  %v4195_v57 = vpop.eup %4194  ;;  %4200 = vpow2.f32 %v4043_v54  ;;  %v389_v54 = vand.u32 2147483647, %v4820_v56 }
  0xd9   :  { %v351_v45 = vmul.f32 %v4195_v57, %v4807_v40  ;;  %4202 = vrcp.f32 %v4820_v56  ;;  %v4828_v61 = vpop.eup %4196  ;;  %vm356_vm0 = vweird.f32 %v4195_v57  ;;  %vm430_vm15 = vweird.f32 %v4824_v60 }
  0xda   :  { %v4811_v46 = vadd.f32 %v262_v39, %v234_v36  ;;  %4204 = vrcp.f32 %v4822_v58  ;;  %v4199_v62 = vpop.eup %4198  ;;  %v366_v3 = vmul.f32 %v4828_v61, %v4815_v48  ;;  %vm357_vm2 = vmor %vm355_vm1, %vm356_vm0  ;;  %vm371_vm3 = vweird.f32 %v4828_v61 }
  0xdb   :  { %v352_v1 = vsub.f32 1.0, %v351_v45  ;;  %v4834_v5 = vadd.f32 1.0, %v4199_v62  ;;  %v362_v36 = vor.u32 1.1754944e-38, %v361_v23  ;;  %vm4874_vm6 = vmor %vm370_vm5, %vm371_vm3  ;;  %vm405_vm0 = vcmp.eq.f32.partialorder %v404_v51, 8.507059e+37 }
  0xdc   :  { %v317_v53 = vadd.f32 %v301_v50, %v4811_v46  ;;  %v367_v12 = vsub.f32 1.0, %v366_v3  ;;  %vm390_vm1 = vcmp.eq.f32.partialorder %v389_v54, 8.507059e+37  ;;  %v392_v23 = vor.u32 1.1754944e-38, %v391_v55 }
  0xdd   :  { %v353_v11 = vmul.f32 %v4195_v57, %v352_v1  ;;  %vm415_vm3 = vweird.f32 %v4834_v5 }
  0xde   :  { %v4044_v59 = vmul.f32 -1.442695, %v317_v53  ;;  %v4201_v63 = vpop.eup %4200  ;;  %v368_v20 = vmul.f32 %v4828_v61, %v367_v12 }
  0xdf   :  { %v4836_v6 = vpop.eup %4202  ;;  %v4840_v9 = vadd.f32 1.0, %v4201_v63  ;;  %v354_v19 = vadd.f32 %v4195_v57, %v353_v11 }
  0xe0   :  { %4206 = vpow2.f32 %v4044_v59  ;;  %v4838_v7 = vpop.eup %4204  ;;  %v381_v14 = vmul.f32 %v4836_v6, %v4820_v56  ;;  %v369_v31 = vadd.f32 %v4828_v61, %v368_v20  ;;  %vm386_vm9 = vweird.f32 %v4836_v6 }
  0xe1   :  { %4208 = vrcp.f32 %v4824_v60  ;;  %v396_v15 = vmul.f32 %v4838_v7, %v4822_v58  ;;  %v358_v30 = vsel %vm357_vm2, %v4195_v57, %v354_v19  ;;  %vm401_vm10 = vweird.f32 %v4838_v7  ;;  %vm4913_vm13 = vmor %vm385_vm8, %vm386_vm9 }
  0xe2   :  { %4210 = vrcp.f32 %v4834_v5  ;;  %v382_v25 = vsub.f32 1.0, %v381_v14  ;;  %v4872_v40 = vsel %vm360_vm4, %v362_v36, %v358_v30  ;;  %v373_v47 = vsel %vm4874_vm6, %v4828_v61, %v369_v31  ;;  %vm4918_vm14 = vmor %vm400_vm12, %vm401_vm10 }
  0xe3   :  { %4212 = vrcp.f32 %v4840_v9  ;;  %v397_v27 = vsub.f32 1.0, %v396_v15  ;;  %v4902_v63 = vsel %vm4878_vm7, %v377_v43, %v373_v47  ;;  %v436_v15 = vand.u32 2147483648, %v4824_v60 }
  0xe4   :  { %v383_v38 = vmul.f32 %v4836_v6, %v382_v25  ;;  %v434_v56 = vand.u32 2147483647, %v4824_v60  ;;  %v407_v25 = vor.u32 1.1754944e-38, %v406_v52  ;;  %v451_v47 = vand.u32 2147483648, %v4840_v9 }
  0xe5   :  { %v398_v39 = vmul.f32 %v4838_v7, %v397_v27  ;;  %v437_v29 = vor.u32 1.1754944e-38, %v436_v15  ;;  %vm445_vm8 = vweird.f32 %v4840_v9 }
  0xe6   :  { %v4207_v10 = vpop.eup %4206  ;;  %v384_v45 = vadd.f32 %v4836_v6, %v383_v38  ;;  %vm435_vm5 = vcmp.eq.f32.partialorder %v434_v56, 8.507059e+37 }
  0xe7   :  { %v4842_v13 = vpop.eup %4208  ;;  %v4849_v17 = vadd.f32 1.0, %v4207_v10  ;;  %v399_v61 = vadd.f32 %v4838_v7, %v398_v39  ;;  %v489_v12 = vpop.permute.xlu2 %488 }
  0xe8   :  { %v426_v22 = vmul.f32 %v4842_v13, %v4824_v60  ;;  %v4858_v26 = vpop.eup %4210  ;;  %vm431_vm11 = vweird.f32 %v4842_v13  ;;  %v388_v58 = vsel %vm4913_vm13, %v4836_v6, %v384_v45 }
  0xe9   :  { %4214 = vrcp.f32 %v4849_v17  ;;  %v4865_v34 = vpop.eup %4212  ;;  %v411_v37 = vmul.f32 %v4858_v26, %v4834_v5  ;;  %vm4934_vm2 = vmor %vm430_vm15, %vm431_vm11  ;;  %vm416_vm4 = vweird.f32 %v4858_v26  ;;  %v4944_v28 = vsel %vm390_vm1, %v392_v23, %v388_v58 }
  0xea   :  { %v427_v32 = vsub.f32 1.0, %v426_v22  ;;  %v441_v49 = vmul.f32 %v4865_v34, %v4840_v9  ;;  %v403_v22 = vsel %vm4918_vm14, %v4838_v7, %v399_v61  ;;  %vm446_vm6 = vweird.f32 %v4865_v34  ;;  %vm417_vm7 = vmor %vm415_vm3, %vm416_vm4 }
  0xeb   :  { %v412_v57 = vsub.f32 1.0, %v411_v37  ;;  %v4946_v30 = vsel %vm405_vm0, %v407_v25, %v403_v22  ;;  %v421_v37 = vand.u32 2147483648, %v4834_v5  ;;  %vm447_vm9 = vmor %vm445_vm8, %vm446_vm6  ;;  %vm460_vm12 = vweird.f32 %v4849_v17 }
  0xec   :  { %v428_v48 = vmul.f32 %v4842_v13, %v427_v32  ;;  %v442_v11 = vsub.f32 1.0, %v441_v49  ;;  %v509_v36 = vmul.f32 %v489_v12, %v4946_v30  ;;  %v449_v49 = vand.u32 2147483647, %v4840_v9 }
  0xed   :  { %v413_v20 = vmul.f32 %v4858_v26, %v412_v57  ;;  %v422_v52 = vor.u32 1.1754944e-38, %v421_v37  ;;  %v452_v57 = vor.u32 1.1754944e-38, %v451_v47  ;;  %v464_v9 = vand.u32 2147483647, %v4849_v17 }
  0xee   :  { %v429_v10 = vadd.f32 %v4842_v13, %v428_v48  ;;  %v443_v60 = vmul.f32 %v4865_v34, %v442_v11  ;;  %vm450_vm13 = vcmp.eq.f32.partialorder %v449_v49, 8.507059e+37  ;;  %vm659_vm0 = vcmask 1041409  }
  0xef   :  { %v4889_v50 = vpop.eup %4214  ;;  %v414_v31 = vadd.f32 %v4858_v26, %v413_v20  ;;  %v491_v51 = vpop.permute.xlu2 %490  ;;  %vm465_vm15 = vcmp.eq.f32.partialorder %v464_v9, 8.507059e+37  ;;  %vm662_vm1 = vcmask 1042434   ;;  %vm668_vm3 = vcmask 1044484  }
  0xf0   :  { %v456_v1 = vmul.f32 %v4889_v50, %v4849_v17  ;;  %v433_v6 = vsel %vm4934_vm2, %v4842_v13, %v429_v10  ;;  %v419_v13 = vand.u32 2147483647, %v4834_v5  ;;  %v444_v43 = vadd.f32 %v4865_v34, %v443_v60 }
  0xf1   :  { %v4953_v39 = vsel %vm435_vm5, %v437_v29, %v433_v6  ;;  %v418_v48 = vsel %vm417_vm7, %v4858_v26, %v414_v31  ;;  %vm461_vm11 = vweird.f32 %v4889_v50  ;;  %v466_v26 = vand.u32 2147483648, %v4849_v17 }
  0xf2   :  { %v457_v27 = vsub.f32 1.0, %v456_v1  ;;  %vm420_vm10 = vcmp.eq.f32.partialorder %v419_v13, 8.507059e+37  ;;  %v448_v5 = vsel %vm447_vm9, %v4865_v34, %v444_v43  ;;  %vm462_vm14 = vmor %vm460_vm12, %vm461_vm11  ;;  %vm665_vm2 = vcmask 1043459  }
  0xf3   :  { %v4973_v54 = vsel %vm420_vm10, %v422_v52, %v418_v48  ;;  %v4979_v45 = vsel %vm450_vm13, %v452_v57, %v448_v5  ;;  %vm671_vm4 = vcmask 1045509   ;;  %vm674_vm5 = vcmask 1046534  }
  0xf4   :  { %v458_v41 = vmul.f32 %v4889_v50, %v457_v27  ;;  %vm677_vm6 = vcmask 1047559   ;;  %vm270_vm7 = vcmask 130048  }
  0xfd   :  { %v483_v53 = vpop.permute.xlu1 %482 }
  0xfe   :  { %v506_v59 = vmul.f32 %v483_v53, %v4872_v40  ;;  %v459_v53 = vadd.f32 %v4889_v50, %v458_v41 }
  0xff   :  { %v485_v62 = vpop.permute.xlu0 %484 }
 0x100   :  { %v507_v3 = vmul.f32 %v485_v62, %v4902_v63  ;;  %522 = vrot.lane.b32.xlu2 %v506_v59, %s4597_s17  ;;  %v510_v59 = vmul.f32 %v491_v51, %v4973_v54  ;;  %v463_v61 = vsel %vm462_vm14, %v4889_v50, %v459_v53  ;;  %v467_v62 = vor.u32 1.1754944e-38, %v466_v26 }
 0x102   :  { %524 = vrot.lane.b32.xlu0 %v507_v3, %s4597_s17  ;;  %v4985_v1 = vsel %vm465_vm15, %v467_v62, %v463_v61  ;;  %v497_v3 = vpop.permute.xlu2 %496 }
 0x103   :  { %v513_v10 = vmul.f32 %v497_v3, %v4985_v1 }
 0x105   :  { %v487_v7 = vpop.permute.xlu1 %486 }
 0x106   :  { %v508_v32 = vmul.f32 %v487_v7, %v4944_v28 }
 0x107   :  { %v493_v38 = vpop.permute.xlu0 %492 }
 0x108   :  { %v511_v42 = vmul.f32 %v493_v38, %v4953_v39  ;;  %526 = vrot.lane.b32.xlu1 %v508_v32, %s4597_s17 }
 0x10a   :  { %528 = vrot.lane.b32.xlu0 %v509_v36, %s4597_s17  ;;  %532 = vrot.lane.b32.xlu2 %v511_v42, %s4597_s17 }
 0x10d   :  { %v495_v55 = vpop.permute.xlu1 %494 }
 0x10e   :  { %v512_v34 = vmul.f32 %v495_v55, %v4979_v45 }
 0x110   :  { %530 = vrot.lane.b32.xlu1 %v510_v59, %s4597_s17 }
 0x112   :  { %534 = vrot.lane.b32.xlu0 %v512_v34, %s4597_s17 }
 0x118   :  { %536 = vrot.lane.b32.xlu1 %v513_v10, %s4597_s17 }
 0x15a   :  { %v523_v17 = vpop.permute.xlu2 %522 }
 0x15b   :  { %v546_v11 = vadd.f32 %v523_v17, %v4782_v4 }
 0x15d   :  { %4216 = vtanh.f32 %v546_v11 }
 0x163   :  { %v4990_v50 = vpop.eup %4216 }
 0x164   :  { %v533_v12 = vpop.permute.xlu2 %532  ;;  %v562_v14 = vsub.f32 0.0, %v4990_v50 }
 0x165   :  { %v551_v15 = vadd.f32 %v533_v12, %v4795_v21 }
 0x166   :  { %578 = vrot.lane.b32.xlu1 %v562_v14, %s4599_s2 }
 0x167   :  { %4218 = vtanh.f32 %v551_v15 }
 0x16d   :  { %v4995_v19 = vpop.eup %4218 }
 0x16e   :  { %v567_v20 = vsub.f32 0.0, %v4995_v19 }
 0x170   :  { %588 = vrot.lane.b32.xlu1 %v567_v20, %s4599_s2 }
 0x174   :  { %v525_v58 = vpop.permute.xlu0 %524 }
 0x175   :  { %v547_v56 = vadd.f32 %v525_v58, %v4784_v8 }
 0x177   :  { %4220 = vtanh.f32 %v547_v56 }
 0x17a   :  { %v527_v22 = vpop.permute.xlu1 %526 }
 0x17b   :  { %v548_v23 = vadd.f32 %v527_v22, %v4790_v16 }
 0x17c   :  { %v529_v24 = vpop.permute.xlu0 %528 }
 0x17d   :  { %v4221_v25 = vpop.eup %4220  ;;  %4222 = vtanh.f32 %v548_v23  ;;  %v549_v27 = vadd.f32 %v529_v24, %v4792_v18 }
 0x17e   :  { %v563_v6 = vsub.f32 0.0, %v4221_v25 }
 0x17f   :  { %4224 = vtanh.f32 %v549_v27 }
 0x180   :  { %580 = vrot.lane.b32.xlu2 %v563_v6, %s4599_s2 }
 0x182   :  { %v531_v60 = vpop.permute.xlu1 %530 }
 0x183   :  { %v4223_v7 = vpop.eup %4222  ;;  %v550_v29 = vadd.f32 %v531_v60, %v4802_v33 }
 0x184   :  { %v535_v31 = vpop.permute.xlu0 %534  ;;  %v564_v32 = vsub.f32 0.0, %v4223_v7 }
 0x185   :  { %v4225_v36 = vpop.eup %4224  ;;  %4226 = vtanh.f32 %v550_v29  ;;  %v552_v13 = vadd.f32 %v535_v31, %v4804_v35 }
 0x186   :  { %582 = vrot.lane.b32.xlu0 %v564_v32, %s4599_s2  ;;  %v565_v37 = vsub.f32 0.0, %v4225_v36 }
 0x187   :  { %4228 = vtanh.f32 %v552_v13 }
 0x188   :  { %584 = vrot.lane.b32.xlu2 %v565_v37, %s4599_s2 }
 0x18a   :  { %v537_v38 = vpop.permute.xlu1 %536 }
 0x18b   :  { %v4227_v41 = vpop.eup %4226  ;;  %v553_v42 = vadd.f32 %v537_v38, %v4811_v46 }
 0x18c   :  { %v566_v43 = vsub.f32 0.0, %v4227_v41 }
 0x18d   :  { %v4229_v47 = vpop.eup %4228  ;;  %4230 = vtanh.f32 %v553_v42 }
 0x18e   :  { %586 = vrot.lane.b32.xlu0 %v566_v43, %s4599_s2  ;;  %v568_v48 = vsub.f32 0.0, %v4229_v47 }
 0x190   :  { %590 = vrot.lane.b32.xlu2 %v568_v48, %s4599_s2 }
 0x193   :  { %v4231_v49 = vpop.eup %4230 }
 0x194   :  { %v569_v51 = vsub.f32 0.0, %v4231_v49 }
 0x196   :  { %592 = vrot.lane.b32.xlu0 %v569_v51, %s4599_s2 }
 0x1d8   :  { %v579_v52 = vpop.permute.xlu1 %578 }
 0x1d9   :  { %v602_v53 = vmul.f32 %v579_v52, %v4872_v40 }
 0x1da   :  { %v581_v5 = vpop.permute.xlu2 %580 }
 0x1db   :  { %v603_v26 = vmul.f32 %v581_v5, %v4902_v63  ;;  %618 = vrot.lane.b32.xlu0 %v602_v53, %s4600_s26 }
 0x1dd   :  { %620 = vrot.lane.b32.xlu1 %v603_v26, %s4600_s26 }
 0x1e2   :  { %v589_v55 = vpop.permute.xlu1 %588  ;;  %v585_v57 = vpop.permute.xlu2 %584 }
 0x1e3   :  { %v607_v59 = vmul.f32 %v589_v55, %v4953_v39  ;;  %v605_v9 = vmul.f32 %v585_v57, %v4946_v30 }
 0x1e5   :  { %628 = vrot.lane.b32.xlu0 %v607_v59, %s4600_s26  ;;  %624 = vrot.lane.b32.xlu1 %v605_v9, %s4600_s26 }
 0x1ea   :  { %v591_v61 = vpop.permute.xlu2 %590 }
 0x1eb   :  { %v608_v40 = vmul.f32 %v591_v61, %v4979_v45 }
 0x1ed   :  { %630 = vrot.lane.b32.xlu1 %v608_v40, %s4600_s26 }
 0x1f8   :  { %v583_v63 = vpop.permute.xlu0 %582 }
 0x1f9   :  { %v604_v34 = vmul.f32 %v583_v63, %v4944_v28 }
 0x1fb   :  { %622 = vrot.lane.b32.xlu2 %v604_v34, %s4600_s26 }
 0x200   :  { %v587_v62 = vpop.permute.xlu0 %586 }
 0x201   :  { %v606_v3 = vmul.f32 %v587_v62, %v4973_v54 }
 0x203   :  { %626 = vrot.lane.b32.xlu2 %v606_v3, %s4600_s26 }
 0x208   :  { %v593_v30 = vpop.permute.xlu0 %592 }
 0x209   :  { %v609_v39 = vmul.f32 %v593_v30, %v4985_v1 }
 0x20b   :  { %632 = vrot.lane.b32.xlu2 %v609_v39, %s4600_s26 }
 0x24d   :  { %v619_v17 = vpop.permute.xlu0 %618 }
 0x24e   :  { %v5036_v20 = vadd.f32 %v4990_v50, %v619_v17 }
 0x24f   :  { %v621_v10 = vpop.permute.xlu1 %620 }
 0x250   :  { %v5027_v11 = vadd.f32 %v4221_v25, %v621_v10 }
 0x252   :  { %v658_v14 = vrot.slane %v5027_v11, 7 }
 0x254   :  { %v660_v56 = vsel %vm659_vm0, %v658_v14, %v5036_v20 }
 0x255   :  { %v623_v45 = vpop.permute.xlu2 %622 }
 0x256   :  { %v5029_v12 = vadd.f32 %v4223_v7, %v623_v45 }
 0x257   :  { %v625_v28 = vpop.permute.xlu1 %624  ;;  %v629_v1 = vpop.permute.xlu0 %628 }
 0x258   :  { %v5032_v15 = vadd.f32 %v4225_v36, %v625_v28  ;;  %v661_v54 = vrot.slane %v5029_v12, 6  ;;  %v5045_v27 = vadd.f32 %v4995_v19, %v629_v1 }
 0x25a   :  { %v664_v22 = vrot.slane %v5032_v15, 5  ;;  %v663_v24 = vsel %vm662_vm1, %v661_v54, %v660_v56  ;;  %v670_v29 = vrot.slane %v5045_v27, 3 }
 0x25c   :  { %v666_v60 = vsel %vm665_vm2, %v664_v22, %v663_v24 }
 0x25d   :  { %v627_v58 = vpop.permute.xlu2 %626 }
 0x25e   :  { %v5041_v23 = vadd.f32 %v4227_v41, %v627_v58 }
 0x25f   :  { %v631_v25 = vpop.permute.xlu1 %630 }
 0x260   :  { %v667_v50 = vrot.slane %v5041_v23, 4  ;;  %v5048_v6 = vadd.f32 %v4229_v47, %v631_v25 }
 0x262   :  { %v669_v7 = vsel %vm668_vm3, %v667_v50, %v666_v60  ;;  %v673_v31 = vrot.slane %v5048_v6, 2 }
 0x263   :  { %v672_v19 = vsel %vm671_vm4, %v670_v29, %v669_v7 }
 0x264   :  { %v675_v37 = vsel %vm674_vm5, %v673_v31, %v672_v19 }
 0x265   :  { %v633_v32 = vpop.permute.xlu2 %632 }
 0x266   :  { %v5054_v36 = vadd.f32 %v4231_v49, %v633_v32 }
 0x268   :  { %v676_v13 = vrot.slane %v5054_v36, 1 }
 0x26a   :  { %v678_v38 = vsel %vm677_vm6, %v676_v13, %v675_v37 }
 0x26b   :  { %679 = vrot.lane.b32.xlu0 %v678_v38, %s4598_s24 }
 0x2dd   :  { %v680_v41 = vpop.permute.xlu0 %679 }
 0x2de   :  { %682 = vst.msk [vmem:[#allocation2] sm:$0xff] %vm270_vm7, %v680_v41  ;;  %4045 = vmatmul.msk.f32.vlgmr.msra.gmra.mxu3 %vm270_vm7, %v680_v41 }
 0x2df   :  { %2511 = vmatpush.msra.mxu3 %v4648_v0 }
 0x2e1   :  { %2512 = vmatpush.msra.mxu3 %v4656_v2 }
 0x361   :  { %v5065_v42 = vpop.f32.mrf.mxu3 }
 0x362   :  { %v881_v43 = vadd.f32 %v5065_v42, %v4765_v44  ;;  %v707_v53 = vrot.slane %v5065_v42, 1  ;;  %v709_v55 = vrot.slane %v5065_v42, 3  ;;  %v712_v9 = vrot.slane %v5065_v42, 6 }
 0x363   :  { %v706_v62 = vrot.slane %v5065_v42, 7  ;;  %v722_v30 = vadd.f32 %v5065_v42, %v4784_v8  ;;  %v710_v45 = vrot.slane %v5065_v42, 4  ;;  %v708_v54 = vrot.slane %v5065_v42, 2 }
 0x364   :  { %892 = vrot.lane.b32.xlu0 %v881_v43, %s4598_s24  ;;  %v884_v47 = vrot.slane %v881_v43, 1  ;;  %v883_v48 = vrot.slane %v881_v43, 7  ;;  %v887_v49 = vrot.slane %v881_v43, 4  ;;  %v886_v51 = vrot.slane %v881_v43, 3 }
 0x365   :  { %v885_v0 = vrot.slane %v881_v43, 2  ;;  %v889_v2 = vrot.slane %v881_v43, 6  ;;  %v888_v52 = vrot.slane %v881_v43, 5  ;;  %v723_v5 = vadd.f32 %v707_v53, %v4790_v16 }
 0x366   :  { %894 = vrot.lane.b32.xlu2 %v884_v47, %s4598_s24  ;;  %890 = vrot.lane.b32.xlu1 %v883_v48, %s4598_s24  ;;  %v725_v57 = vadd.f32 %v709_v55, %v4802_v33  ;;  %v728_v40 = vadd.f32 %v712_v9, %v4811_v46  ;;  %v721_v39 = vadd.f32 %v706_v62, %v4782_v4  ;;  %v4047_v17 = vmul.f32 -1.442695, %v722_v30 }
 0x367   :  { %v4048_v26 = vmul.f32 -1.442695, %v723_v5  ;;  %v726_v56 = vadd.f32 %v710_v45, %v4795_v21  ;;  %v724_v22 = vadd.f32 %v708_v54, %v4792_v18  ;;  %v711_v31 = vrot.slane %v5065_v42, 5 }
 0x368   :  { %v4050_v59 = vmul.f32 -1.442695, %v725_v57  ;;  %v4053_v34 = vmul.f32 -1.442695, %v728_v40  ;;  %v4046_v14 = vmul.f32 -1.442695, %v721_v39 }
 0x369   :  { %4232 = vpow2.f32 %v4048_v26  ;;  %v4051_v50 = vmul.f32 -1.442695, %v726_v56  ;;  %v4049_v29 = vmul.f32 -1.442695, %v724_v22  ;;  %v727_v38 = vadd.f32 %v711_v31, %v4804_v35 }
 0x36a   :  { %4234 = vpow2.f32 %v4050_v59 }
 0x36c   :  { %900 = vrot.lane.b32.xlu0 %v887_v49, %s4598_s24 }
 0x36e   :  { %898 = vrot.lane.b32.xlu2 %v886_v51, %s4598_s24  ;;  %896 = vrot.lane.b32.xlu1 %v885_v0, %s4598_s24  ;;  %v4052_v0 = vmul.f32 -1.442695, %v727_v38 }
 0x36f   :  { %v4233_v61 = vpop.eup %4232 }
 0x370   :  { %v755_v63 = vadd.f32 1.0, %v4233_v61  ;;  %v4235_v3 = vpop.eup %4234 }
 0x371   :  { %v5087_v10 = vadd.f32 1.0, %v4235_v3 }
 0x372   :  { %4236 = vrcp.f32 %v755_v63  ;;  %v802_v42 = vand.u32 2147483648, %v755_v63  ;;  %vm796_vm9 = vweird.f32 %v755_v63  ;;  %v800_v51 = vand.u32 2147483647, %v755_v63 }
 0x373   :  { %4238 = vpow2.f32 %v4053_v34  ;;  %v832_v3 = vand.u32 2147483648, %v5087_v10  ;;  %vm826_vm13 = vweird.f32 %v5087_v10  ;;  %v830_v30 = vand.u32 2147483647, %v5087_v10 }
 0x374   :  { %4240 = vrcp.f32 %v5087_v10  ;;  %v803_v26 = vor.u32 1.1754944e-38, %v802_v42  ;;  %vm801_vm11 = vcmp.eq.f32.partialorder %v800_v51, 8.507059e+37 }
 0x375   :  { %4242 = vpow2.f32 %v4047_v17  ;;  %v833_v54 = vor.u32 1.1754944e-38, %v832_v3  ;;  %vm831_vm15 = vcmp.eq.f32.partialorder %v830_v30, 8.507059e+37 }
 0x376   :  { %904 = vrot.lane.b32.xlu2 %v889_v2, %s4598_s24  ;;  %902 = vrot.lane.b32.xlu1 %v888_v52, %s4598_s24  ;;  %4244 = vpow2.f32 %v4046_v14 }
 0x378   :  { %v4237_v28 = vpop.eup %4236 }
 0x379   :  { %v4239_v1 = vpop.eup %4238  ;;  %v792_v58 = vmul.f32 %v4237_v28, %v755_v63  ;;  %vm797_vm8 = vweird.f32 %v4237_v28 }
 0x37a   :  { %v5094_v24 = vadd.f32 1.0, %v4239_v1  ;;  %v4241_v60 = vpop.eup %4240  ;;  %vm798_vm10 = vmor %vm796_vm9, %vm797_vm8 }
 0x37b   :  { %v793_v25 = vsub.f32 1.0, %v792_v58  ;;  %v4243_v7 = vpop.eup %4242  ;;  %v822_v13 = vmul.f32 %v4241_v60, %v5087_v10  ;;  %vm827_vm12 = vweird.f32 %v4241_v60 }
 0x37c   :  { %4246 = vrcp.f32 %v5094_v24  ;;  %v4245_v32 = vpop.eup %4244  ;;  %v5099_v37 = vadd.f32 1.0, %v4243_v7  ;;  %vm828_vm14 = vmor %vm826_vm13, %vm827_vm12  ;;  %vm871_vm9 = vweird.f32 %v5094_v24  ;;  %v875_v31 = vand.u32 2147483647, %v5094_v24 }
 0x37d   :  { %v794_v19 = vmul.f32 %v4237_v28, %v793_v25  ;;  %4248 = vpow2.f32 %v4051_v50  ;;  %v5102_v41 = vadd.f32 1.0, %v4245_v32  ;;  %v823_v47 = vsub.f32 1.0, %v822_v13 }
 0x37e   :  { %4250 = vpow2.f32 %v4049_v29  ;;  %v877_v29 = vand.u32 2147483648, %v5094_v24  ;;  %vm781_vm13 = vweird.f32 %v5099_v37 }
 0x37f   :  { %v795_v43 = vadd.f32 %v4237_v28, %v794_v19  ;;  %4252 = vrcp.f32 %v5099_v37  ;;  %v824_v53 = vmul.f32 %v4241_v60, %v823_v47 }
 0x380   :  { %4254 = vrcp.f32 %v5102_v41  ;;  %v878_v47 = vor.u32 1.1754944e-38, %v877_v29 }
 0x381   :  { %v799_v52 = vsel %vm798_vm10, %v4237_v28, %v795_v43  ;;  %4256 = vpow2.f32 %v4052_v0  ;;  %v825_v63 = vadd.f32 %v4241_v60, %v824_v53  ;;  %v785_v0 = vand.u32 2147483647, %v5099_v37 }
 0x382   :  { %v5104_v48 = vpop.eup %4246  ;;  %v5114_v9 = vsel %vm801_vm11, %v803_v26, %v799_v52  ;;  %vm876_vm11 = vcmp.eq.f32.partialorder %v875_v31, 8.507059e+37  ;;  %v772_v26 = vand.u32 2147483648, %v5102_v41 }
 0x383   :  { %v4249_v49 = vpop.eup %4248  ;;  %v867_v5 = vmul.f32 %v5104_v48, %v5094_v24  ;;  %v829_v45 = vsel %vm828_vm14, %v4241_v60, %v825_v63  ;;  %vm872_vm8 = vweird.f32 %v5104_v48 }
 0x384   :  { %v4251_v2 = vpop.eup %4250  ;;  %v5110_v55 = vadd.f32 1.0, %v4249_v49  ;;  %v5134_v10 = vsel %vm831_vm15, %v833_v54, %v829_v45  ;;  %vm873_vm10 = vmor %vm871_vm9, %vm872_vm8  ;;  %vm766_vm8 = vweird.f32 %v5102_v41 }
 0x385   :  { %v5112_v57 = vpop.eup %4252  ;;  %v5116_v61 = vadd.f32 1.0, %v4251_v2  ;;  %v868_v34 = vsub.f32 1.0, %v867_v5 }
 0x386   :  { %v5119_v62 = vpop.eup %4254  ;;  %4258 = vrcp.f32 %v5110_v55  ;;  %v777_v39 = vmul.f32 %v5112_v57, %v5099_v37  ;;  %vm782_vm12 = vweird.f32 %v5112_v57  ;;  %v847_v54 = vand.u32 2147483648, %v5110_v55 }
 0x387   :  { %4260 = vrcp.f32 %v5116_v61  ;;  %v4257_v17 = vpop.eup %4256  ;;  %v869_v28 = vmul.f32 %v5104_v48, %v868_v34  ;;  %v762_v14 = vmul.f32 %v5119_v62, %v5102_v41  ;;  %vm767_vm14 = vweird.f32 %v5119_v62  ;;  %vm783_vm15 = vmor %vm781_vm13, %vm782_vm12 }
 0x388   :  { %v778_v1 = vsub.f32 1.0, %v777_v39  ;;  %v5136_v22 = vadd.f32 1.0, %v4257_v17  ;;  %vm768_vm9 = vmor %vm766_vm8, %vm767_vm14  ;;  %vm841_vm13 = vweird.f32 %v5110_v55  ;;  %vm811_vm8 = vweird.f32 %v5116_v61 }
 0x389   :  { %v870_v50 = vadd.f32 %v5104_v48, %v869_v28  ;;  %v763_v60 = vsub.f32 1.0, %v762_v14  ;;  %v848_v29 = vor.u32 1.1754944e-38, %v847_v54 }
 0x38a   :  { %v779_v32 = vmul.f32 %v5112_v57, %v778_v1  ;;  %4262 = vrcp.f32 %v5136_v22 }
 0x38b   :  { %v874_v13 = vsel %vm873_vm10, %v5104_v48, %v870_v50  ;;  %v764_v38 = vmul.f32 %v5119_v62, %v763_v60  ;;  %v787_v48 = vand.u32 2147483648, %v5099_v37  ;;  %v770_v37 = vand.u32 2147483647, %v5102_v41 }
 0x38c   :  { %v5132_v58 = vpop.eup %4258  ;;  %v780_v42 = vadd.f32 %v5112_v57, %v779_v32  ;;  %v5157_v51 = vsel %vm876_vm11, %v878_v47, %v874_v13  ;;  %vm786_vm10 = vcmp.eq.f32.partialorder %v785_v0, 8.507059e+37  ;;  %v817_v50 = vand.u32 2147483648, %v5116_v61 }
 0x38d   :  { %v5141_v7 = vpop.eup %4260  ;;  %v837_v19 = vmul.f32 %v5132_v58, %v5110_v55  ;;  %v765_v52 = vadd.f32 %v5119_v62, %v764_v38  ;;  %v788_v63 = vor.u32 1.1754944e-38, %v787_v48  ;;  %vm771_vm11 = vcmp.eq.f32.partialorder %v770_v37, 8.507059e+37 }
 0x38e   :  { %v807_v43 = vmul.f32 %v5141_v7, %v5116_v61  ;;  %vm842_vm12 = vweird.f32 %v5132_v58  ;;  %vm812_vm14 = vweird.f32 %v5141_v7  ;;  %v818_v38 = vor.u32 1.1754944e-38, %v817_v50 }
 0x38f   :  { %v838_v24 = vsub.f32 1.0, %v837_v19  ;;  %v769_v34 = vsel %vm768_vm9, %v5119_v62, %v765_v52  ;;  %v845_v62 = vand.u32 2147483647, %v5110_v55  ;;  %v815_v55 = vand.u32 2147483647, %v5116_v61  ;;  %vm813_vm9 = vmor %vm811_vm8, %vm812_vm14 }
 0x390   :  { %v808_v53 = vsub.f32 1.0, %v807_v43  ;;  %v5165_v5 = vpop.eup %4262 }
 0x391   :  { %v852_v30 = vmul.f32 %v5165_v5, %v5136_v22 }
 0x392   :  { %v809_v3 = vmul.f32 %v5141_v7, %v808_v53 }
 0x3c0   :  { %v895_v59 = vpop.permute.xlu2 %894 }
 0x3c1   :  { %v916_v40 = vmul.f32 %v895_v59, %v5114_v9  ;;  %v784_v59 = vsel %vm783_vm15, %v5112_v57, %v780_v42  ;;  %v773_v57 = vor.u32 1.1754944e-38, %v772_v26  ;;  %vm843_vm15 = vmor %vm841_vm13, %vm842_vm12  ;;  %vm857_vm12 = vweird.f32 %v5165_v5 }
 0x3c2   :  { %v5177_v17 = vsel %vm786_vm10, %v788_v63, %v784_v59  ;;  %vm846_vm10 = vcmp.eq.f32.partialorder %v845_v62, 8.507059e+37  ;;  %vm856_vm13 = vweird.f32 %v5136_v22 }
 0x3c3   :  { %934 = vrot.lane.b32.xlu1 %v916_v40, %s4597_s17  ;;  %v839_v40 = vmul.f32 %v5132_v58, %v838_v24  ;;  %v5182_v14 = vsel %vm771_vm11, %v773_v57, %v769_v34  ;;  %vm816_vm11 = vcmp.eq.f32.partialorder %v815_v55, 8.507059e+37  ;;  %v860_v24 = vand.u32 2147483647, %v5136_v22  ;;  %vm858_vm14 = vmor %vm856_vm13, %vm857_vm12 }
 0x3c5   :  { %v840_v41 = vadd.f32 %v5132_v58, %v839_v40 }
 0x3c7   :  { %v844_v60 = vsel %vm843_vm15, %v5132_v58, %v840_v41  ;;  %vm861_vm15 = vcmp.eq.f32.partialorder %v860_v24, 8.507059e+37 }
 0x3c8   :  { %v899_v56 = vpop.permute.xlu2 %898  ;;  %v5198_v13 = vsel %vm846_vm10, %v848_v29, %v844_v60 }
 0x3c9   :  { %v918_v25 = vmul.f32 %v899_v56, %v5134_v10  ;;  %v810_v56 = vadd.f32 %v5141_v7, %v809_v3 }
 0x3cb   :  { %938 = vrot.lane.b32.xlu1 %v918_v25, %s4597_s17  ;;  %v853_v25 = vsub.f32 1.0, %v852_v30  ;;  %v814_v31 = vsel %vm813_vm9, %v5141_v7, %v810_v56  ;;  %v862_v7 = vand.u32 2147483648, %v5136_v22 }
 0x3cc   :  { %v5201_v58 = vsel %vm816_vm11, %v818_v38, %v814_v31 }
 0x3cd   :  { %v854_v32 = vmul.f32 %v5165_v5, %v853_v25  ;;  %v863_v0 = vor.u32 1.1754944e-38, %v862_v7 }
 0x3cf   :  { %v855_v61 = vadd.f32 %v5165_v5, %v854_v32 }
 0x3d0   :  { %v905_v49 = vpop.permute.xlu2 %904 }
 0x3d1   :  { %v921_v2 = vmul.f32 %v905_v49, %v5157_v51  ;;  %v859_v49 = vsel %vm858_vm14, %v5165_v5, %v855_v61 }
 0x3d3   :  { %944 = vrot.lane.b32.xlu1 %v921_v2, %s4597_s17  ;;  %v5212_v2 = vsel %vm861_vm15, %v863_v0, %v859_v49 }
 0x3d6   :  { %v893_v39 = vpop.permute.xlu0 %892 }
 0x3d7   :  { %v915_v45 = vmul.f32 %v893_v39, %v5177_v17 }
 0x3d8   :  { %v891_v28 = vpop.permute.xlu1 %890 }
 0x3d9   :  { %v914_v1 = vmul.f32 %v891_v28, %v5182_v14  ;;  %932 = vrot.lane.b32.xlu2 %v915_v45, %s4597_s17 }
 0x3db   :  { %930 = vrot.lane.b32.xlu0 %v914_v1, %s4597_s17 }
 0x3de   :  { %v901_v19 = vpop.permute.xlu0 %900 }
 0x3df   :  { %v919_v43 = vmul.f32 %v901_v19, %v5198_v13 }
 0x3e0   :  { %v897_v47 = vpop.permute.xlu1 %896 }
 0x3e1   :  { %v917_v42 = vmul.f32 %v897_v47, %v5201_v58  ;;  %940 = vrot.lane.b32.xlu2 %v919_v43, %s4597_s17 }
 0x3e3   :  { %936 = vrot.lane.b32.xlu0 %v917_v42, %s4597_s17 }
 0x3e8   :  { %v903_v48 = vpop.permute.xlu1 %902 }
 0x3e9   :  { %v920_v52 = vmul.f32 %v903_v48, %v5212_v2 }
 0x3eb   :  { %942 = vrot.lane.b32.xlu0 %v920_v52, %s4597_s17 }
 0x433   :  { %v933_v53 = vpop.permute.xlu2 %932 }
 0x434   :  { %v955_v26 = vadd.f32 %v933_v53, %v4784_v8 }
 0x435   :  { %v935_v59 = vpop.permute.xlu1 %934 }
 0x436   :  { %4264 = vtanh.f32 %v955_v26  ;;  %v956_v37 = vadd.f32 %v935_v59, %v4790_v16 }
 0x438   :  { %4266 = vtanh.f32 %v956_v37 }
 0x43b   :  { %v941_v22 = vpop.permute.xlu2 %940 }
 0x43c   :  { %v5218_v40 = vpop.eup %4264  ;;  %v959_v5 = vadd.f32 %v941_v22, %v4795_v21 }
 0x43d   :  { %v939_v63 = vpop.permute.xlu1 %938  ;;  %v979_v34 = vrot.slane %v5218_v40, 1 }
 0x43e   :  { %v5222_v3 = vpop.eup %4266  ;;  %4268 = vtanh.f32 %v959_v5  ;;  %v958_v30 = vadd.f32 %v939_v63, %v4802_v33 }
 0x43f   :  { %v995_v39 = vsub.f32 %v5027_v11, %v979_v34  ;;  %v980_v57 = vrot.slane %v5222_v3, 1 }
 0x440   :  { %4270 = vtanh.f32 %v958_v30 }
 0x441   :  { %v1011_v45 = vrot.slane %v995_v39, 7  ;;  %v996_v41 = vsub.f32 %v5029_v12, %v980_v57 }
 0x443   :  { %1020 = vrot.lane.b32.xlu1 %v1011_v45, %s4599_s2  ;;  %v1012_v28 = vrot.slane %v996_v41, 7 }
 0x444   :  { %v5229_v62 = vpop.eup %4268 }
 0x445   :  { %v945_v54 = vpop.permute.xlu1 %944  ;;  %1022 = vrot.lane.b32.xlu0 %v1012_v28, %s4599_s2  ;;  %v983_v1 = vrot.slane %v5229_v62, 1 }
 0x446   :  { %v5233_v56 = vpop.eup %4270  ;;  %v961_v11 = vadd.f32 %v945_v54, %v4811_v46 }
 0x447   :  { %v999_v25 = vsub.f32 %v5045_v27, %v983_v1  ;;  %v982_v50 = vrot.slane %v5233_v56, 1 }
 0x448   :  { %4272 = vtanh.f32 %v961_v11 }
 0x449   :  { %v1015_v12 = vrot.slane %v999_v25, 7  ;;  %v998_v60 = vsub.f32 %v5041_v23, %v982_v50 }
 0x44b   :  { %1028 = vrot.lane.b32.xlu1 %v1015_v12, %s4599_s2  ;;  %v1014_v55 = vrot.slane %v998_v60, 7 }
 0x44d   :  { %1026 = vrot.lane.b32.xlu0 %v1014_v55, %s4599_s2  ;;  %v931_v29 = vpop.permute.xlu0 %930 }
 0x44e   :  { %v5241_v31 = vpop.eup %4272  ;;  %v954_v32 = vadd.f32 %v931_v29, %v4782_v4 }
 0x44f   :  { %v985_v19 = vrot.slane %v5241_v31, 1 }
 0x450   :  { %4274 = vtanh.f32 %v954_v32 }
 0x451   :  { %v1001_v27 = vsub.f32 %v5054_v36, %v985_v19 }
 0x453   :  { %v1017_v38 = vrot.slane %v1001_v27, 7 }
 0x455   :  { %1032 = vrot.lane.b32.xlu0 %v1017_v38, %s4599_s2  ;;  %v937_v43 = vpop.permute.xlu0 %936 }
 0x456   :  { %v4275_v23 = vpop.eup %4274  ;;  %v957_v47 = vadd.f32 %v937_v43, %v4792_v18 }
 0x457   :  { %v978_v42 = vrot.slane %v4275_v23, 1 }
 0x458   :  { %4276 = vtanh.f32 %v957_v47 }
 0x459   :  { %v994_v61 = vsub.f32 %v5036_v20, %v978_v42 }
 0x45b   :  { %v1010_v7 = vrot.slane %v994_v61, 7 }
 0x45d   :  { %1018 = vrot.lane.b32.xlu2 %v1010_v7, %s4599_s2  ;;  %v943_v24 = vpop.permute.xlu0 %942 }
 0x45e   :  { %v4277_v49 = vpop.eup %4276  ;;  %v960_v0 = vadd.f32 %v943_v24, %v4804_v35 }
 0x45f   :  { %v981_v48 = vrot.slane %v4277_v49, 1 }
 0x460   :  { %4278 = vtanh.f32 %v960_v0  ;;  %v5312_v0 = vld [vmem:[%s6885_s3 + $0x8] sm:$0xff] }
 0x461   :  { %v997_v36 = vsub.f32 %v5032_v15, %v981_v48  ;;  %v5318_v48 = vld [vmem:[%s6885_s3] sm:$0xff]  ;;  %s4601_s3 = smov 48  }
 0x463   :  { %v1013_v52 = vrot.slane %v997_v36, 7 }
 0x465   :  { %1024 = vrot.lane.b32.xlu2 %v1013_v52, %s4599_s2 }
 0x466   :  { %v4279_v53 = vpop.eup %4278 }
 0x467   :  { %v984_v26 = vrot.slane %v4279_v53, 1 }
 0x469   :  { %v1000_v59 = vsub.f32 %v5048_v6, %v984_v26 }
 0x46b   :  { %v1016_v37 = vrot.slane %v1000_v59, 7 }
 0x46d   :  { %1030 = vrot.lane.b32.xlu2 %v1016_v37, %s4599_s2 }
 0x4b5   :  { %v1021_v20 = vpop.permute.xlu1 %1020 }
 0x4b6   :  { %v1043_v22 = vmul.f32 %v1021_v20, %v5177_v17 }
 0x4b7   :  { %v1019_v5 = vpop.permute.xlu2 %1018  ;;  %v1023_v63 = vpop.permute.xlu0 %1022 }
 0x4b8   :  { %v1042_v34 = vmul.f32 %v1019_v5, %v5182_v14  ;;  %v1044_v30 = vmul.f32 %v1023_v63, %v5114_v9  ;;  %1060 = vrot.lane.b32.xlu0 %v1043_v22, %s4600_s26 }
 0x4ba   :  { %1058 = vrot.lane.b32.xlu1 %v1042_v34, %s4600_s26  ;;  %1062 = vrot.lane.b32.xlu2 %v1044_v30, %s4600_s26 }
 0x4bd   :  { %v1029_v15 = vpop.permute.xlu1 %1028 }
 0x4be   :  { %v1047_v6 = vmul.f32 %v1029_v15, %v5198_v13 }
 0x4bf   :  { %v1025_v39 = vpop.permute.xlu2 %1024  ;;  %v1027_v57 = vpop.permute.xlu0 %1026 }
 0x4c0   :  { %v1045_v45 = vmul.f32 %v1025_v39, %v5201_v58  ;;  %v1046_v17 = vmul.f32 %v1027_v57, %v5134_v10  ;;  %1068 = vrot.lane.b32.xlu0 %v1047_v6, %s4600_s26 }
 0x4c2   :  { %1064 = vrot.lane.b32.xlu1 %v1045_v45, %s4600_s26  ;;  %1066 = vrot.lane.b32.xlu2 %v1046_v17, %s4600_s26 }
 0x4c7   :  { %v1031_v9 = vpop.permute.xlu2 %1030  ;;  %v1033_v14 = vpop.permute.xlu0 %1032 }
 0x4c8   :  { %v1048_v41 = vmul.f32 %v1031_v9, %v5212_v2  ;;  %v1049_v28 = vmul.f32 %v1033_v14, %v5157_v51 }
 0x4ca   :  { %1070 = vrot.lane.b32.xlu1 %v1048_v41, %s4600_s26  ;;  %1072 = vrot.lane.b32.xlu2 %v1049_v28, %s4600_s26 }
 0x514   :  { %v1063_v13 = vpop.permute.xlu2 %1062 }
 0x515   :  { %v5275_v25 = vadd.f32 %v5222_v3, %v1063_v13 }
 0x517   :  { %v1123_v60 = vrot.slane %v5275_v25, 7 }
 0x51c   :  { %v1067_v1 = vpop.permute.xlu2 %1066 }
 0x51d   :  { %v5286_v55 = vadd.f32 %v5233_v56, %v1067_v1 }
 0x51f   :  { %v1127_v38 = vrot.slane %v5286_v55, 5 }
 0x524   :  { %v1073_v19 = vpop.permute.xlu2 %1072 }
 0x525   :  { %v5296_v43 = vadd.f32 %v5241_v31, %v1073_v19 }
 0x52a   :  { %v1061_v54 = vpop.permute.xlu0 %1060 }
 0x52b   :  { %v5278_v50 = vadd.f32 %v5218_v40, %v1061_v54 }
 0x52c   :  { %v1059_v58 = vpop.permute.xlu1 %1058 }
 0x52d   :  { %v5271_v10 = vadd.f32 %v4275_v23, %v1059_v58 }
 0x52f   :  { %v1121_v11 = vrot.slane %v5271_v10, 1 }
 0x531   :  { %v1122_v12 = vsel %vm659_vm0, %v5278_v50, %v1121_v11 }
 0x532   :  { %v1069_v29 = vpop.permute.xlu0 %1068  ;;  %v1124_v3 = vsel %vm662_vm1, %v1123_v60, %v1122_v12 }
 0x533   :  { %v5291_v40 = vadd.f32 %v5229_v62, %v1069_v29  ;;  %v1133_v62 = vrot.slane %v5296_v43, 2 }
 0x534   :  { %v1065_v2 = vpop.permute.xlu1 %1064 }
 0x535   :  { %v5280_v51 = vadd.f32 %v4277_v49, %v1065_v2  ;;  %v1129_v42 = vrot.slane %v5291_v40, 4 }
 0x537   :  { %v1125_v32 = vrot.slane %v5280_v51, 6 }
 0x539   :  { %v1126_v27 = vsel %vm665_vm2, %v1125_v32, %v1124_v3 }
 0x53a   :  { %v1128_v56 = vsel %vm668_vm3, %v1127_v38, %v1126_v27 }
 0x53b   :  { %v1130_v7 = vsel %vm671_vm4, %v1129_v42, %v1128_v56 }
 0x53c   :  { %v1071_v23 = vpop.permute.xlu1 %1070 }
 0x53d   :  { %v5298_v47 = vadd.f32 %v4279_v53, %v1071_v23 }
 0x53f   :  { %v1131_v61 = vrot.slane %v5298_v47, 3 }
 0x541   :  { %v1132_v24 = vsel %vm674_vm5, %v1131_v61, %v1130_v7 }
 0x542   :  { %v1134_v49 = vsel %vm677_vm6, %v1133_v62, %v1132_v24 }
 0x543   :  { %1135 = vrot.lane.b32.xlu0 %v1134_v49, %s4598_s24 }
 0x5b5   :  { %v1136_v31 = vpop.permute.xlu0 %1135 }
 0x5b6   :  { %4054 = vmatmul.msk.f32.vlgmr.msrb.gmra.mxu2 %vm270_vm7, %v1136_v31 }
 0x5b7   :  { %2965 = vmatpush.msrb.mxu2 %v5312_v0 }
 0x5b9   :  { %2966 = vmatpush.msrb.mxu2 %v5318_v48 }
 0x639   :  { %v1156_v36 = vpop.f32.mrf.mxu2 }
 0x63a   :  { %v1335_v52 = vadd.f32 %v1156_v36, %v4765_v44  ;;  %v1161_v63 = vrot.slane %v1156_v36, 7  ;;  %v1163_v15 = vrot.slane %v1156_v36, 2  ;;  %v1166_v57 = vrot.slane %v1156_v36, 5 }
 0x63b   :  { %v1162_v41 = vrot.slane %v1156_v36, 1  ;;  %v1177_v13 = vadd.f32 %v1156_v36, %v4790_v16  ;;  %v1160_v11 = vrot.slane %v1156_v36, 6  ;;  %v1164_v60 = vrot.slane %v1156_v36, 3 }
 0x63c   :  { %1348 = vrot.lane.b32.xlu1 %v1335_v52, %s4598_s24  ;;  %v1339_v53 = vrot.slane %v1335_v52, 1  ;;  %v1338_v26 = vrot.slane %v1335_v52, 7  ;;  %v1337_v59 = vrot.slane %v1335_v52, 6  ;;  %v1341_v37 = vrot.slane %v1335_v52, 3 }
 0x63d   :  { %v1340_v20 = vrot.slane %v1335_v52, 2  ;;  %v1342_v22 = vrot.slane %v1335_v52, 4  ;;  %v1343_v5 = vrot.slane %v1335_v52, 5  ;;  %v1176_v34 = vadd.f32 %v1161_v63, %v4784_v8 }
 0x63e   :  { %1350 = vrot.lane.b32.xlu0 %v1339_v53, %s4598_s24  ;;  %1346 = vrot.lane.b32.xlu2 %v1338_v26, %s4598_s24  ;;  %v1179_v6 = vadd.f32 %v1163_v15, %v4802_v33  ;;  %v1182_v17 = vadd.f32 %v1166_v57, %v4811_v46  ;;  %v1178_v58 = vadd.f32 %v1162_v41, %v4792_v18  ;;  %v4057_v1 = vmul.f32 -1.442695, %v1177_v13 }
 0x63f   :  { %v4056_v30 = vmul.f32 -1.442695, %v1176_v34  ;;  %v1175_v19 = vadd.f32 %v1160_v11, %v4782_v4  ;;  %v1180_v3 = vadd.f32 %v1164_v60, %v4795_v21  ;;  %v1165_v56 = vrot.slane %v1156_v36, 4 }
 0x640   :  { %v4059_v39 = vmul.f32 -1.442695, %v1179_v6  ;;  %v4062_v14 = vmul.f32 -1.442695, %v1182_v17  ;;  %v4058_v12 = vmul.f32 -1.442695, %v1178_v58 }
 0x641   :  { %4280 = vpow2.f32 %v4056_v30  ;;  %v4055_v23 = vmul.f32 -1.442695, %v1175_v19  ;;  %v4060_v7 = vmul.f32 -1.442695, %v1180_v3  ;;  %v1181_v31 = vadd.f32 %v1165_v56, %v4804_v35 }
 0x642   :  { %4282 = vpow2.f32 %v4059_v39 }
 0x644   :  { %1344 = vrot.lane.b32.xlu1 %v1337_v59, %s4598_s24  ;;  %v4061_v59 = vmul.f32 -1.442695, %v1181_v31 }
 0x646   :  { %1354 = vrot.lane.b32.xlu0 %v1341_v37, %s4598_s24  ;;  %1352 = vrot.lane.b32.xlu2 %v1340_v20, %s4598_s24 }
 0x647   :  { %v4281_v45 = vpop.eup %4280 }
 0x648   :  { %v1208_v9 = vadd.f32 1.0, %v4281_v45  ;;  %v4283_v28 = vpop.eup %4282 }
 0x649   :  { %v5335_v54 = vadd.f32 1.0, %v4283_v28 }
 0x64a   :  { %4284 = vrcp.f32 %v1208_v9  ;;  %v1241_v20 = vand.u32 2147483648, %v1208_v9  ;;  %vm1235_vm9 = vweird.f32 %v1208_v9 }
 0x64b   :  { %4286 = vpow2.f32 %v4062_v14  ;;  %v1286_v58 = vand.u32 2147483648, %v5335_v54  ;;  %vm1280_vm13 = vweird.f32 %v5335_v54  ;;  %v1284_v11 = vand.u32 2147483647, %v5335_v54 }
 0x64c   :  { %1356 = vrot.lane.b32.xlu1 %v1342_v22, %s4598_s24  ;;  %4288 = vrcp.f32 %v5335_v54  ;;  %v1242_v6 = vor.u32 1.1754944e-38, %v1241_v20 }
 0x64d   :  { %4290 = vpow2.f32 %v4057_v1  ;;  %vm1285_vm15 = vcmp.eq.f32.partialorder %v1284_v11, 8.507059e+37 }
 0x64e   :  { %1358 = vrot.lane.b32.xlu2 %v1343_v5, %s4598_s24  ;;  %4292 = vpow2.f32 %v4058_v12  ;;  %v1239_v5 = vand.u32 2147483647, %v1208_v9 }
 0x650   :  { %v4285_v2 = vpop.eup %4284  ;;  %vm1240_vm11 = vcmp.eq.f32.partialorder %v1239_v5, 8.507059e+37 }
 0x651   :  { %v4287_v29 = vpop.eup %4286  ;;  %v1231_v32 = vmul.f32 %v4285_v2, %v1208_v9  ;;  %vm1236_vm8 = vweird.f32 %v4285_v2 }
 0x652   :  { %v5340_v27 = vadd.f32 1.0, %v4287_v29  ;;  %v4289_v42 = vpop.eup %4288  ;;  %vm1237_vm10 = vmor %vm1235_vm9, %vm1236_vm8 }
 0x653   :  { %v1232_v38 = vsub.f32 1.0, %v1231_v32  ;;  %v4291_v61 = vpop.eup %4290  ;;  %v1276_v49 = vmul.f32 %v4289_v42, %v5335_v54  ;;  %vm1281_vm12 = vweird.f32 %v4289_v42  ;;  %v1287_v32 = vor.u32 1.1754944e-38, %v1286_v58 }
 0x654   :  { %4294 = vrcp.f32 %v5340_v27  ;;  %v4293_v62 = vpop.eup %4292  ;;  %v5345_v52 = vadd.f32 1.0, %v4291_v61  ;;  %vm1282_vm14 = vmor %vm1280_vm13, %vm1281_vm12  ;;  %vm1325_vm9 = vweird.f32 %v5340_v27 }
 0x655   :  { %v1233_v24 = vmul.f32 %v4285_v2, %v1232_v38  ;;  %4296 = vpow2.f32 %v4055_v23  ;;  %v5347_v53 = vadd.f32 1.0, %v4293_v62  ;;  %v1277_v36 = vsub.f32 1.0, %v1276_v49 }
 0x656   :  { %4298 = vpow2.f32 %v4060_v7  ;;  %v1331_v62 = vand.u32 2147483648, %v5340_v27  ;;  %vm1250_vm13 = vweird.f32 %v5345_v52 }
 0x657   :  { %v1234_v26 = vadd.f32 %v4285_v2, %v1233_v24  ;;  %4300 = vrcp.f32 %v5345_v52  ;;  %v1278_v30 = vmul.f32 %v4289_v42, %v1277_v36  ;;  %v1329_v24 = vand.u32 2147483647, %v5340_v27 }
 0x658   :  { %4302 = vrcp.f32 %v5347_v53  ;;  %v1332_v20 = vor.u32 1.1754944e-38, %v1331_v62 }
 0x659   :  { %v1238_v34 = vsel %vm1237_vm10, %v4285_v2, %v1234_v26  ;;  %4304 = vpow2.f32 %v4061_v59  ;;  %v1279_v41 = vadd.f32 %v4289_v42, %v1278_v30  ;;  %v1256_v30 = vand.u32 2147483648, %v5345_v52 }
 0x65a   :  { %v5349_v37 = vpop.eup %4294  ;;  %v5359_v17 = vsel %vm1240_vm11, %v1242_v6, %v1238_v34  ;;  %vm1330_vm11 = vcmp.eq.f32.partialorder %v1329_v24, 8.507059e+37 }
 0x65b   :  { %v4297_v22 = vpop.eup %4296  ;;  %v1321_v15 = vmul.f32 %v5349_v37, %v5340_v27  ;;  %v1283_v12 = vsel %vm1282_vm14, %v4289_v42, %v1279_v41  ;;  %vm1326_vm8 = vweird.f32 %v5349_v37  ;;  %v1271_v41 = vand.u32 2147483648, %v5347_v53 }
 0x65c   :  { %v4299_v63 = vpop.eup %4298  ;;  %v5355_v39 = vadd.f32 1.0, %v4297_v22  ;;  %v5381_v23 = vsel %vm1285_vm15, %v1287_v32, %v1283_v12  ;;  %vm1327_vm10 = vmor %vm1325_vm9, %vm1326_vm8  ;;  %vm1265_vm8 = vweird.f32 %v5347_v53 }
 0x65d   :  { %v5357_v57 = vpop.eup %4300  ;;  %v5361_v9 = vadd.f32 1.0, %v4299_v63  ;;  %v1322_v28 = vsub.f32 1.0, %v1321_v15 }
 0x65e   :  { %v5364_v13 = vpop.eup %4302  ;;  %4306 = vrcp.f32 %v5355_v39  ;;  %v1246_v2 = vmul.f32 %v5357_v57, %v5345_v52  ;;  %vm1251_vm12 = vweird.f32 %v5357_v57 }
 0x65f   :  { %v4305_v1 = vpop.eup %4304  ;;  %4308 = vrcp.f32 %v5361_v9  ;;  %v1323_v60 = vmul.f32 %v5349_v37, %v1322_v28  ;;  %v1261_v29 = vmul.f32 %v5364_v13, %v5347_v53  ;;  %vm1266_vm14 = vweird.f32 %v5364_v13  ;;  %vm1252_vm15 = vmor %vm1250_vm13, %vm1251_vm12 }
 0x660   :  { %v5377_v19 = vadd.f32 1.0, %v4305_v1  ;;  %v1247_v3 = vsub.f32 1.0, %v1246_v2  ;;  %v1257_v1 = vor.u32 1.1754944e-38, %v1256_v30  ;;  %vm1267_vm9 = vmor %vm1265_vm8, %vm1266_vm14  ;;  %vm1220_vm13 = vweird.f32 %v5355_v39 }
 0x661   :  { %v1324_v61 = vadd.f32 %v5349_v37, %v1323_v60  ;;  %v1262_v42 = vsub.f32 1.0, %v1261_v29  ;;  %v1272_v29 = vor.u32 1.1754944e-38, %v1271_v41  ;;  %v1301_v62 = vand.u32 2147483648, %v5361_v9 }
 0x662   :  { %4310 = vrcp.f32 %v5377_v19  ;;  %v1248_v49 = vmul.f32 %v5357_v57, %v1247_v3  ;;  %vm1295_vm8 = vweird.f32 %v5361_v9 }
 0x663   :  { %v1328_v26 = vsel %vm1327_vm10, %v5349_v37, %v1324_v61  ;;  %v1263_v36 = vmul.f32 %v5364_v13, %v1262_v42  ;;  %v1254_v37 = vand.u32 2147483647, %v5345_v52  ;;  %v1224_v61 = vand.u32 2147483647, %v5355_v39 }
 0x664   :  { %v5379_v38 = vpop.eup %4306  ;;  %v1249_v22 = vadd.f32 %v5357_v57, %v1248_v49  ;;  %v5404_v34 = vsel %vm1330_vm11, %v1332_v20, %v1328_v26  ;;  %v1299_v49 = vand.u32 2147483647, %v5361_v9  ;;  %v1302_v20 = vor.u32 1.1754944e-38, %v1301_v62 }
 0x665   :  { %v5386_v7 = vpop.eup %4308  ;;  %v1216_v31 = vmul.f32 %v5379_v38, %v5355_v39  ;;  %v1264_v6 = vadd.f32 %v5364_v13, %v1263_v36  ;;  %vm1255_vm10 = vcmp.eq.f32.partialorder %v1254_v37, 8.507059e+37  ;;  %vm1221_vm12 = vweird.f32 %v5379_v38 }
 0x666   :  { %v1291_v59 = vmul.f32 %v5386_v7, %v5361_v9  ;;  %v1253_v28 = vsel %vm1252_vm15, %v5357_v57, %v1249_v22  ;;  %vm1296_vm14 = vweird.f32 %v5386_v7  ;;  %vm1222_vm15 = vmor %vm1220_vm13, %vm1221_vm12  ;;  %vm1310_vm13 = vweird.f32 %v5377_v19 }
 0x667   :  { %v1217_v27 = vsub.f32 1.0, %v1216_v31  ;;  %v1268_v11 = vsel %vm1267_vm9, %v5364_v13, %v1264_v6  ;;  %v5422_v60 = vsel %vm1255_vm10, %v1257_v1, %v1253_v28  ;;  %v1226_v13 = vand.u32 2147483648, %v5355_v39  ;;  %vm1297_vm9 = vmor %vm1295_vm8, %vm1296_vm14 }
 0x668   :  { %v5402_v5 = vpop.eup %4310  ;;  %vm1225_vm10 = vcmp.eq.f32.partialorder %v1224_v61, 8.507059e+37 }
 0x669   :  { %v1218_v52 = vmul.f32 %v5379_v38, %v1217_v27  ;;  %v1306_v58 = vmul.f32 %v5402_v5, %v5377_v19  ;;  %v1227_v26 = vor.u32 1.1754944e-38, %v1226_v13  ;;  %vm1311_vm12 = vweird.f32 %v5402_v5 }
 0x66a   :  { %vm1312_vm14 = vmor %vm1310_vm13, %vm1311_vm12 }
 0x66b   :  { %v1307_v32 = vsub.f32 1.0, %v1306_v58 }
 0x66d   :  { %v1308_v31 = vmul.f32 %v5402_v5, %v1307_v32 }
 0x698   :  { %v1347_v45 = vpop.permute.xlu2 %1346 }
 0x699   :  { %v1369_v14 = vmul.f32 %v1347_v45, %v5359_v17  ;;  %v1292_v45 = vsub.f32 1.0, %v1291_v59 }
 0x69b   :  { %1386 = vrot.lane.b32.xlu1 %v1369_v14, %s4597_s17  ;;  %v1269_v14 = vand.u32 2147483647, %v5347_v53  ;;  %v1293_v2 = vmul.f32 %v5386_v7, %v1292_v45  ;;  %v1219_v53 = vadd.f32 %v5379_v38, %v1218_v52 }
 0x69d   :  { %vm1270_vm11 = vcmp.eq.f32.partialorder %v1269_v14, 8.507059e+37  ;;  %v1294_v42 = vadd.f32 %v5386_v7, %v1293_v2  ;;  %v1223_v24 = vsel %vm1222_vm15, %v5379_v38, %v1219_v53  ;;  %v1309_v38 = vadd.f32 %v5402_v5, %v1308_v31 }
 0x69e   :  { %v5443_v59 = vsel %vm1225_vm10, %v1227_v26, %v1223_v24 }
 0x69f   :  { %v1298_v39 = vsel %vm1297_vm9, %v5386_v7, %v1294_v42  ;;  %v1314_v7 = vand.u32 2147483647, %v5377_v19  ;;  %v1313_v30 = vsel %vm1312_vm14, %v5402_v5, %v1309_v38 }
 0x6a0   :  { %v1353_v54 = vpop.permute.xlu2 %1352 }
 0x6a1   :  { %v1372_v56 = vmul.f32 %v1353_v54, %v5381_v23  ;;  %v5427_v54 = vsel %vm1270_vm11, %v1272_v29, %v1268_v11  ;;  %vm1300_vm11 = vcmp.eq.f32.partialorder %v1299_v49, 8.507059e+37  ;;  %vm1315_vm15 = vcmp.eq.f32.partialorder %v1314_v7, 8.507059e+37 }
 0x6a2   :  { %v5448_v9 = vsel %vm1300_vm11, %v1302_v20, %v1298_v39 }
 0x6a3   :  { %1392 = vrot.lane.b32.xlu1 %v1372_v56, %s4597_s17 }
 0x6a8   :  { %v1359_v63 = vpop.permute.xlu2 %1358 }
 0x6a9   :  { %v1375_v15 = vmul.f32 %v1359_v63, %v5404_v34  ;;  %v1316_v63 = vand.u32 2147483648, %v5377_v19 }
 0x6ab   :  { %1398 = vrot.lane.b32.xlu1 %v1375_v15, %s4597_s17  ;;  %v1317_v15 = vor.u32 1.1754944e-38, %v1316_v63 }
 0x6ad   :  { %v5457_v45 = vsel %vm1315_vm15, %v1317_v15, %v1313_v30 }
 0x6ae   :  { %v1349_v12 = vpop.permute.xlu1 %1348 }
 0x6af   :  { %v1370_v57 = vmul.f32 %v1349_v12, %v5422_v60 }
 0x6b0   :  { %v1351_v3 = vpop.permute.xlu0 %1350 }
 0x6b1   :  { %v1371_v56 = vmul.f32 %v1351_v3, %v5427_v54  ;;  %1388 = vrot.lane.b32.xlu0 %v1370_v57, %s4597_s17 }
 0x6b3   :  { %1390 = vrot.lane.b32.xlu2 %v1371_v56, %s4597_s17 }
 0x6b6   :  { %v1345_v36 = vpop.permute.xlu1 %1344 }
 0x6b7   :  { %v1368_v22 = vmul.f32 %v1345_v36, %v5443_v59 }
 0x6b8   :  { %v1355_v27 = vpop.permute.xlu0 %1354 }
 0x6b9   :  { %v1373_v37 = vmul.f32 %v1355_v27, %v5448_v9  ;;  %1384 = vrot.lane.b32.xlu0 %v1368_v22, %s4597_s17 }
 0x6bb   :  { %1394 = vrot.lane.b32.xlu2 %v1373_v37, %s4597_s17 }
 0x6be   :  { %v1357_v6 = vpop.permute.xlu1 %1356 }
 0x6bf   :  { %v1374_v14 = vmul.f32 %v1357_v6, %v5457_v45 }
 0x6c1   :  { %1396 = vrot.lane.b32.xlu0 %v1374_v14, %s4597_s17 }
 0x70d   :  { %v1391_v41 = vpop.permute.xlu2 %1390  ;;  %v1387_v28 = vpop.permute.xlu1 %1386 }
 0x70e   :  { %v1411_v52 = vadd.f32 %v1391_v41, %v4792_v18  ;;  %v1409_v19 = vadd.f32 %v1387_v28, %v4784_v8 }
 0x710   :  { %4312 = vtanh.f32 %v1411_v52 }
 0x711   :  { %4314 = vtanh.f32 %v1409_v19 }
 0x715   :  { %v1395_v58 = vpop.permute.xlu2 %1394  ;;  %v1393_v1 = vpop.permute.xlu1 %1392 }
 0x716   :  { %v5463_v5 = vpop.eup %4312  ;;  %v1413_v11 = vadd.f32 %v1395_v58, %v4795_v21  ;;  %v1412_v2 = vadd.f32 %v1393_v1, %v4802_v33 }
 0x717   :  { %v5467_v12 = vpop.eup %4314  ;;  %v1435_v29 = vrot.slane %v5463_v5, 1 }
 0x718   :  { %4316 = vtanh.f32 %v1413_v11  ;;  %v1433_v57 = vrot.slane %v5467_v12, 1 }
 0x719   :  { %4318 = vtanh.f32 %v1412_v2  ;;  %v1451_v53 = vsub.f32 %v5280_v51, %v1435_v29 }
 0x71a   :  { %v1449_v32 = vsub.f32 %v5278_v50, %v1433_v57 }
 0x71b   :  { %v1467_v3 = vrot.slane %v1451_v53, 7 }
 0x71c   :  { %v1465_v13 = vrot.slane %v1449_v32, 7 }
 0x71d   :  { %1478 = vrot.lane.b32.xlu1 %v1467_v3, %s4599_s2  ;;  %v1399_v56 = vpop.permute.xlu1 %1398 }
 0x71e   :  { %v5474_v61 = vpop.eup %4316  ;;  %v1415_v42 = vadd.f32 %v1399_v56, %v4811_v46  ;;  %1474 = vrot.lane.b32.xlu0 %v1465_v13, %s4599_s2 }
 0x71f   :  { %v5478_v62 = vpop.eup %4318  ;;  %v1437_v24 = vrot.slane %v5474_v61, 1 }
 0x720   :  { %4320 = vtanh.f32 %v1415_v42  ;;  %v1436_v49 = vrot.slane %v5478_v62, 1 }
 0x721   :  { %v1453_v31 = vsub.f32 %v5291_v40, %v1437_v24 }
 0x722   :  { %v1452_v26 = vsub.f32 %v5286_v55, %v1436_v49 }
 0x723   :  { %v1389_v39 = vpop.permute.xlu0 %1388  ;;  %v1469_v36 = vrot.slane %v1453_v31, 7 }
 0x724   :  { %v1410_v20 = vadd.f32 %v1389_v39, %v4790_v16  ;;  %v1468_v22 = vrot.slane %v1452_v26, 7 }
 0x725   :  { %1482 = vrot.lane.b32.xlu1 %v1469_v36, %s4599_s2 }
 0x726   :  { %v5486_v38 = vpop.eup %4320  ;;  %4322 = vtanh.f32 %v1410_v20  ;;  %1480 = vrot.lane.b32.xlu0 %v1468_v22, %s4599_s2 }
 0x727   :  { %v1439_v27 = vrot.slane %v5486_v38, 1 }
 0x729   :  { %v1455_v63 = vsub.f32 %v5296_v43, %v1439_v27 }
 0x72b   :  { %v1385_v37 = vpop.permute.xlu0 %1384  ;;  %v1471_v7 = vrot.slane %v1455_v63, 7 }
 0x72c   :  { %v4323_v30 = vpop.eup %4322  ;;  %v1408_v15 = vadd.f32 %v1385_v37, %v4782_v4 }
 0x72d   :  { %v1434_v6 = vrot.slane %v4323_v30, 1 }
 0x72e   :  { %4324 = vtanh.f32 %v1408_v15  ;;  %1486 = vrot.lane.b32.xlu0 %v1471_v7, %s4599_s2 }
 0x72f   :  { %v1450_v14 = vsub.f32 %v5275_v25, %v1434_v6 }
 0x731   :  { %v1466_v41 = vrot.slane %v1450_v14, 7 }
 0x733   :  { %1476 = vrot.lane.b32.xlu2 %v1466_v41, %s4599_s2  ;;  %v1397_v28 = vpop.permute.xlu0 %1396 }
 0x734   :  { %v4325_v52 = vpop.eup %4324  ;;  %v1414_v19 = vadd.f32 %v1397_v28, %v4804_v35 }
 0x735   :  { %v1432_v58 = vrot.slane %v4325_v52, 1 }
 0x736   :  { %4326 = vtanh.f32 %v1414_v19 }
 0x737   :  { %v1448_v1 = vsub.f32 %v5271_v10, %v1432_v58 }
 0x739   :  { %v1464_v11 = vrot.slane %v1448_v1, 7 }
 0x73b   :  { %1472 = vrot.lane.b32.xlu2 %v1464_v11, %s4599_s2 }
 0x73c   :  { %v4327_v2 = vpop.eup %4326 }
 0x73d   :  { %v1438_v29 = vrot.slane %v4327_v2, 1 }
 0x73f   :  { %v1454_v57 = vsub.f32 %v5298_v47, %v1438_v29 }
 0x741   :  { %v1470_v53 = vrot.slane %v1454_v57, 7 }
 0x743   :  { %1484 = vrot.lane.b32.xlu2 %v1470_v53, %s4599_s2 }
 0x78d   :  { %v1477_v32 = vpop.permute.xlu2 %1476 }
 0x78e   :  { %v1498_v3 = vmul.f32 %v1477_v32, %v5422_v60 }
 0x78f   :  { %v1479_v13 = vpop.permute.xlu1 %1478 }
 0x790   :  { %v1499_v56 = vmul.f32 %v1479_v13, %v5427_v54  ;;  %v1475_v42 = vpop.permute.xlu0 %1474  ;;  %1516 = vrot.lane.b32.xlu1 %v1498_v3, %s4600_s26 }
 0x791   :  { %v1497_v24 = vmul.f32 %v1475_v42, %v5359_v17 }
 0x792   :  { %1518 = vrot.lane.b32.xlu0 %v1499_v56, %s4600_s26 }
 0x793   :  { %1514 = vrot.lane.b32.xlu2 %v1497_v24, %s4600_s26 }
 0x795   :  { %v1473_v49 = vpop.permute.xlu2 %1472 }
 0x796   :  { %v1496_v31 = vmul.f32 %v1473_v49, %v5443_v59 }
 0x797   :  { %v1483_v26 = vpop.permute.xlu1 %1482 }
 0x798   :  { %v1501_v39 = vmul.f32 %v1483_v26, %v5448_v9  ;;  %v1481_v36 = vpop.permute.xlu0 %1480  ;;  %1512 = vrot.lane.b32.xlu1 %v1496_v31, %s4600_s26 }
 0x799   :  { %v1500_v60 = vmul.f32 %v1481_v36, %v5381_v23 }
 0x79a   :  { %1522 = vrot.lane.b32.xlu0 %v1501_v39, %s4600_s26 }
 0x79b   :  { %1520 = vrot.lane.b32.xlu2 %v1500_v60, %s4600_s26 }
 0x79d   :  { %v1485_v17 = vpop.permute.xlu2 %1484 }
 0x79e   :  { %v1502_v54 = vmul.f32 %v1485_v17, %v5457_v45 }
 0x7a0   :  { %v1487_v20 = vpop.permute.xlu0 %1486  ;;  %1524 = vrot.lane.b32.xlu1 %v1502_v54, %s4600_s26 }
 0x7a1   :  { %v1503_v59 = vmul.f32 %v1487_v20, %v5404_v34 }
 0x7a3   :  { %1526 = vrot.lane.b32.xlu2 %v1503_v59, %s4600_s26 }
 0x7ed   :  { %v1515_v9 = vpop.permute.xlu2 %1514 }
 0x7ee   :  { %v5517_v23 = vadd.f32 %v5467_v12, %v1515_v9 }
 0x7f0   :  { %6921 = vst [vmem:[#allocation6_spill] sm:$0xff] %v5517_v23  ;;  %v1572_v45 = vrot.slane %v5517_v23, 1 }
 0x7f5   :  { %v1521_v63 = vpop.permute.xlu2 %1520 }
 0x7f6   :  { %v5526_v6 = vadd.f32 %v5478_v62, %v1521_v63 }
 0x7f8   :  { %6924 = vst [vmem:[#allocation9_spill] sm:$0xff] %v5526_v6  ;;  %v1577_v58 = vrot.slane %v5526_v6, 6 }
 0x7fd   :  { %v1527_v28 = vpop.permute.xlu2 %1526 }
 0x7fe   :  { %v5541_v1 = vadd.f32 %v5486_v38, %v1527_v28 }
 0x800   :  { %6927 = vst [vmem:[#allocation12_spill] sm:$0xff] %v5541_v1  ;;  %v1583_v32 = vrot.slane %v5541_v1, 3 }
 0x802   :  { %v1517_v22 = vpop.permute.xlu1 %1516 }
 0x803   :  { %v5529_v41 = vadd.f32 %v4323_v30, %v1517_v22 }
 0x804   :  { %v1519_v27 = vpop.permute.xlu0 %1518 }
 0x805   :  { %v5520_v7 = vadd.f32 %v5463_v5, %v1519_v27  ;;  %6925 = vst [vmem:[#allocation10_spill] sm:$0xff] %v5529_v41 }
 0x807   :  { %6922 = vst [vmem:[#allocation7_spill] sm:$0xff] %v5520_v7  ;;  %v1575_v12 = vrot.slane %v5520_v7, 7 }
 0x80a   :  { %v1513_v37 = vpop.permute.xlu1 %1512 }
 0x80b   :  { %v5522_v15 = vadd.f32 %v4325_v52, %v1513_v37 }
 0x80c   :  { %v1523_v14 = vpop.permute.xlu0 %1522 }
 0x80d   :  { %6923 = vst [vmem:[#allocation8_spill] sm:$0xff] %v5522_v15  ;;  %v1571_v34 = vrot.slane %v5522_v15, 2  ;;  %v5534_v5 = vadd.f32 %v5474_v61, %v1523_v14 }
 0x80f   :  { %v1573_v19 = vsel %vm659_vm0, %v1572_v45, %v1571_v34  ;;  %6926 = vst [vmem:[#allocation11_spill] sm:$0xff] %v5534_v5  ;;  %v1579_v57 = vrot.slane %v5534_v5, 5 }
 0x810   :  { %v1574_v52 = vsel %vm662_vm1, %v5529_v41, %v1573_v19 }
 0x811   :  { %v1576_v62 = vsel %vm665_vm2, %v1575_v12, %v1574_v52 }
 0x812   :  { %v1525_v30 = vpop.permute.xlu1 %1524  ;;  %v1578_v29 = vsel %vm668_vm3, %v1577_v58, %v1576_v62 }
 0x813   :  { %v5543_v11 = vadd.f32 %v4327_v2, %v1525_v30  ;;  %v1580_v53 = vsel %vm671_vm4, %v1579_v57, %v1578_v29 }
 0x815   :  { %6928 = vst [vmem:[#allocation13_spill] sm:$0xff] %v5543_v11  ;;  %v1581_v61 = vrot.slane %v5543_v11, 4 }
 0x817   :  { %v1582_v3 = vsel %vm674_vm5, %v1581_v61, %v1580_v53 }
 0x818   :  { %v1584_v13 = vsel %vm677_vm6, %v1583_v32, %v1582_v3 }
 0x819   :  { %1585 = vrot.lane.b32.xlu0 %v1584_v13, %s4598_s24 }
 0x88b   :  { %v1586_v38 = vpop.permute.xlu0 %1585 }
 0x88c   :  { %4063 = vmatmul.msk.f32.vlgmr.msrb.gmra.mxu3 %vm270_vm7, %v1586_v38 }
 0x88d   :  { %3419 = vmatpush.msrb.mxu3 %v5312_v0 }
 0x88f   :  { %3420 = vmatpush.msrb.mxu3 %v5318_v48 }
 0x90f   :  { %v5556_v2 = vpop.f32.mrf.mxu3 }
 0x910   :  { %v1785_v56 = vadd.f32 %v5556_v2, %v4765_v44  ;;  %v1628_v39 = vadd.f32 %v5556_v2, %v4792_v18  ;;  %v1611_v60 = vrot.slane %v5556_v2, 6  ;;  %v1616_v20 = vrot.slane %v5556_v2, 4 }
 0x911   :  { %v1612_v63 = vrot.slane %v5556_v2, 7  ;;  %v1610_v45 = vrot.slane %v5556_v2, 5  ;;  %v1614_v19 = vrot.slane %v5556_v2, 2  ;;  %v1613_v58 = vrot.slane %v5556_v2, 1 }
 0x912   :  { %1800 = vrot.lane.b32.xlu2 %v1785_v56, %s4598_s24  ;;  %v1789_v42 = vrot.slane %v1785_v56, 7  ;;  %v1787_v24 = vrot.slane %v1785_v56, 5  ;;  %v1788_v49 = vrot.slane %v1785_v56, 6  ;;  %v1791_v31 = vrot.slane %v1785_v56, 2 }
 0x913   :  { %v1790_v0 = vrot.slane %v1785_v56, 1  ;;  %v1793_v48 = vrot.slane %v1785_v56, 4  ;;  %v1792_v26 = vrot.slane %v1785_v56, 3  ;;  %v4067_v36 = vmul.f32 -1.442695, %v1628_v39 }
 0x914   :  { %1798 = vrot.lane.b32.xlu0 %v1789_v42, %s4598_s24  ;;  %1794 = vrot.lane.b32.xlu1 %v1787_v24, %s4598_s24  ;;  %v1626_v17 = vadd.f32 %v1611_v60, %v4784_v8  ;;  %v1632_v9 = vadd.f32 %v1616_v20, %v4811_v46  ;;  %v1627_v14 = vadd.f32 %v1612_v63, %v4790_v16  ;;  %v1615_v56 = vrot.slane %v5556_v2, 3 }
 0x915   :  { %4328 = vpow2.f32 %v4067_v36  ;;  %v1625_v28 = vadd.f32 %v1610_v45, %v4782_v4  ;;  %v1630_v57 = vadd.f32 %v1614_v19, %v4795_v21  ;;  %v1629_v53 = vadd.f32 %v1613_v58, %v4802_v33 }
 0x916   :  { %v4065_v54 = vmul.f32 -1.442695, %v1626_v17  ;;  %v4071_v27 = vmul.f32 -1.442695, %v1632_v9  ;;  %v4066_v52 = vmul.f32 -1.442695, %v1627_v14 }
 0x917   :  { %v4064_v29 = vmul.f32 -1.442695, %v1625_v28  ;;  %v4069_v13 = vmul.f32 -1.442695, %v1630_v57  ;;  %v4068_v38 = vmul.f32 -1.442695, %v1629_v53 }
 0x918   :  { %4330 = vpow2.f32 %v4065_v54 }
 0x91a   :  { %1796 = vrot.lane.b32.xlu2 %v1788_v49, %s4598_s24 }
 0x91b   :  { %v4329_v59 = vpop.eup %4328 }
 0x91c   :  { %1804 = vrot.lane.b32.xlu0 %v1791_v31, %s4598_s24  ;;  %1802 = vrot.lane.b32.xlu1 %v1790_v0, %s4598_s24  ;;  %v1660_v22 = vadd.f32 1.0, %v4329_v59  ;;  %v1631_v0 = vadd.f32 %v1615_v56, %v4804_v35 }
 0x91e   :  { %4332 = vrcp.f32 %v1660_v22  ;;  %v4331_v37 = vpop.eup %4330  ;;  %v1721_v60 = vand.u32 2147483648, %v1660_v22  ;;  %vm1715_vm9 = vweird.f32 %v1660_v22  ;;  %v1719_v2 = vand.u32 2147483647, %v1660_v22 }
 0x91f   :  { %4334 = vpow2.f32 %v4071_v27  ;;  %v5576_v34 = vadd.f32 1.0, %v4331_v37  ;;  %v4070_v54 = vmul.f32 -1.442695, %v1631_v0 }
 0x920   :  { %v1722_v37 = vor.u32 1.1754944e-38, %v1721_v60  ;;  %vm1720_vm11 = vcmp.eq.f32.partialorder %v1719_v2, 8.507059e+37 }
 0x921   :  { %4336 = vrcp.f32 %v5576_v34  ;;  %vm1685_vm13 = vweird.f32 %v5576_v34 }
 0x922   :  { %1808 = vrot.lane.b32.xlu2 %v1793_v48, %s4598_s24  ;;  %4338 = vpow2.f32 %v4066_v52  ;;  %v1691_v52 = vand.u32 2147483648, %v5576_v34 }
 0x923   :  { %4340 = vpow2.f32 %v4064_v29 }
 0x924   :  { %1806 = vrot.lane.b32.xlu1 %v1792_v26, %s4598_s24  ;;  %v4333_v12 = vpop.eup %4332 }
 0x925   :  { %v4335_v62 = vpop.eup %4334  ;;  %v1711_v30 = vmul.f32 %v4333_v12, %v1660_v22  ;;  %vm1716_vm8 = vweird.f32 %v4333_v12 }
 0x926   :  { %v5584_v61 = vadd.f32 1.0, %v4335_v62  ;;  %vm1717_vm10 = vmor %vm1715_vm9, %vm1716_vm8 }
 0x927   :  { %v1712_v32 = vsub.f32 1.0, %v1711_v30  ;;  %v4337_v3 = vpop.eup %4336  ;;  %v1689_v30 = vand.u32 2147483647, %v5576_v34 }
 0x928   :  { %4342 = vrcp.f32 %v5584_v61  ;;  %v1681_v24 = vmul.f32 %v4337_v3, %v5576_v34  ;;  %v4339_v49 = vpop.eup %4338  ;;  %vm1686_vm12 = vweird.f32 %v4337_v3  ;;  %vm1775_vm9 = vweird.f32 %v5584_v61 }
 0x929   :  { %v1713_v42 = vmul.f32 %v4333_v12, %v1712_v32  ;;  %v4341_v31 = vpop.eup %4340  ;;  %4344 = vpow2.f32 %v4069_v13  ;;  %v5591_v39 = vadd.f32 1.0, %v4339_v49  ;;  %vm1687_vm14 = vmor %vm1685_vm13, %vm1686_vm12  ;;  %v1692_v13 = vor.u32 1.1754944e-38, %v1691_v52 }
 0x92a   :  { %4346 = vpow2.f32 %v4068_v38  ;;  %v1682_v26 = vsub.f32 1.0, %v1681_v24  ;;  %v5595_v17 = vadd.f32 1.0, %v4341_v31  ;;  %vm1690_vm15 = vcmp.eq.f32.partialorder %v1689_v30, 8.507059e+37 }
 0x92b   :  { %v1714_v48 = vadd.f32 %v4333_v12, %v1713_v42  ;;  %4348 = vrcp.f32 %v5591_v39  ;;  %v1781_v49 = vand.u32 2147483648, %v5584_v61  ;;  %v1706_v30 = vand.u32 2147483648, %v5591_v39 }
 0x92c   :  { %v1683_v9 = vmul.f32 %v4337_v3, %v1682_v26  ;;  %4350 = vrcp.f32 %v5595_v17 }
 0x92d   :  { %v1718_v59 = vsel %vm1717_vm10, %v4333_v12, %v1714_v48  ;;  %4352 = vpow2.f32 %v4070_v54  ;;  %v1779_v48 = vand.u32 2147483647, %v5584_v61 }
 0x92e   :  { %v5593_v36 = vpop.eup %4342  ;;  %v5601_v14 = vsel %vm1720_vm11, %v1722_v37, %v1718_v59  ;;  %v1684_v12 = vadd.f32 %v4337_v3, %v1683_v9 }
 0x92f   :  { %v4345_v20 = vpop.eup %4344  ;;  %v1771_v27 = vmul.f32 %v5593_v36, %v5584_v61  ;;  %vm1776_vm8 = vweird.f32 %v5593_v36  ;;  %vm1780_vm11 = vcmp.eq.f32.partialorder %v1779_v48, 8.507059e+37 }
 0x930   :  { %v4347_v63 = vpop.eup %4346  ;;  %v5603_v28 = vadd.f32 1.0, %v4345_v20  ;;  %v1688_v57 = vsel %vm1687_vm14, %v4337_v3, %v1684_v12  ;;  %vm1777_vm10 = vmor %vm1775_vm9, %vm1776_vm8  ;;  %v1782_v20 = vor.u32 1.1754944e-38, %v1781_v49  ;;  %vm1700_vm14 = vweird.f32 %v5591_v39 }
 0x931   :  { %v1772_v19 = vsub.f32 1.0, %v1771_v27  ;;  %v5607_v58 = vadd.f32 1.0, %v4347_v63  ;;  %v5609_v62 = vpop.eup %4348  ;;  %v5623_v42 = vsel %vm1690_vm15, %v1692_v13, %v1688_v57  ;;  %v1676_v57 = vand.u32 2147483648, %v5595_v17 }
 0x932   :  { %v5614_v29 = vpop.eup %4350  ;;  %4354 = vrcp.f32 %v5603_v28  ;;  %v1696_v38 = vmul.f32 %v5609_v62, %v5591_v39  ;;  %vm1701_vm12 = vweird.f32 %v5609_v62  ;;  %vm1670_vm8 = vweird.f32 %v5595_v17 }
 0x933   :  { %v1773_v53 = vmul.f32 %v5593_v36, %v1772_v19  ;;  %v4353_v32 = vpop.eup %4352  ;;  %4356 = vrcp.f32 %v5607_v58  ;;  %v1666_v56 = vmul.f32 %v5614_v29, %v5595_v17  ;;  %vm1671_vm13 = vweird.f32 %v5614_v29  ;;  %vm5659_vm15 = vmor %vm1700_vm14, %vm1701_vm12 }
 0x934   :  { %v5629_v31 = vadd.f32 1.0, %v4353_v32  ;;  %v1697_v26 = vsub.f32 1.0, %v1696_v38  ;;  %v1704_v32 = vand.u32 2147483647, %v5591_v39  ;;  %v1674_v13 = vand.u32 2147483647, %v5595_v17  ;;  %vm1672_vm9 = vmor %vm1670_vm8, %vm1671_vm13 }
 0x935   :  { %v1774_v24 = vadd.f32 %v5593_v36, %v1773_v53  ;;  %v1667_v60 = vsub.f32 1.0, %v1666_v56  ;;  %v1707_v49 = vor.u32 1.1754944e-38, %v1706_v30  ;;  %v1677_v39 = vor.u32 1.1754944e-38, %v1676_v57 }
 0x936   :  { %4358 = vrcp.f32 %v5629_v31  ;;  %v1698_v9 = vmul.f32 %v5609_v62, %v1697_v26  ;;  %vm1745_vm14 = vweird.f32 %v5603_v28  ;;  %vm1730_vm8 = vweird.f32 %v5607_v58 }
 0x937   :  { %v1778_v54 = vsel %vm1777_vm10, %v5593_v36, %v1774_v24  ;;  %v1668_v27 = vmul.f32 %v5614_v29, %v1667_v60  ;;  %vm1705_vm10 = vcmp.eq.f32.partialorder %v1704_v32, 8.507059e+37 }
 0x938   :  { %v5631_v0 = vpop.eup %4354  ;;  %v5646_v37 = vsel %vm1780_vm11, %v1782_v20, %v1778_v54  ;;  %vm1675_vm11 = vcmp.eq.f32.partialorder %v1674_v13, 8.507059e+37  ;;  %v1764_v13 = vand.u32 2147483647, %v5629_v31 }
 0x939   :  { %v5636_v2 = vpop.eup %4356  ;;  %v1741_v59 = vmul.f32 %v5631_v0, %v5603_v28  ;;  %v1669_v12 = vadd.f32 %v5614_v29, %v1668_v27  ;;  %vm1746_vm12 = vweird.f32 %v5631_v0  ;;  %v1736_v27 = vand.u32 2147483648, %v5607_v58 }
 0x93a   :  { %v1726_v61 = vmul.f32 %v5636_v2, %v5607_v58  ;;  %vm1731_vm13 = vweird.f32 %v5636_v2 }
 0x93b   :  { %v1742_v36 = vsub.f32 1.0, %v1741_v59 }
 0x93c   :  { %v1727_v19 = vsub.f32 1.0, %v1726_v61  ;;  %v5654_v52 = vpop.eup %4358  ;;  %v1749_v61 = vand.u32 2147483647, %v5603_v28 }
 0x93d   :  { %v1743_v38 = vmul.f32 %v5631_v0, %v1742_v36  ;;  %v1756_v24 = vmul.f32 %v5654_v52, %v5629_v31 }
 0x93f   :  { %v1757_v59 = vsub.f32 1.0, %v1756_v24 }
 0x96c   :  { %v1801_v45 = vpop.permute.xlu2 %1800 }
 0x96d   :  { %v1821_v22 = vmul.f32 %v1801_v45, %v5601_v14 }
 0x96f   :  { %1840 = vrot.lane.b32.xlu1 %v1821_v22, %s4597_s17  ;;  %v1699_v22 = vadd.f32 %v5609_v62, %v1698_v9  ;;  %v1751_v9 = vand.u32 2147483648, %v5603_v28 }
 0x971   :  { %v1703_v56 = vsel %vm5659_vm15, %v5609_v62, %v1699_v22  ;;  %v1744_v62 = vadd.f32 %v5631_v0, %v1743_v38  ;;  %vm1747_vm15 = vmor %vm1745_vm14, %vm1746_vm12  ;;  %v1758_v22 = vmul.f32 %v5654_v52, %v1757_v59  ;;  %vm1761_vm12 = vweird.f32 %v5654_v52 }
 0x972   :  { %v5675_v48 = vsel %vm1705_vm10, %v1707_v49, %v1703_v56  ;;  %vm1750_vm10 = vcmp.eq.f32.partialorder %v1749_v61, 8.507059e+37 }
 0x974   :  { %v1797_v34 = vpop.permute.xlu2 %1796 }
 0x975   :  { %v1819_v3 = vmul.f32 %v1797_v34, %v5623_v42  ;;  %v1673_v34 = vsel %vm1672_vm9, %v5614_v29, %v1669_v12  ;;  %vm1732_vm9 = vmor %vm1730_vm8, %vm1731_vm13  ;;  %v1752_v12 = vor.u32 1.1754944e-38, %v1751_v9  ;;  %vm1760_vm13 = vweird.f32 %v5629_v31 }
 0x976   :  { %v5677_v60 = vsel %vm1675_vm11, %v1677_v39, %v1673_v34  ;;  %vm1762_vm14 = vmor %vm1760_vm13, %vm1761_vm12 }
 0x977   :  { %1836 = vrot.lane.b32.xlu1 %v1819_v3, %s4597_s17  ;;  %v1728_v3 = vmul.f32 %v5636_v2, %v1727_v19  ;;  %v1737_v19 = vor.u32 1.1754944e-38, %v1736_v27 }
 0x979   :  { %v1729_v20 = vadd.f32 %v5636_v2, %v1728_v3 }
 0x97b   :  { %v1733_v36 = vsel %vm1732_vm9, %v5636_v2, %v1729_v20  ;;  %v1766_v2 = vand.u32 2147483648, %v5629_v31 }
 0x97c   :  { %v1809_v63 = vpop.permute.xlu2 %1808 }
 0x97d   :  { %v1825_v45 = vmul.f32 %v1809_v63, %v5646_v37  ;;  %v1734_v63 = vand.u32 2147483647, %v5607_v58  ;;  %v1767_v56 = vor.u32 1.1754944e-38, %v1766_v2 }
 0x97f   :  { %1848 = vrot.lane.b32.xlu1 %v1825_v45, %s4597_s17  ;;  %v1748_v45 = vsel %vm1747_vm15, %v5631_v0, %v1744_v62  ;;  %vm1735_vm11 = vcmp.eq.f32.partialorder %v1734_v63, 8.507059e+37  ;;  %v1759_v0 = vadd.f32 %v5654_v52, %v1758_v22  ;;  %vm1765_vm15 = vcmp.eq.f32.partialorder %v1764_v13, 8.507059e+37 }
 0x980   :  { %v5697_v57 = vsel %vm1750_vm10, %v1752_v12, %v1748_v45  ;;  %v5699_v28 = vsel %vm1735_vm11, %v1737_v19, %v1733_v36 }
 0x981   :  { %v1763_v38 = vsel %vm1762_vm14, %v5654_v52, %v1759_v0 }
 0x982   :  { %v5711_v3 = vsel %vm1765_vm15, %v1767_v56, %v1763_v38 }
 0x986   :  { %v1799_v17 = vpop.permute.xlu0 %1798  ;;  %v1795_v26 = vpop.permute.xlu1 %1794 }
 0x987   :  { %v1820_v29 = vmul.f32 %v1799_v17, %v5675_v48  ;;  %v1818_v54 = vmul.f32 %v1795_v26, %v5677_v60 }
 0x989   :  { %1838 = vrot.lane.b32.xlu2 %v1820_v29, %s4597_s17  ;;  %1834 = vrot.lane.b32.xlu0 %v1818_v54, %s4597_s17 }
 0x98e   :  { %v1805_v30 = vpop.permute.xlu0 %1804  ;;  %v1803_v53 = vpop.permute.xlu1 %1802 }
 0x98f   :  { %v1823_v32 = vmul.f32 %v1805_v30, %v5697_v57  ;;  %v1822_v58 = vmul.f32 %v1803_v53, %v5699_v28 }
 0x991   :  { %1844 = vrot.lane.b32.xlu2 %v1823_v32, %s4597_s17  ;;  %1842 = vrot.lane.b32.xlu0 %v1822_v58, %s4597_s17 }
 0x996   :  { %v1807_v34 = vpop.permute.xlu1 %1806 }
 0x997   :  { %v1824_v24 = vmul.f32 %v1807_v34, %v5711_v3 }
 0x999   :  { %1846 = vrot.lane.b32.xlu0 %v1824_v24, %s4597_s17 }
 0x9e1   :  { %v1841_v49 = vpop.permute.xlu1 %1840 }
 0x9e2   :  { %v1861_v39 = vadd.f32 %v1841_v49, %v4792_v18 }
 0x9e3   :  { %v1839_v17 = vpop.permute.xlu2 %1838 }
 0x9e4   :  { %4360 = vtanh.f32 %v1861_v39  ;;  %v1860_v26 = vadd.f32 %v1839_v17, %v4790_v16 }
 0x9e6   :  { %4362 = vtanh.f32 %v1860_v26 }
 0x9e9   :  { %v1837_v31 = vpop.permute.xlu1 %1836 }
 0x9ea   :  { %v5717_v62 = vpop.eup %4360  ;;  %v1859_v52 = vadd.f32 %v1837_v31, %v4784_v8 }
 0x9eb   :  { %v1845_v29 = vpop.permute.xlu2 %1844  ;;  %v1885_v54 = vrot.slane %v5717_v62, 1 }
 0x9ec   :  { %v5721_v20 = vpop.eup %4362  ;;  %4364 = vtanh.f32 %v1859_v52  ;;  %v1863_v59 = vadd.f32 %v1845_v29, %v4795_v21 }
 0x9ed   :  { %v1901_v9 = vsub.f32 %v5520_v7, %v1885_v54  ;;  %v1884_v27 = vrot.slane %v5721_v20, 1 }
 0x9ee   :  { %4366 = vtanh.f32 %v1863_v59 }
 0x9ef   :  { %v1917_v61 = vrot.slane %v1901_v9, 7  ;;  %v1900_v63 = vsub.f32 %v5529_v41, %v1884_v27 }
 0x9f1   :  { %v1849_v45 = vpop.permute.xlu1 %1848  ;;  %1928 = vrot.lane.b32.xlu0 %v1917_v61, %s4599_s2  ;;  %v1916_v36 = vrot.slane %v1900_v63, 7 }
 0x9f2   :  { %v5728_v22 = vpop.eup %4364  ;;  %v1865_v12 = vadd.f32 %v1849_v45, %v4811_v46 }
 0x9f3   :  { %1926 = vrot.lane.b32.xlu1 %v1916_v36, %s4599_s2  ;;  %v1883_v19 = vrot.slane %v5728_v22, 1 }
 0x9f4   :  { %v5733_v30 = vpop.eup %4366  ;;  %4368 = vtanh.f32 %v1865_v12 }
 0x9f5   :  { %v1899_v53 = vsub.f32 %v5517_v23, %v1883_v19  ;;  %v1887_v32 = vrot.slane %v5733_v30, 1 }
 0x9f7   :  { %v1915_v58 = vrot.slane %v1899_v53, 7  ;;  %v1903_v0 = vsub.f32 %v5534_v5, %v1887_v32 }
 0x9f9   :  { %1924 = vrot.lane.b32.xlu0 %v1915_v58, %s4599_s2  ;;  %v1919_v2 = vrot.slane %v1903_v0, 7 }
 0x9fa   :  { %v5739_v13 = vpop.eup %4368 }
 0x9fb   :  { %1932 = vrot.lane.b32.xlu1 %v1919_v2, %s4599_s2  ;;  %v1835_v38 = vpop.permute.xlu0 %1834  ;;  %v1889_v56 = vrot.slane %v5739_v13, 1 }
 0x9fc   :  { %v1858_v34 = vadd.f32 %v1835_v38, %v4782_v4 }
 0x9fd   :  { %v1905_v24 = vsub.f32 %v5541_v1, %v1889_v56 }
 0x9fe   :  { %4370 = vtanh.f32 %v1858_v34 }
 0x9ff   :  { %v1921_v49 = vrot.slane %v1905_v24, 7 }
 0xa01   :  { %1936 = vrot.lane.b32.xlu0 %v1921_v49, %s4599_s2 }
 0xa03   :  { %v1843_v39 = vpop.permute.xlu0 %1842 }
 0xa04   :  { %v4371_v17 = vpop.eup %4370  ;;  %v1862_v26 = vadd.f32 %v1843_v39, %v4802_v33 }
 0xa05   :  { %v1882_v31 = vrot.slane %v4371_v17, 1 }
 0xa06   :  { %4372 = vtanh.f32 %v1862_v26 }
 0xa07   :  { %v1898_v52 = vsub.f32 %v5522_v15, %v1882_v31 }
 0xa09   :  { %v1914_v29 = vrot.slane %v1898_v52, 7 }
 0xa0b   :  { %1922 = vrot.lane.b32.xlu2 %v1914_v29, %s4599_s2  ;;  %v1847_v54 = vpop.permute.xlu0 %1846 }
 0xa0c   :  { %v4373_v59 = vpop.eup %4372  ;;  %v1864_v9 = vadd.f32 %v1847_v54, %v4804_v35 }
 0xa0d   :  { %v1886_v27 = vrot.slane %v4373_v59, 1 }
 0xa0e   :  { %4374 = vtanh.f32 %v1864_v9 }
 0xa0f   :  { %v1902_v61 = vsub.f32 %v5526_v6, %v1886_v27 }
 0xa11   :  { %v1918_v63 = vrot.slane %v1902_v61, 7 }
 0xa13   :  { %1930 = vrot.lane.b32.xlu2 %v1918_v63, %s4599_s2 }
 0xa14   :  { %v4375_v45 = vpop.eup %4374 }
 0xa15   :  { %v1888_v36 = vrot.slane %v4375_v45, 1 }
 0xa17   :  { %v1904_v12 = vsub.f32 %v5543_v11, %v1888_v36 }
 0xa19   :  { %v1920_v19 = vrot.slane %v1904_v12, 7 }
 0xa1b   :  { %1934 = vrot.lane.b32.xlu2 %v1920_v19, %s4599_s2 }
 0xa63   :  { %v1929_v53 = vpop.permute.xlu0 %1928 }
 0xa64   :  { %v1949_v32 = vmul.f32 %v1929_v53, %v5601_v14 }
 0xa65   :  { %v1927_v58 = vpop.permute.xlu1 %1926  ;;  %v1923_v0 = vpop.permute.xlu2 %1922 }
 0xa66   :  { %v1948_v2 = vmul.f32 %v1927_v58, %v5675_v48  ;;  %v1946_v38 = vmul.f32 %v1923_v0, %v5677_v60  ;;  %1968 = vrot.lane.b32.xlu2 %v1949_v32, %s4600_s26 }
 0xa68   :  { %1966 = vrot.lane.b32.xlu0 %v1948_v2, %s4600_s26  ;;  %1962 = vrot.lane.b32.xlu1 %v1946_v38, %s4600_s26 }
 0xa6b   :  { %v1925_v56 = vpop.permute.xlu0 %1924 }
 0xa6c   :  { %v1947_v34 = vmul.f32 %v1925_v56, %v5623_v42 }
 0xa6d   :  { %v1933_v24 = vpop.permute.xlu1 %1932  ;;  %v1931_v49 = vpop.permute.xlu2 %1930 }
 0xa6e   :  { %v1951_v39 = vmul.f32 %v1933_v24, %v5697_v57  ;;  %v1950_v14 = vmul.f32 %v1931_v49, %v5699_v28  ;;  %1964 = vrot.lane.b32.xlu2 %v1947_v34, %s4600_s26 }
 0xa70   :  { %1972 = vrot.lane.b32.xlu0 %v1951_v39, %s4600_s26  ;;  %1970 = vrot.lane.b32.xlu1 %v1950_v14, %s4600_s26 }
 0xa73   :  { %v1937_v48 = vpop.permute.xlu0 %1936 }
 0xa74   :  { %v1953_v60 = vmul.f32 %v1937_v48, %v5646_v37 }
 0xa75   :  { %v1935_v26 = vpop.permute.xlu2 %1934 }
 0xa76   :  { %v1952_v31 = vmul.f32 %v1935_v26, %v5711_v3  ;;  %1976 = vrot.lane.b32.xlu2 %v1953_v60, %s4600_s26 }
 0xa78   :  { %1974 = vrot.lane.b32.xlu1 %v1952_v31, %s4600_s26 }
 0xac0   :  { %v1969_v42 = vpop.permute.xlu2 %1968 }
 0xac1   :  { %v5790_v53 = vadd.f32 %v5717_v62, %v1969_v42 }
 0xac8   :  { %v1965_v28 = vpop.permute.xlu2 %1964 }
 0xac9   :  { %v5773_v54 = vadd.f32 %v5728_v22, %v1965_v28 }
 0xacb   :  { %v2026_v3 = vrot.slane %v5773_v54, 2 }
 0xad0   :  { %v1977_v22 = vpop.permute.xlu2 %1976 }
 0xad1   :  { %v5793_v32 = vadd.f32 %v5739_v13, %v1977_v22 }
 0xad3   :  { %v2037_v56 = vrot.slane %v5793_v32, 4 }
 0xada   :  { %v1963_v57 = vpop.permute.xlu1 %1962  ;;  %v1967_v52 = vpop.permute.xlu0 %1966 }
 0xadb   :  { %v5770_v29 = vadd.f32 %v4371_v17, %v1963_v57  ;;  %v5776_v9 = vadd.f32 %v5721_v20, %v1967_v52 }
 0xadd   :  { %v2025_v37 = vrot.slane %v5770_v29, 3  ;;  %v2028_v61 = vrot.slane %v5776_v9, 1 }
 0xadf   :  { %v2027_v12 = vsel %vm659_vm0, %v2026_v3, %v2025_v37 }
 0xae0   :  { %v2029_v19 = vsel %vm662_vm1, %v2028_v61, %v2027_v12 }
 0xae1   :  { %v2030_v0 = vsel %vm665_vm2, %v5790_v53, %v2029_v19 }
 0xae2   :  { %v1971_v27 = vpop.permute.xlu1 %1970  ;;  %v1973_v36 = vpop.permute.xlu0 %1972 }
 0xae3   :  { %v5781_v63 = vadd.f32 %v4373_v59, %v1971_v27  ;;  %v5785_v17 = vadd.f32 %v5733_v30, %v1973_v36 }
 0xae5   :  { %v2031_v20 = vrot.slane %v5781_v63, 7  ;;  %v2033_v59 = vrot.slane %v5785_v17, 6 }
 0xae7   :  { %v2032_v30 = vsel %vm668_vm3, %v2031_v20, %v2030_v0 }
 0xae8   :  { %v2034_v62 = vsel %vm671_vm4, %v2033_v59, %v2032_v30 }
 0xaea   :  { %v1975_v58 = vpop.permute.xlu1 %1974 }
 0xaeb   :  { %v5798_v2 = vadd.f32 %v4375_v45, %v1975_v58 }
 0xaed   :  { %v2035_v38 = vrot.slane %v5798_v2, 5 }
 0xaef   :  { %v2036_v34 = vsel %vm674_vm5, %v2035_v38, %v2034_v62 }
 0xaf0   :  { %v2038_v13 = vsel %vm677_vm6, %v2037_v56, %v2036_v34 }
 0xaf1   :  { %2039 = vrot.lane.b32.xlu0 %v2038_v13, %s4598_s24 }
 0xb63   :  { %v2040_v24 = vpop.permute.xlu0 %2039 }
 0xb64   :  { %4072 = vmatmul.msk.f32.vlgmr.msra.gmra.mxu2 %vm270_vm7, %v2040_v24 }
 0xbe7   :  { %v5808_v49 = vpop.f32.mrf.mxu2 }
 0xbe8   :  { %v2239_v45 = vadd.f32 %v5808_v49, %v4765_v44  ;;  %v2065_v57 = vrot.slane %v5808_v49, 5  ;;  %v2068_v37 = vrot.slane %v5808_v49, 1  ;;  %v2070_v61 = vrot.slane %v5808_v49, 3 }
 0xbe9   :  { %v2066_v20 = vrot.slane %v5808_v49, 6  ;;  %v2064_v59 = vrot.slane %v5808_v49, 4  ;;  %v2067_v13 = vrot.slane %v5808_v49, 7 }
 0xbea   :  { %v2243_v39 = vrot.slane %v2239_v45, 6  ;;  %v2242_v14 = vrot.slane %v2239_v45, 5  ;;  %v2241_v48 = vrot.slane %v2239_v45, 4  ;;  %v2245_v60 = vrot.slane %v2239_v45, 1 }
 0xbeb   :  { %v2244_v26 = vrot.slane %v2239_v45, 7  ;;  %v2247_v31 = vrot.slane %v2239_v45, 3  ;;  %v2246_v42 = vrot.slane %v2239_v45, 2  ;;  %v2080_v52 = vadd.f32 %v2065_v57, %v4784_v8 }
 0xbec   :  { %2252 = vrot.lane.b32.xlu0 %v2243_v39, %s4598_s24  ;;  %2250 = vrot.lane.b32.xlu2 %v2242_v14, %s4598_s24  ;;  %v2084_v3 = vadd.f32 %v2068_v37, %v4795_v21  ;;  %v2086_v12 = vadd.f32 %v2070_v61, %v4811_v46  ;;  %v2081_v0 = vadd.f32 %v2066_v20, %v4790_v16  ;;  %v2069_v57 = vrot.slane %v5808_v49, 2 }
 0xbed   :  { %2248 = vrot.lane.b32.xlu1 %v2241_v48, %s4598_s24  ;;  %v4074_v28 = vmul.f32 -1.442695, %v2080_v52  ;;  %v2079_v38 = vadd.f32 %v2064_v59, %v4782_v4  ;;  %v2083_v39 = vadd.f32 %v5808_v49, %v4802_v33  ;;  %v2082_v48 = vadd.f32 %v2067_v13, %v4792_v18 }
 0xbee   :  { %v4078_v27 = vmul.f32 -1.442695, %v2084_v3  ;;  %v4080_v19 = vmul.f32 -1.442695, %v2086_v12  ;;  %v4075_v62 = vmul.f32 -1.442695, %v2081_v0  ;;  %v2085_v61 = vadd.f32 %v2069_v57, %v4804_v35 }
 0xbef   :  { %4376 = vpow2.f32 %v4074_v28  ;;  %v4073_v34 = vmul.f32 -1.442695, %v2079_v38 }
 0xbf0   :  { %4378 = vpow2.f32 %v4078_v27 }
 0xbf4   :  { %2256 = vrot.lane.b32.xlu0 %v2239_v45, %s4598_s24  ;;  %2258 = vrot.lane.b32.xlu2 %v2245_v60, %s4598_s24 }
 0xbf5   :  { %2254 = vrot.lane.b32.xlu1 %v2244_v26, %s4598_s24  ;;  %v4377_v36 = vpop.eup %4376 }
 0xbf6   :  { %v2112_v22 = vadd.f32 1.0, %v4377_v36  ;;  %v4379_v58 = vpop.eup %4378 }
 0xbf7   :  { %v5829_v30 = vadd.f32 1.0, %v4379_v58  ;;  %v4079_v58 = vmul.f32 -1.442695, %v2085_v61 }
 0xbf8   :  { %4380 = vrcp.f32 %v2112_v22  ;;  %v2145_v59 = vand.u32 2147483648, %v2112_v22  ;;  %vm2139_vm9 = vweird.f32 %v2112_v22  ;;  %v2143_v49 = vand.u32 2147483647, %v2112_v22 }
 0xbf9   :  { %4382 = vpow2.f32 %v4080_v19  ;;  %v2205_v57 = vand.u32 2147483648, %v5829_v30  ;;  %vm2199_vm13 = vweird.f32 %v5829_v30 }
 0xbfa   :  { %4384 = vrcp.f32 %v5829_v30  ;;  %vm2144_vm11 = vcmp.eq.f32.partialorder %v2143_v49, 8.507059e+37 }
 0xbfb   :  { %4386 = vpow2.f32 %v4075_v62 }
 0xbfc   :  { %2262 = vrot.lane.b32.xlu2 %v2247_v31, %s4598_s24  ;;  %4388 = vpow2.f32 %v4073_v34  ;;  %v4077_v31 = vmul.f32 -1.442695, %v2083_v39 }
 0xbfd   :  { %2260 = vrot.lane.b32.xlu1 %v2246_v42, %s4598_s24  ;;  %v4076_v42 = vmul.f32 -1.442695, %v2082_v48 }
 0xbfe   :  { %v4381_v56 = vpop.eup %4380 }
 0xbff   :  { %v4383_v24 = vpop.eup %4382  ;;  %v2135_v45 = vmul.f32 %v4381_v56, %v2112_v22  ;;  %vm2140_vm8 = vweird.f32 %v4381_v56 }
 0xc00   :  { %v5836_v14 = vadd.f32 1.0, %v4383_v24  ;;  %v4385_v26 = vpop.eup %4384  ;;  %vm2141_vm10 = vmor %vm2139_vm9, %vm2140_vm8  ;;  %v2146_v24 = vor.u32 1.1754944e-38, %v2145_v59 }
 0xc01   :  { %v2136_v60 = vsub.f32 1.0, %v2135_v45  ;;  %v4387_v52 = vpop.eup %4386  ;;  %v2195_v37 = vmul.f32 %v4385_v26, %v5829_v30  ;;  %vm2200_vm12 = vweird.f32 %v4385_v26 }
 0xc02   :  { %4390 = vrcp.f32 %v5836_v14  ;;  %v4389_v3 = vpop.eup %4388  ;;  %v5842_v27 = vadd.f32 1.0, %v4387_v52  ;;  %vm2201_vm14 = vmor %vm2199_vm13, %vm2200_vm12  ;;  %vm2229_vm9 = vweird.f32 %v5836_v14 }
 0xc03   :  { %v2137_v28 = vmul.f32 %v4381_v56, %v2136_v60  ;;  %4392 = vpow2.f32 %v4077_v31  ;;  %v2196_v12 = vsub.f32 1.0, %v2195_v37  ;;  %v5845_v19 = vadd.f32 1.0, %v4389_v3 }
 0xc04   :  { %4394 = vpow2.f32 %v4076_v42 }
 0xc05   :  { %v2138_v36 = vadd.f32 %v4381_v56, %v2137_v28  ;;  %4396 = vrcp.f32 %v5842_v27  ;;  %v2197_v62 = vmul.f32 %v4385_v26, %v2196_v12  ;;  %v2203_v28 = vand.u32 2147483647, %v5829_v30 }
 0xc06   :  { %4398 = vrcp.f32 %v5845_v19  ;;  %v2206_v12 = vor.u32 1.1754944e-38, %v2205_v57 }
 0xc07   :  { %v2142_v38 = vsel %vm2141_vm10, %v4381_v56, %v2138_v36  ;;  %4400 = vpow2.f32 %v4079_v58  ;;  %v2198_v60 = vadd.f32 %v4385_v26, %v2197_v62  ;;  %vm2204_vm15 = vcmp.eq.f32.partialorder %v2203_v28, 8.507059e+37 }
 0xc08   :  { %v5847_v20 = vpop.eup %4390  ;;  %v5853_v39 = vsel %vm2144_vm11, %v2146_v24, %v2142_v38 }
 0xc09   :  { %v4393_v0 = vpop.eup %4392  ;;  %v2225_v34 = vmul.f32 %v5847_v20, %v5836_v14  ;;  %v2202_v37 = vsel %vm2201_vm14, %v4385_v26, %v2198_v60  ;;  %vm2230_vm8 = vweird.f32 %v5847_v20  ;;  %vm2154_vm14 = vweird.f32 %v5842_v27 }
 0xc0a   :  { %v4395_v13 = vpop.eup %4394  ;;  %v5855_v22 = vadd.f32 1.0, %v4393_v0  ;;  %v5875_v58 = vsel %vm2204_vm15, %v2206_v12, %v2202_v37  ;;  %vm2231_vm10 = vmor %vm2229_vm9, %vm2230_vm8  ;;  %v2160_v12 = vand.u32 2147483648, %v5842_v27  ;;  %vm2124_vm8 = vweird.f32 %v5845_v19 }
 0xc0b   :  { %v2226_v56 = vsub.f32 1.0, %v2225_v34  ;;  %v5858_v31 = vadd.f32 1.0, %v4395_v13  ;;  %v5860_v42 = vpop.eup %4396  ;;  %v2235_v34 = vand.u32 2147483648, %v5836_v14 }
 0xc0c   :  { %v5863_v52 = vpop.eup %4398  ;;  %4402 = vrcp.f32 %v5855_v22  ;;  %v2150_v61 = vmul.f32 %v5860_v42, %v5842_v27  ;;  %vm2155_vm12 = vweird.f32 %v5860_v42 }
 0xc0d   :  { %v2227_v3 = vmul.f32 %v5847_v20, %v2226_v56  ;;  %4404 = vrcp.f32 %v5858_v31  ;;  %v4401_v36 = vpop.eup %4400  ;;  %v2120_v59 = vmul.f32 %v5863_v52, %v5845_v19  ;;  %v2236_v57 = vor.u32 1.1754944e-38, %v2235_v34  ;;  %vm2156_vm15 = vmor %vm2154_vm14, %vm2155_vm12 }
 0xc0e   :  { %v2151_v0 = vsub.f32 1.0, %v2150_v61  ;;  %v5880_v38 = vadd.f32 1.0, %v4401_v36  ;;  %vm2125_vm13 = vweird.f32 %v5863_v52  ;;  %v2128_v34 = vand.u32 2147483647, %v5845_v19 }
 0xc0f   :  { %v2228_v26 = vadd.f32 %v5847_v20, %v2227_v3  ;;  %v2121_v13 = vsub.f32 1.0, %v2120_v59  ;;  %vm2126_vm9 = vmor %vm2124_vm8, %vm2125_vm13  ;;  %vm2184_vm14 = vweird.f32 %v5855_v22  ;;  %vm2169_vm8 = vweird.f32 %v5858_v31 }
 0xc10   :  { %v2152_v60 = vmul.f32 %v5860_v42, %v2151_v0  ;;  %4406 = vrcp.f32 %v5880_v38  ;;  %v2130_v0 = vand.u32 2147483648, %v5845_v19 }
 0xc11   :  { %v2122_v28 = vmul.f32 %v5863_v52, %v2121_v13 }
 0xc12   :  { %v5882_v62 = vpop.eup %4402 }
 0xc13   :  { %v5885_v24 = vpop.eup %4404  ;;  %v2180_v56 = vmul.f32 %v5882_v62, %v5855_v22  ;;  %v2123_v59 = vadd.f32 %v5863_v52, %v2122_v28  ;;  %vm2185_vm12 = vweird.f32 %v5882_v62 }
 0xc14   :  { %v2165_v37 = vmul.f32 %v5885_v24, %v5858_v31  ;;  %vm2170_vm13 = vweird.f32 %v5885_v24 }
 0xc15   :  { %v2181_v36 = vsub.f32 1.0, %v2180_v56 }
 0xc46   :  { %v2251_v45 = vpop.permute.xlu2 %2250 }
 0xc47   :  { %v2273_v48 = vmul.f32 %v2251_v45, %v5853_v39  ;;  %v2233_v45 = vand.u32 2147483647, %v5836_v14 }
 0xc49   :  { %2290 = vrot.lane.b32.xlu1 %v2273_v48, %s4597_s17  ;;  %v2232_v48 = vsel %vm2231_vm10, %v5847_v20, %v2228_v26  ;;  %vm2234_vm11 = vcmp.eq.f32.partialorder %v2233_v45, 8.507059e+37  ;;  %v2153_v20 = vadd.f32 %v5860_v42, %v2152_v60  ;;  %v2158_v26 = vand.u32 2147483647, %v5842_v27 }
 0xc4a   :  { %v5898_v61 = vsel %vm2234_vm11, %v2236_v57, %v2232_v48  ;;  %v2182_v45 = vmul.f32 %v5882_v62, %v2181_v36  ;;  %v2161_v48 = vor.u32 1.1754944e-38, %v2160_v12  ;;  %v2127_v60 = vsel %vm2126_vm9, %v5863_v52, %v2123_v59  ;;  %vm2171_vm9 = vmor %vm2169_vm8, %vm2170_vm13 }
 0xc4b   :  { %v2157_v13 = vsel %vm2156_vm15, %v5860_v42, %v2153_v20  ;;  %vm2159_vm10 = vcmp.eq.f32.partialorder %v2158_v26, 8.507059e+37  ;;  %v2131_v57 = vor.u32 1.1754944e-38, %v2130_v0  ;;  %vm2129_vm11 = vcmp.eq.f32.partialorder %v2128_v34, 8.507059e+37  ;;  %vm2186_vm15 = vmor %vm2184_vm14, %vm2185_vm12 }
 0xc4c   :  { %v2183_v52 = vadd.f32 %v5882_v62, %v2182_v45  ;;  %v2188_v59 = vand.u32 2147483647, %v5855_v22  ;;  %v2173_v26 = vand.u32 2147483647, %v5858_v31  ;;  %vm2214_vm13 = vweird.f32 %v5880_v38 }
 0xc4e   :  { %v2259_v49 = vpop.permute.xlu2 %2258  ;;  %v2187_v0 = vsel %vm2186_vm15, %v5882_v62, %v2183_v52 }
 0xc4f   :  { %v2277_v30 = vmul.f32 %v2259_v49, %v5875_v58  ;;  %v2166_v49 = vsub.f32 1.0, %v2165_v37  ;;  %v5920_v37 = vsel %vm2159_vm10, %v2161_v48, %v2157_v13  ;;  %vm2189_vm10 = vcmp.eq.f32.partialorder %v2188_v59, 8.507059e+37 }
 0xc51   :  { %2298 = vrot.lane.b32.xlu1 %v2277_v30, %s4597_s17  ;;  %v5906_v30 = vpop.eup %4406  ;;  %v2167_v56 = vmul.f32 %v5885_v24, %v2166_v49  ;;  %v2175_v49 = vand.u32 2147483648, %v5858_v31 }
 0xc52   :  { %v2210_v27 = vmul.f32 %v5906_v30, %v5880_v38  ;;  %vm2215_vm12 = vweird.f32 %v5906_v30 }
 0xc53   :  { %v2168_v36 = vadd.f32 %v5885_v24, %v2167_v56  ;;  %vm2216_vm14 = vmor %vm2214_vm13, %vm2215_vm12 }
 0xc54   :  { %v2211_v12 = vsub.f32 1.0, %v2210_v27 }
 0xc55   :  { %v2172_v13 = vsel %vm2171_vm9, %v5885_v24, %v2168_v36  ;;  %v2220_v24 = vand.u32 2147483648, %v5880_v38 }
 0xc56   :  { %v2263_v3 = vpop.permute.xlu2 %2262  ;;  %v2212_v45 = vmul.f32 %v5906_v30, %v2211_v12 }
 0xc57   :  { %v2279_v14 = vmul.f32 %v2263_v3, %v5898_v61  ;;  %v5924_v3 = vsel %vm2129_vm11, %v2131_v57, %v2127_v60  ;;  %vm2174_vm11 = vcmp.eq.f32.partialorder %v2173_v26, 8.507059e+37 }
 0xc58   :  { %v2213_v62 = vadd.f32 %v5906_v30, %v2212_v45 }
 0xc59   :  { %2302 = vrot.lane.b32.xlu1 %v2279_v14, %s4597_s17  ;;  %v2190_v14 = vand.u32 2147483648, %v5855_v22  ;;  %v2176_v22 = vor.u32 1.1754944e-38, %v2175_v49 }
 0xc5b   :  { %v2191_v34 = vor.u32 1.1754944e-38, %v2190_v14  ;;  %v5946_v57 = vsel %vm2174_vm11, %v2176_v22, %v2172_v13 }
 0xc5d   :  { %v5943_v60 = vsel %vm2189_vm10, %v2191_v34, %v2187_v0 }
 0xc5e   :  { %v2253_v28 = vpop.permute.xlu0 %2252 }
 0xc5f   :  { %v2274_v19 = vmul.f32 %v2253_v28, %v5920_v37  ;;  %v2249_v42 = vpop.permute.xlu1 %2248  ;;  %v2218_v28 = vand.u32 2147483647, %v5880_v38 }
 0xc60   :  { %v2272_v20 = vmul.f32 %v2249_v42, %v5924_v3  ;;  %v2221_v42 = vor.u32 1.1754944e-38, %v2220_v24 }
 0xc61   :  { %2292 = vrot.lane.b32.xlu2 %v2274_v19, %s4597_s17  ;;  %v2217_v19 = vsel %vm2216_vm14, %v5906_v30, %v2213_v62  ;;  %vm2219_vm15 = vcmp.eq.f32.partialorder %v2218_v28, 8.507059e+37 }
 0xc62   :  { %2288 = vrot.lane.b32.xlu0 %v2272_v20, %s4597_s17  ;;  %v5957_v14 = vsel %vm2219_vm15, %v2221_v42, %v2217_v19 }
 0xc66   :  { %v2257_v48 = vpop.permute.xlu0 %2256 }
 0xc67   :  { %v2276_v56 = vmul.f32 %v2257_v48, %v5943_v60  ;;  %v2255_v27 = vpop.permute.xlu1 %2254 }
 0xc68   :  { %v2275_v31 = vmul.f32 %v2255_v27, %v5946_v57 }
 0xc69   :  { %2296 = vrot.lane.b32.xlu2 %v2276_v56, %s4597_s17 }
 0xc6a   :  { %2294 = vrot.lane.b32.xlu0 %v2275_v31, %s4597_s17 }
 0xc6f   :  { %v2261_v52 = vpop.permute.xlu1 %2260 }
 0xc70   :  { %v2278_v20 = vmul.f32 %v2261_v52, %v5957_v14 }
 0xc72   :  { %2300 = vrot.lane.b32.xlu0 %v2278_v20, %s4597_s17 }
 0xcbb   :  { %v2293_v36 = vpop.permute.xlu2 %2292  ;;  %v2291_v12 = vpop.permute.xlu1 %2290 }
 0xcbc   :  { %v2314_v59 = vadd.f32 %v2293_v36, %v4790_v16  ;;  %v2313_v49 = vadd.f32 %v2291_v12, %v4784_v8 }
 0xcbe   :  { %4408 = vtanh.f32 %v2314_v59 }
 0xcbf   :  { %4410 = vtanh.f32 %v2313_v49 }
 0xcc3   :  { %v2297_v38 = vpop.permute.xlu2 %2296  ;;  %v2299_v26 = vpop.permute.xlu1 %2298 }
 0xcc4   :  { %v5963_v30 = vpop.eup %4408  ;;  %v2316_v0 = vadd.f32 %v2297_v38, %v4802_v33  ;;  %v2317_v34 = vadd.f32 %v2299_v26, %v4795_v21 }
 0xcc5   :  { %v5967_v13 = vpop.eup %4410  ;;  %v2338_v45 = vrot.slane %v5963_v30, 1 }
 0xcc6   :  { %v2337_v22 = vrot.slane %v5967_v13, 1  ;;  %4412 = vtanh.f32 %v2316_v0 }
 0xcc7   :  { %4414 = vtanh.f32 %v2317_v34  ;;  %v2354_v48 = vsub.f32 %v5776_v9, %v2338_v45 }
 0xcc8   :  { %v2353_v56 = vsub.f32 %v5773_v54, %v2337_v22 }
 0xcc9   :  { %v2370_v27 = vrot.slane %v2354_v48, 7 }
 0xcca   :  { %v2369_v31 = vrot.slane %v2353_v56, 7 }
 0xccb   :  { %2380 = vrot.lane.b32.xlu1 %v2370_v27, %s4599_s2  ;;  %v2303_v62 = vpop.permute.xlu1 %2302 }
 0xccc   :  { %v5974_v24 = vpop.eup %4412  ;;  %v2319_v28 = vadd.f32 %v2303_v62, %v4811_v46  ;;  %2378 = vrot.lane.b32.xlu0 %v2369_v31, %s4599_s2 }
 0xccd   :  { %v5978_v19 = vpop.eup %4414  ;;  %v2340_v42 = vrot.slane %v5974_v24, 1 }
 0xcce   :  { %v2341_v52 = vrot.slane %v5978_v19, 1  ;;  %4416 = vtanh.f32 %v2319_v28 }
 0xccf   :  { %v2356_v20 = vsub.f32 %v5781_v63, %v2340_v42 }
 0xcd0   :  { %v2357_v36 = vsub.f32 %v5785_v17, %v2341_v52 }
 0xcd1   :  { %v2372_v12 = vrot.slane %v2356_v20, 7 }
 0xcd2   :  { %v2373_v59 = vrot.slane %v2357_v36, 7 }
 0xcd3   :  { %2384 = vrot.lane.b32.xlu1 %v2372_v12, %s4599_s2 }
 0xcd4   :  { %v5985_v49 = vpop.eup %4416  ;;  %2386 = vrot.lane.b32.xlu0 %v2373_v59, %s4599_s2  ;;  %v2289_v38 = vpop.permute.xlu0 %2288 }
 0xcd5   :  { %v2343_v26 = vrot.slane %v5985_v49, 1  ;;  %v2312_v0 = vadd.f32 %v2289_v38, %v4782_v4 }
 0xcd7   :  { %4418 = vtanh.f32 %v2312_v0  ;;  %v2359_v34 = vsub.f32 %v5793_v32, %v2343_v26 }
 0xcd9   :  { %v2375_v45 = vrot.slane %v2359_v34, 7 }
 0xcdc   :  { %2390 = vrot.lane.b32.xlu0 %v2375_v45, %s4599_s2  ;;  %v2295_v22 = vpop.permute.xlu0 %2294 }
 0xcdd   :  { %v4419_v48 = vpop.eup %4418  ;;  %v2315_v56 = vadd.f32 %v2295_v22, %v4792_v18 }
 0xcde   :  { %v2336_v27 = vrot.slane %v4419_v48, 1 }
 0xcdf   :  { %4420 = vtanh.f32 %v2315_v56 }
 0xce0   :  { %v2352_v31 = vsub.f32 %v5770_v29, %v2336_v27 }
 0xce2   :  { %v2368_v62 = vrot.slane %v2352_v31, 7 }
 0xce4   :  { %2376 = vrot.lane.b32.xlu2 %v2368_v62, %s4599_s2  ;;  %v2301_v28 = vpop.permute.xlu0 %2300 }
 0xce5   :  { %v4421_v42 = vpop.eup %4420  ;;  %v2318_v52 = vadd.f32 %v2301_v28, %v4804_v35 }
 0xce6   :  { %v2339_v20 = vrot.slane %v4421_v42, 1 }
 0xce7   :  { %4422 = vtanh.f32 %v2318_v52 }
 0xce8   :  { %v2355_v36 = vsub.f32 %v5790_v53, %v2339_v20 }
 0xcea   :  { %v2371_v12 = vrot.slane %v2355_v36, 7 }
 0xcec   :  { %2382 = vrot.lane.b32.xlu2 %v2371_v12, %s4599_s2 }
 0xced   :  { %v4423_v59 = vpop.eup %4422 }
 0xcee   :  { %v2342_v38 = vrot.slane %v4423_v59, 1 }
 0xcf0   :  { %v2358_v26 = vsub.f32 %v5798_v2, %v2342_v38 }
 0xcf2   :  { %v2374_v0 = vrot.slane %v2358_v26, 7 }
 0xcf4   :  { %2388 = vrot.lane.b32.xlu2 %v2374_v0, %s4599_s2 }
 0xd3d   :  { %v2381_v34 = vpop.permute.xlu1 %2380 }
 0xd3e   :  { %v2402_v45 = vmul.f32 %v2381_v34, %v5920_v37  ;;  %v2377_v22 = vpop.permute.xlu2 %2376  ;;  %v2379_v56 = vpop.permute.xlu0 %2378 }
 0xd3f   :  { %v2400_v27 = vmul.f32 %v2377_v22, %v5924_v3  ;;  %v2401_v31 = vmul.f32 %v2379_v56, %v5853_v39 }
 0xd40   :  { %2420 = vrot.lane.b32.xlu0 %v2402_v45, %s4600_s26 }
 0xd41   :  { %2416 = vrot.lane.b32.xlu1 %v2400_v27, %s4600_s26  ;;  %2418 = vrot.lane.b32.xlu2 %v2401_v31, %s4600_s26 }
 0xd45   :  { %v2385_v62 = vpop.permute.xlu1 %2384 }
 0xd46   :  { %v2404_v28 = vmul.f32 %v2385_v62, %v5943_v60  ;;  %v2383_v52 = vpop.permute.xlu2 %2382  ;;  %v2387_v20 = vpop.permute.xlu0 %2386 }
 0xd47   :  { %v2403_v36 = vmul.f32 %v2383_v52, %v5946_v57  ;;  %v2405_v37 = vmul.f32 %v2387_v20, %v5875_v58 }
 0xd48   :  { %2424 = vrot.lane.b32.xlu0 %v2404_v28, %s4600_s26 }
 0xd49   :  { %2422 = vrot.lane.b32.xlu1 %v2403_v36, %s4600_s26  ;;  %2426 = vrot.lane.b32.xlu2 %v2405_v37, %s4600_s26 }
 0xd4e   :  { %v2389_v39 = vpop.permute.xlu2 %2388  ;;  %v2391_v3 = vpop.permute.xlu0 %2390 }
 0xd4f   :  { %v2406_v12 = vmul.f32 %v2389_v39, %v5957_v14  ;;  %v2407_v38 = vmul.f32 %v2391_v3, %v5898_v61 }
 0xd51   :  { %2428 = vrot.lane.b32.xlu1 %v2406_v12, %s4600_s26  ;;  %2430 = vrot.lane.b32.xlu2 %v2407_v38, %s4600_s26 }
 0xd9b   :  { %v2419_v60 = vpop.permute.xlu2 %2418 }
 0xd9c   :  { %v6019_v34 = vadd.f32 %v5967_v13, %v2419_v60 }
 0xd9e   :  { %6932 = vst [vmem:[#allocation15_spill] sm:$0xff] %v6019_v34  ;;  %v2480_v61 = vrot.slane %v6019_v34, 3 }
 0xda3   :  { %v2427_v0 = vpop.permute.xlu2 %2426 }
 0xdab   :  { %v2431_v28 = vpop.permute.xlu2 %2430 }
 0xdac   :  { %v6040_v36 = vadd.f32 %v5985_v49, %v2431_v28 }
 0xdae   :  { %6936 = vst [vmem:[#allocation19_spill] sm:$0xff] %v6040_v36 }
 0xdb2   :  { %v2421_v58 = vpop.permute.xlu0 %2420 }
 0xdb3   :  { %v2417_v57 = vpop.permute.xlu1 %2416  ;;  %v6022_v45 = vadd.f32 %v5963_v30, %v2421_v58  ;;  %v6033_v30 = vadd.f32 %v5978_v19, %v2427_v0  ;;  %v2491_v19 = vrot.slane %v6040_v36, 5 }
 0xdb4   :  { %v6016_v26 = vadd.f32 %v4419_v48, %v2417_v57 }
 0xdb5   :  { %6933 = vst [vmem:[#allocation16_spill] sm:$0xff] %v6022_v45  ;;  %v2482_v56 = vrot.slane %v6022_v45, 2  ;;  %v2487_v3 = vrot.slane %v6033_v30, 7 }
 0xdb6   :  { %6931 = vst [vmem:[#allocation14_spill] sm:$0xff] %v6016_v26  ;;  %v2479_v14 = vrot.slane %v6016_v26, 4 }
 0xdb7   :  { %6935 = vst [vmem:[#allocation18_spill] sm:$0xff] %v6033_v30 }
 0xdb8   :  { %v2481_v48 = vsel %vm659_vm0, %v2480_v61, %v2479_v14 }
 0xdb9   :  { %v2483_v13 = vsel %vm662_vm1, %v2482_v56, %v2481_v48 }
 0xdba   :  { %v2425_v62 = vpop.permute.xlu0 %2424 }
 0xdbb   :  { %v2423_v22 = vpop.permute.xlu1 %2422  ;;  %v6037_v20 = vadd.f32 %v5974_v24, %v2425_v62 }
 0xdbc   :  { %v6027_v27 = vadd.f32 %v4421_v42, %v2423_v22 }
 0xdbe   :  { %6934 = vst [vmem:[#allocation17_spill] sm:$0xff] %v6027_v27  ;;  %v2484_v31 = vrot.slane %v6027_v27, 1 }
 0xdc0   :  { %v2485_v52 = vsel %vm665_vm2, %v2484_v31, %v2483_v13 }
 0xdc1   :  { %v2486_v37 = vsel %vm668_vm3, %v6037_v20, %v2485_v52 }
 0xdc2   :  { %v2488_v38 = vsel %vm671_vm4, %v2487_v3, %v2486_v37 }
 0xdc3   :  { %v2429_v42 = vpop.permute.xlu1 %2428 }
 0xdc4   :  { %v6044_v39 = vadd.f32 %v4423_v59, %v2429_v42 }
 0xdc6   :  { %v2489_v12 = vrot.slane %v6044_v39, 6 }
 0xdc8   :  { %v2490_v24 = vsel %vm674_vm5, %v2489_v12, %v2488_v38 }
 0xdc9   :  { %v2492_v60 = vsel %vm677_vm6, %v2491_v19, %v2490_v24 }
 0xdca   :  { %2493 = vrot.lane.b32.xlu0 %v2492_v60, %s4598_s24 }
 0xe3c   :  { %v2494_v49 = vpop.permute.xlu0 %2493 }
 0xe3d   :  { %4081 = vmatmul.msk.f32.vlgmr.msra.gmra.mxu3 %vm270_vm7, %v2494_v49 }
 0xec0   :  { %v6054_v57 = vpop.f32.mrf.mxu3 }
 0xec1   :  { %v2693_v59 = vadd.f32 %v6054_v57, %v4765_v44  ;;  %v2519_v31 = vrot.slane %v6054_v57, 4  ;;  %v2522_v13 = vrot.slane %v6054_v57, 7  ;;  %v2524_v37 = vrot.slane %v6054_v57, 2 }
 0xec2   :  { %v2520_v24 = vrot.slane %v6054_v57, 5  ;;  %v2518_v60 = vrot.slane %v6054_v57, 3 }
 0xec3   :  { %v2697_v58 = vrot.slane %v2693_v59, 5  ;;  %v2696_v0 = vrot.slane %v2693_v59, 4  ;;  %v2695_v14 = vrot.slane %v2693_v59, 3  ;;  %v2700_v61 = vrot.slane %v2693_v59, 1 }
 0xec4   :  { %v2699_v22 = vrot.slane %v2693_v59, 7  ;;  %v2698_v56 = vrot.slane %v2693_v59, 6  ;;  %v2701_v48 = vrot.slane %v2693_v59, 2  ;;  %v2534_v62 = vadd.f32 %v2519_v31, %v4784_v8 }
 0xec5   :  { %2706 = vrot.lane.b32.xlu0 %v2697_v58, %s4598_s24  ;;  %2704 = vrot.lane.b32.xlu2 %v2696_v0, %s4598_s24  ;;  %v2537_v52 = vadd.f32 %v2522_v13, %v4802_v33  ;;  %v2540_v12 = vadd.f32 %v2524_v37, %v4811_v46  ;;  %v2533_v0 = vadd.f32 %v2518_v60, %v4782_v4 }
 0xec6   :  { %2702 = vrot.lane.b32.xlu1 %v2695_v14, %s4598_s24  ;;  %v4083_v28 = vmul.f32 -1.442695, %v2534_v62 }
 0xec7   :  { %v4086_v42 = vmul.f32 -1.442695, %v2537_v52  ;;  %v4089_v38 = vmul.f32 -1.442695, %v2540_v12 }
 0xec8   :  { %4424 = vpow2.f32 %v4083_v28 }
 0xec9   :  { %4426 = vpow2.f32 %v4086_v42 }
 0xecd   :  { %2714 = vrot.lane.b32.xlu0 %v2700_v61, %s4598_s24  ;;  %2710 = vrot.lane.b32.xlu2 %v2699_v22, %s4598_s24  ;;  %v2523_v22 = vrot.slane %v6054_v57, 1 }
 0xece   :  { %2708 = vrot.lane.b32.xlu1 %v2698_v56, %s4598_s24  ;;  %v4425_v3 = vpop.eup %4424  ;;  %v4082_v56 = vmul.f32 -1.442695, %v2533_v0  ;;  %v2538_v0 = vadd.f32 %v6054_v57, %v4795_v21 }
 0xecf   :  { %v2566_v19 = vadd.f32 1.0, %v4425_v3  ;;  %v4427_v49 = vpop.eup %4426  ;;  %v2539_v28 = vadd.f32 %v2523_v22, %v4804_v35 }
 0xed0   :  { %v6075_v58 = vadd.f32 1.0, %v4427_v49 }
 0xed1   :  { %4428 = vrcp.f32 %v2566_v19  ;;  %v4088_v3 = vmul.f32 -1.442695, %v2539_v28  ;;  %vm2593_vm9 = vweird.f32 %v2566_v19  ;;  %v4087_v28 = vmul.f32 -1.442695, %v2538_v0 }
 0xed2   :  { %4430 = vpow2.f32 %v4089_v38  ;;  %v2644_v1 = vand.u32 2147483648, %v6075_v58  ;;  %vm2638_vm13 = vweird.f32 %v6075_v58 }
 0xed3   :  { %4432 = vrcp.f32 %v6075_v58 }
 0xed5   :  { %2716 = vrot.lane.b32.xlu2 %v2701_v48, %s4598_s24  ;;  %v2521_v48 = vrot.slane %v6054_v57, 6 }
 0xed6   :  { %2712 = vrot.lane.b32.xlu1 %v2693_v59, %s4598_s24  ;;  %v2535_v59 = vadd.f32 %v2520_v24, %v4790_v16 }
 0xed7   :  { %v4429_v14 = vpop.eup %4428  ;;  %v2536_v52 = vadd.f32 %v2521_v48, %v4792_v18 }
 0xed8   :  { %v4084_v61 = vmul.f32 -1.442695, %v2535_v59  ;;  %v4431_v31 = vpop.eup %4430  ;;  %v2589_v62 = vmul.f32 %v4429_v14, %v2566_v19  ;;  %vm2594_vm8 = vweird.f32 %v4429_v14 }
 0xed9   :  { %v6082_v13 = vadd.f32 1.0, %v4431_v31  ;;  %v4433_v37 = vpop.eup %4432  ;;  %v4085_v12 = vmul.f32 -1.442695, %v2536_v52  ;;  %v2599_v31 = vand.u32 2147483648, %v2566_v19  ;;  %vm2595_vm10 = vmor %vm2593_vm9, %vm2594_vm8 }
 0xeda   :  { %4434 = vpow2.f32 %v4084_v61  ;;  %v2590_v42 = vsub.f32 1.0, %v2589_v62  ;;  %v2634_v60 = vmul.f32 %v4433_v37, %v6075_v58  ;;  %v2597_v62 = vand.u32 2147483647, %v2566_v19 }
 0xedb   :  { %4436 = vpow2.f32 %v4082_v56  ;;  %vm2639_vm12 = vweird.f32 %v4433_v37  ;;  %vm2683_vm9 = vweird.f32 %v6082_v13 }
 0xedc   :  { %4438 = vrcp.f32 %v6082_v13  ;;  %v2591_v24 = vmul.f32 %v4429_v14, %v2590_v42  ;;  %v2635_v22 = vsub.f32 1.0, %v2634_v60  ;;  %vm2598_vm11 = vcmp.eq.f32.partialorder %v2597_v62, 8.507059e+37  ;;  %vm2640_vm14 = vmor %vm2638_vm13, %vm2639_vm12 }
 0xedd   :  { %4440 = vpow2.f32 %v4088_v3 }
 0xede   :  { %4442 = vpow2.f32 %v4085_v12  ;;  %v2592_v61 = vadd.f32 %v4429_v14, %v2591_v24  ;;  %v2636_v3 = vmul.f32 %v4433_v37, %v2635_v22 }
 0xee0   :  { %v4435_v38 = vpop.eup %4434  ;;  %v2596_v42 = vsel %vm2595_vm10, %v4429_v14, %v2592_v61  ;;  %v2637_v0 = vadd.f32 %v4433_v37, %v2636_v3  ;;  %v2645_v3 = vor.u32 1.1754944e-38, %v2644_v1  ;;  %v2689_v1 = vand.u32 2147483648, %v6082_v13 }
 0xee1   :  { %v4437_v49 = vpop.eup %4436  ;;  %v6087_v59 = vadd.f32 1.0, %v4435_v38  ;;  %v2600_v38 = vor.u32 1.1754944e-38, %v2599_v31  ;;  %v2642_v31 = vand.u32 2147483647, %v6075_v58 }
 0xee2   :  { %v6091_v56 = vadd.f32 1.0, %v4437_v49  ;;  %v6093_v48 = vpop.eup %4438  ;;  %v2641_v62 = vsel %vm2640_vm14, %v4433_v37, %v2637_v0 }
 0xee3   :  { %4444 = vrcp.f32 %v6087_v59  ;;  %v4441_v52 = vpop.eup %4440  ;;  %v2679_v57 = vmul.f32 %v6093_v48, %v6082_v13  ;;  %v6099_v60 = vsel %vm2598_vm11, %v2600_v38, %v2596_v42  ;;  %vm2643_vm15 = vcmp.eq.f32.partialorder %v2642_v31, 8.507059e+37 }
 0xee4   :  { %4446 = vrcp.f32 %v6091_v56  ;;  %v4443_v12 = vpop.eup %4442  ;;  %v6101_v19 = vadd.f32 1.0, %v4441_v52  ;;  %v6121_v38 = vsel %vm2643_vm15, %v2645_v3, %v2641_v62  ;;  %vm2684_vm8 = vweird.f32 %v6093_v48 }
 0xee5   :  { %4448 = vpow2.f32 %v4087_v28  ;;  %v2680_v14 = vsub.f32 1.0, %v2679_v57  ;;  %v6104_v61 = vadd.f32 1.0, %v4443_v12  ;;  %v2687_v31 = vand.u32 2147483647, %v6082_v13  ;;  %vm2685_vm10 = vmor %vm2683_vm9, %vm2684_vm8 }
 0xee6   :  { %4450 = vrcp.f32 %v6101_v19  ;;  %vm2608_vm14 = vweird.f32 %v6087_v59  ;;  %vm2578_vm8 = vweird.f32 %v6091_v56 }
 0xee7   :  { %v2681_v28 = vmul.f32 %v6093_v48, %v2680_v14  ;;  %4452 = vrcp.f32 %v6104_v61  ;;  %vm2688_vm11 = vcmp.eq.f32.partialorder %v2687_v31, 8.507059e+37  ;;  %v2612_v31 = vand.u32 2147483647, %v6087_v59 }
 0xee9   :  { %v6106_v22 = vpop.eup %4444  ;;  %v2682_v37 = vadd.f32 %v6093_v48, %v2681_v28 }
 0xeea   :  { %v6109_v11 = vpop.eup %4446  ;;  %v2604_v52 = vmul.f32 %v6106_v22, %v6087_v59  ;;  %vm2609_vm12 = vweird.f32 %v6106_v22 }
 0xeeb   :  { %v4449_v42 = vpop.eup %4448  ;;  %v2574_v57 = vmul.f32 %v6109_v11, %v6091_v56  ;;  %v2686_v62 = vsel %vm2685_vm10, %v6093_v48, %v2682_v37  ;;  %vm2579_vm13 = vweird.f32 %v6109_v11  ;;  %vm2610_vm15 = vmor %vm2608_vm14, %vm2609_vm12  ;;  %vm2613_vm10 = vcmp.eq.f32.partialorder %v2612_v31, 8.507059e+37 }
 0xeec   :  { %v6128_v0 = vpop.eup %4450  ;;  %vm2580_vm9 = vmor %vm2578_vm8, %vm2579_vm13  ;;  %vm2668_vm14 = vweird.f32 %v6101_v19  ;;  %v2629_v31 = vand.u32 2147483648, %v6104_v61  ;;  %vm2623_vm8 = vweird.f32 %v6104_v61 }
 0xeed   :  { %v2575_v14 = vsub.f32 1.0, %v2574_v57  ;;  %v6131_v5 = vpop.eup %4452  ;;  %vm2669_vm12 = vweird.f32 %v6128_v0 }
 0xeee   :  { %v2619_v57 = vmul.f32 %v6131_v5, %v6104_v61  ;;  %vm2624_vm13 = vweird.f32 %v6131_v5 }
 0xeef   :  { %v2576_v3 = vmul.f32 %v6109_v11, %v2575_v14 }
 0xef0   :  { %v2620_v14 = vsub.f32 1.0, %v2619_v57 }
 0xf1f   :  { %v2705_v24 = vpop.permute.xlu2 %2704 }
 0xf20   :  { %v2727_v49 = vmul.f32 %v2705_v24, %v6099_v60  ;;  %v2605_v24 = vsub.f32 1.0, %v2604_v52  ;;  %v2664_v52 = vmul.f32 %v6128_v0, %v6101_v19 }
 0xf22   :  { %2744 = vrot.lane.b32.xlu1 %v2727_v49, %s4597_s17  ;;  %v6126_v49 = vadd.f32 1.0, %v4449_v42  ;;  %v2606_v28 = vmul.f32 %v6106_v22, %v2605_v24  ;;  %v2690_v42 = vor.u32 1.1754944e-38, %v2689_v1  ;;  %v2665_v37 = vsub.f32 1.0, %v2664_v52 }
 0xf23   :  { %v2614_v24 = vand.u32 2147483648, %v6087_v59  ;;  %v2577_v1 = vadd.f32 %v6109_v11, %v2576_v3 }
 0xf24   :  { %4454 = vrcp.f32 %v6126_v49  ;;  %v2607_v48 = vadd.f32 %v6106_v22, %v2606_v28  ;;  %v2582_v28 = vand.u32 2147483647, %v6091_v56 }
 0xf25   :  { %v2615_v3 = vor.u32 1.1754944e-38, %v2614_v24  ;;  %v2581_v57 = vsel %vm2580_vm9, %v6109_v11, %v2577_v1  ;;  %vm2625_vm9 = vmor %vm2623_vm8, %vm2624_vm13  ;;  %vm2653_vm13 = vweird.f32 %v6126_v49 }
 0xf26   :  { %v2611_v52 = vsel %vm2610_vm15, %v6106_v22, %v2607_v48  ;;  %vm2670_vm15 = vmor %vm2668_vm14, %vm2669_vm12 }
 0xf27   :  { %v2711_v12 = vpop.permute.xlu2 %2710  ;;  %v6166_v41 = vsel %vm2613_vm10, %v2615_v3, %v2611_v52 }
 0xf28   :  { %v2730_v58 = vmul.f32 %v2711_v12, %v6121_v38 }
 0xf2a   :  { %2750 = vrot.lane.b32.xlu1 %v2730_v58, %s4597_s17  ;;  %v6144_v58 = vsel %vm2688_vm11, %v2690_v42, %v2686_v62  ;;  %v6152_v6 = vpop.eup %4454  ;;  %v2584_v62 = vand.u32 2147483648, %v6091_v56  ;;  %v2666_v42 = vmul.f32 %v6128_v0, %v2665_v37  ;;  %vm2583_vm11 = vcmp.eq.f32.partialorder %v2582_v28, 8.507059e+37 }
 0xf2b   :  { %v2649_v59 = vmul.f32 %v6152_v6, %v6126_v49  ;;  %v2674_v56 = vand.u32 2147483648, %v6101_v19  ;;  %vm2654_vm12 = vweird.f32 %v6152_v6 }
 0xf2c   :  { %v2667_v11 = vadd.f32 %v6128_v0, %v2666_v42  ;;  %vm2655_vm14 = vmor %vm2653_vm13, %vm2654_vm12 }
 0xf2d   :  { %v2675_v52 = vor.u32 1.1754944e-38, %v2674_v56  ;;  %v2657_v56 = vand.u32 2147483647, %v6126_v49 }
 0xf2e   :  { %v2671_v28 = vsel %vm2670_vm15, %v6128_v0, %v2667_v11 }
 0xf2f   :  { %v2717_v12 = vpop.permute.xlu2 %2716  ;;  %vm2658_vm15 = vcmp.eq.f32.partialorder %v2657_v56, 8.507059e+37 }
 0xf30   :  { %v2733_v13 = vmul.f32 %v2717_v12, %v6144_v58  ;;  %v2621_v12 = vmul.f32 %v6131_v5, %v2620_v14  ;;  %v2650_v14 = vsub.f32 1.0, %v2649_v59 }
 0xf32   :  { %2756 = vrot.lane.b32.xlu1 %v2733_v13, %s4597_s17  ;;  %v2585_v13 = vor.u32 1.1754944e-38, %v2584_v62  ;;  %v2622_v1 = vadd.f32 %v6131_v5, %v2621_v12  ;;  %v2627_v62 = vand.u32 2147483647, %v6104_v61  ;;  %v2651_v3 = vmul.f32 %v6152_v6, %v2650_v14 }
 0xf34   :  { %v6170_v37 = vsel %vm2583_vm11, %v2585_v13, %v2581_v57  ;;  %v2626_v42 = vsel %vm2625_vm9, %v6131_v5, %v2622_v1  ;;  %v2630_v57 = vor.u32 1.1754944e-38, %v2629_v31  ;;  %vm2628_vm11 = vcmp.eq.f32.partialorder %v2627_v62, 8.507059e+37 }
 0xf35   :  { %v2652_v0 = vadd.f32 %v6152_v6, %v2651_v3  ;;  %v2659_v5 = vand.u32 2147483648, %v6126_v49 }
 0xf37   :  { %v2707_v7 = vpop.permute.xlu0 %2706  ;;  %v2660_v11 = vor.u32 1.1754944e-38, %v2659_v5 }
 0xf38   :  { %v2728_v22 = vmul.f32 %v2707_v7, %v6166_v41  ;;  %v2703_v48 = vpop.permute.xlu1 %2702  ;;  %v2672_v7 = vand.u32 2147483647, %v6101_v19 }
 0xf39   :  { %v2726_v24 = vmul.f32 %v2703_v48, %v6170_v37  ;;  %v2656_v48 = vsel %vm2655_vm14, %v6152_v6, %v2652_v0 }
 0xf3a   :  { %2746 = vrot.lane.b32.xlu2 %v2728_v22, %s4597_s17  ;;  %vm2673_vm10 = vcmp.eq.f32.partialorder %v2672_v7, 8.507059e+37  ;;  %v6190_v22 = vsel %vm2628_vm11, %v2630_v57, %v2626_v42  ;;  %v6201_v1 = vsel %vm2658_vm15, %v2660_v11, %v2656_v48 }
 0xf3b   :  { %2742 = vrot.lane.b32.xlu0 %v2726_v24, %s4597_s17  ;;  %v6187_v12 = vsel %vm2673_vm10, %v2675_v52, %v2671_v28 }
 0xf3f   :  { %v2715_v19 = vpop.permute.xlu0 %2714 }
 0xf40   :  { %v2732_v59 = vmul.f32 %v2715_v19, %v6187_v12  ;;  %v2709_v13 = vpop.permute.xlu1 %2708 }
 0xf41   :  { %v2729_v61 = vmul.f32 %v2709_v13, %v6190_v22 }
 0xf42   :  { %2754 = vrot.lane.b32.xlu2 %v2732_v59, %s4597_s17 }
 0xf43   :  { %2748 = vrot.lane.b32.xlu0 %v2729_v61, %s4597_s17 }
 0xf48   :  { %v2713_v24 = vpop.permute.xlu1 %2712 }
 0xf49   :  { %v2731_v14 = vmul.f32 %v2713_v24, %v6201_v1 }
 0xf4b   :  { %2752 = vrot.lane.b32.xlu0 %v2731_v14, %s4597_s17 }
 0xf94   :  { %v2747_v7 = vpop.permute.xlu2 %2746  ;;  %v2745_v31 = vpop.permute.xlu1 %2744 }
 0xf95   :  { %v2768_v62 = vadd.f32 %v2747_v7, %v4790_v16  ;;  %v2767_v28 = vadd.f32 %v2745_v31, %v4784_v8 }
 0xf97   :  { %4456 = vtanh.f32 %v2768_v62 }
 0xf98   :  { %4458 = vtanh.f32 %v2767_v28 }
 0xf9c   :  { %v2755_v49 = vpop.permute.xlu2 %2754  ;;  %v2751_v52 = vpop.permute.xlu1 %2750 }
 0xf9d   :  { %v6207_v6 = vpop.eup %4456  ;;  %v2772_v42 = vadd.f32 %v2755_v49, %v4804_v35  ;;  %v2770_v3 = vadd.f32 %v2751_v52, %v4802_v33 }
 0xf9e   :  { %v6211_v57 = vpop.eup %4458  ;;  %v2792_v19 = vrot.slane %v6207_v6, 1 }
 0xf9f   :  { %v2791_v59 = vrot.slane %v6211_v57, 1  ;;  %4460 = vtanh.f32 %v2772_v42 }
 0xfa0   :  { %4462 = vtanh.f32 %v2770_v3  ;;  %v2808_v13 = vsub.f32 %v6022_v45, %v2792_v19 }
 0xfa1   :  { %v2807_v61 = vsub.f32 %v6019_v34, %v2791_v59 }
 0xfa2   :  { %v2824_v0 = vrot.slane %v2808_v13, 7 }
 0xfa3   :  { %v2823_v5 = vrot.slane %v2807_v61, 7 }
 0xfa4   :  { %2834 = vrot.lane.b32.xlu1 %v2824_v0, %s4599_s2  ;;  %v2757_v56 = vpop.permute.xlu1 %2756 }
 0xfa5   :  { %v6218_v48 = vpop.eup %4460  ;;  %v2773_v11 = vadd.f32 %v2757_v56, %v4811_v46  ;;  %2832 = vrot.lane.b32.xlu0 %v2823_v5, %s4599_s2 }
 0xfa6   :  { %v6222_v24 = vpop.eup %4462  ;;  %v2796_v14 = vrot.slane %v6218_v48, 1 }
 0xfa7   :  { %v2794_v7 = vrot.slane %v6222_v24, 1  ;;  %4464 = vtanh.f32 %v2773_v11 }
 0xfa8   :  { %v2812_v31 = vsub.f32 %v6044_v39, %v2796_v14 }
 0xfa9   :  { %v2810_v62 = vsub.f32 %v6037_v20, %v2794_v7 }
 0xfaa   :  { %v2828_v28 = vrot.slane %v2812_v31, 7 }
 0xfab   :  { %v2826_v49 = vrot.slane %v2810_v62, 7 }
 0xfac   :  { %2842 = vrot.lane.b32.xlu1 %v2828_v28, %s4599_s2 }
 0xfad   :  { %v6229_v52 = vpop.eup %4464  ;;  %2838 = vrot.lane.b32.xlu0 %v2826_v49, %s4599_s2  ;;  %v2743_v42 = vpop.permute.xlu0 %2742 }
 0xfae   :  { %v2797_v3 = vrot.slane %v6229_v52, 1  ;;  %v2766_v19 = vadd.f32 %v2743_v42, %v4782_v4 }
 0xfb0   :  { %4466 = vtanh.f32 %v2766_v19  ;;  %v2813_v59 = vsub.f32 %v6040_v36, %v2797_v3 }
 0xfb2   :  { %v2829_v13 = vrot.slane %v2813_v59, 7 }
 0xfb5   :  { %2844 = vrot.lane.b32.xlu0 %v2829_v13, %s4599_s2  ;;  %v2749_v61 = vpop.permute.xlu0 %2748 }
 0xfb6   :  { %v4467_v0 = vpop.eup %4466  ;;  %v2769_v5 = vadd.f32 %v2749_v61, %v4792_v18 }
 0xfb7   :  { %v2790_v56 = vrot.slane %v4467_v0, 1 }
 0xfb8   :  { %4468 = vtanh.f32 %v2769_v5 }
 0xfb9   :  { %v2806_v11 = vsub.f32 %v6016_v26, %v2790_v56 }
 0xfbb   :  { %v2822_v14 = vrot.slane %v2806_v11, 7 }
 0xfbd   :  { %2830 = vrot.lane.b32.xlu2 %v2822_v14, %s4599_s2  ;;  %v2753_v7 = vpop.permute.xlu0 %2752 }
 0xfbe   :  { %v4469_v31 = vpop.eup %4468  ;;  %v2771_v62 = vadd.f32 %v2753_v7, %v4795_v21 }
 0xfbf   :  { %v2793_v28 = vrot.slane %v4469_v31, 1 }
 0xfc0   :  { %4470 = vtanh.f32 %v2771_v62 }
 0xfc1   :  { %v2809_v49 = vsub.f32 %v6027_v27, %v2793_v28 }
 0xfc3   :  { %v2825_v42 = vrot.slane %v2809_v49, 7 }
 0xfc5   :  { %2836 = vrot.lane.b32.xlu2 %v2825_v42, %s4599_s2 }
 0xfc6   :  { %v4471_v3 = vpop.eup %4470 }
 0xfc7   :  { %v2795_v19 = vrot.slane %v4471_v3, 1 }
 0xfc9   :  { %v2811_v59 = vsub.f32 %v6033_v30, %v2795_v19 }
 0xfcb   :  { %v2827_v13 = vrot.slane %v2811_v59, 7 }
 0xfcd   :  { %2840 = vrot.lane.b32.xlu2 %v2827_v13, %s4599_s2 }
0x1016   :  { %v2835_v61 = vpop.permute.xlu1 %2834 }
0x1017   :  { %v2856_v5 = vmul.f32 %v2835_v61, %v6166_v41  ;;  %v2831_v56 = vpop.permute.xlu2 %2830  ;;  %v2833_v11 = vpop.permute.xlu0 %2832 }
0x1018   :  { %v2854_v14 = vmul.f32 %v2831_v56, %v6170_v37  ;;  %v2855_v7 = vmul.f32 %v2833_v11, %v6099_v60 }
0x1019   :  { %2874 = vrot.lane.b32.xlu0 %v2856_v5, %s4600_s26 }
0x101a   :  { %2870 = vrot.lane.b32.xlu1 %v2854_v14, %s4600_s26  ;;  %2872 = vrot.lane.b32.xlu2 %v2855_v7, %s4600_s26 }
0x101e   :  { %v2843_v62 = vpop.permute.xlu1 %2842 }
0x101f   :  { %v2860_v28 = vmul.f32 %v2843_v62, %v6187_v12  ;;  %v2837_v49 = vpop.permute.xlu2 %2836  ;;  %v2839_v42 = vpop.permute.xlu0 %2838 }
0x1020   :  { %v2857_v19 = vmul.f32 %v2837_v49, %v6190_v22  ;;  %v2858_v41 = vmul.f32 %v2839_v42, %v6121_v38 }
0x1021   :  { %2882 = vrot.lane.b32.xlu0 %v2860_v28, %s4600_s26 }
0x1022   :  { %2876 = vrot.lane.b32.xlu1 %v2857_v19, %s4600_s26  ;;  %2878 = vrot.lane.b32.xlu2 %v2858_v41, %s4600_s26 }
0x1027   :  { %v2841_v60 = vpop.permute.xlu2 %2840  ;;  %v2845_v37 = vpop.permute.xlu0 %2844 }
0x1028   :  { %v2859_v59 = vmul.f32 %v2841_v60, %v6201_v1  ;;  %v2861_v13 = vmul.f32 %v2845_v37, %v6144_v58 }
0x102a   :  { %2880 = vrot.lane.b32.xlu1 %v2859_v59, %s4600_s26  ;;  %2884 = vrot.lane.b32.xlu2 %v2861_v13, %s4600_s26 }
0x1074   :  { %v2873_v12 = vpop.permute.xlu2 %2872 }
0x1075   :  { %v6263_v56 = vadd.f32 %v6211_v57, %v2873_v12 }
0x1077   :  { %v2934_v58 = vrot.slane %v6263_v56, 4 }
0x107c   :  { %v2879_v38 = vpop.permute.xlu2 %2878 }
0x107d   :  { %v6276_v57 = vadd.f32 %v6222_v24, %v2879_v38 }
0x107f   :  { %6940 = vst [vmem:[#allocation23_spill] sm:$0xff] %v6276_v57  ;;  %v2940_v60 = vrot.slane %v6276_v57, 1 }
0x1084   :  { %v2885_v42 = vpop.permute.xlu2 %2884 }
0x1085   :  { %v6283_v41 = vadd.f32 %v6229_v52, %v2885_v42 }
0x1087   :  { %6942 = vst [vmem:[#allocation25_spill] sm:$0xff] %v6283_v41  ;;  %v2945_v12 = vrot.slane %v6283_v41, 6 }
0x108b   :  { %v2875_v61 = vpop.permute.xlu0 %2874 }
0x108c   :  { %v2871_v22 = vpop.permute.xlu1 %2870  ;;  %v6266_v11 = vadd.f32 %v6207_v6, %v2875_v61 }
0x108d   :  { %v6260_v5 = vadd.f32 %v4467_v0, %v2871_v22 }
0x108e   :  { %6938 = vst [vmem:[#allocation21_spill] sm:$0xff] %v6266_v11  ;;  %v2936_v62 = vrot.slane %v6266_v11, 3 }
0x108f   :  { %6937 = vst [vmem:[#allocation20_spill] sm:$0xff] %v6260_v5  ;;  %v2933_v1 = vrot.slane %v6260_v5, 5 }
0x1091   :  { %v2935_v28 = vsel %vm659_vm0, %v2934_v58, %v2933_v1 }
0x1092   :  { %v2937_v6 = vsel %vm662_vm1, %v2936_v62, %v2935_v28 }
0x1093   :  { %v2883_v49 = vpop.permute.xlu0 %2882 }
0x1094   :  { %v2877_v14 = vpop.permute.xlu1 %2876  ;;  %v6280_v19 = vadd.f32 %v6218_v48, %v2883_v49 }
0x1095   :  { %v6270_v7 = vadd.f32 %v4469_v31, %v2877_v14 }
0x1096   :  { %6941 = vst [vmem:[#allocation24_spill] sm:$0xff] %v6280_v19  ;;  %v2943_v13 = vrot.slane %v6280_v19, 7 }
0x1097   :  { %6939 = vst [vmem:[#allocation22_spill] sm:$0xff] %v6270_v7  ;;  %v2938_v0 = vrot.slane %v6270_v7, 2 }
0x1099   :  { %v2939_v31 = vsel %vm665_vm2, %v2938_v0, %v2937_v6 }
0x109a   :  { %v2941_v24 = vsel %vm668_vm3, %v2940_v60, %v2939_v31 }
0x109c   :  { %v2881_v37 = vpop.permute.xlu1 %2880 }
0x109d   :  { %v6287_v59 = vadd.f32 %v4471_v3, %v2881_v37 }
0x109f   :  { %6943 = vst [vmem:[#allocation26_spill] sm:$0xff] %v6287_v59  ;;  %v2942_v48 = vsel %vm671_vm4, %v6287_v59, %v2941_v24 }
0x10a0   :  { %v2944_v22 = vsel %vm674_vm5, %v2943_v13, %v2942_v48 }
0x10a1   :  { %v2946_v52 = vsel %vm677_vm6, %v2945_v12, %v2944_v22 }
0x10a2   :  { %2947 = vrot.lane.b32.xlu0 %v2946_v52, %s4598_s24 }
0x1114   :  { %v2948_v61 = vpop.permute.xlu0 %2947 }
0x1115   :  { %4090 = vmatmul.msk.f32.vlgmr.msrb.gmra.mxu2 %vm270_vm7, %v2948_v61 }
0x1198   :  { %v6298_v3 = vpop.f32.mrf.mxu2 }
0x1199   :  { %v3147_v38 = vadd.f32 %v6298_v3, %v4765_v44  ;;  %v2973_v42 = vrot.slane %v6298_v3, 3  ;;  %v2976_v60 = vrot.slane %v6298_v3, 6  ;;  %v2993_v12 = vadd.f32 %v6298_v3, %v4804_v35 }
0x119a   :  { %v2974_v52 = vrot.slane %v6298_v3, 4  ;;  %v2972_v61 = vrot.slane %v6298_v3, 2 }
0x119b   :  { %v3151_v1 = vrot.slane %v3147_v38, 4  ;;  %v3150_v14 = vrot.slane %v3147_v38, 3  ;;  %v3149_v58 = vrot.slane %v3147_v38, 2  ;;  %v3154_v62 = vrot.slane %v3147_v38, 7 }
0x119c   :  { %v3153_v28 = vrot.slane %v3147_v38, 6  ;;  %v3152_v0 = vrot.slane %v3147_v38, 5  ;;  %v3155_v49 = vrot.slane %v3147_v38, 1  ;;  %v2988_v6 = vadd.f32 %v2973_v42, %v4784_v8 }
0x119d   :  { %3160 = vrot.lane.b32.xlu0 %v3151_v1, %s4598_s24  ;;  %3158 = vrot.lane.b32.xlu2 %v3150_v14, %s4598_s24  ;;  %v2991_v37 = vadd.f32 %v2976_v60, %v4802_v33  ;;  %v4097_v22 = vmul.f32 -1.442695, %v2993_v12  ;;  %v2989_v1 = vadd.f32 %v2974_v52, %v4790_v16 }
0x119e   :  { %3156 = vrot.lane.b32.xlu1 %v3149_v58, %s4598_s24  ;;  %v4092_v31 = vmul.f32 -1.442695, %v2988_v6  ;;  %v2987_v58 = vadd.f32 %v2972_v61, %v4782_v4  ;;  %v2978_v61 = vrot.slane %v6298_v3, 1 }
0x119f   :  { %v4095_v13 = vmul.f32 -1.442695, %v2991_v37 }
0x11a0   :  { %4472 = vpow2.f32 %v4092_v31  ;;  %v4091_v42 = vmul.f32 -1.442695, %v2987_v58 }
0x11a1   :  { %4474 = vpow2.f32 %v4095_v13 }
0x11a5   :  { %3166 = vrot.lane.b32.xlu0 %v3154_v62, %s4598_s24  ;;  %3164 = vrot.lane.b32.xlu2 %v3153_v28, %s4598_s24  ;;  %v2977_v28 = vrot.slane %v6298_v3, 7 }
0x11a6   :  { %3162 = vrot.lane.b32.xlu1 %v3152_v0, %s4598_s24  ;;  %v4473_v24 = vpop.eup %4472  ;;  %v4093_v0 = vmul.f32 -1.442695, %v2989_v1 }
0x11a7   :  { %v3020_v48 = vadd.f32 1.0, %v4473_v24  ;;  %v2992_v60 = vadd.f32 %v2977_v28, %v4795_v21  ;;  %v2994_v28 = vadd.f32 %v2978_v61, %v4811_v46 }
0x11a9   :  { %4476 = vrcp.f32 %v3020_v48  ;;  %vm3047_vm9 = vweird.f32 %v3020_v48 }
0x11aa   :  { %4478 = vpow2.f32 %v4097_v22  ;;  %v4096_v22 = vmul.f32 -1.442695, %v2992_v60  ;;  %v3051_v60 = vand.u32 2147483647, %v3020_v48 }
0x11ac   :  { %vm3052_vm11 = vcmp.eq.f32.partialorder %v3051_v60, 8.507059e+37 }
0x11ad   :  { %3168 = vrot.lane.b32.xlu2 %v3147_v38, %s4598_s24  ;;  %v4475_v38 = vpop.eup %4474 }
0x11ae   :  { %3170 = vrot.lane.b32.xlu1 %v3155_v49, %s4598_s24  ;;  %v6319_v14 = vadd.f32 1.0, %v4475_v38  ;;  %v2975_v49 = vrot.slane %v6298_v3, 5  ;;  %v3053_v3 = vand.u32 2147483648, %v3020_v48 }
0x11af   :  { %v4477_v62 = vpop.eup %4476 }
0x11b0   :  { %4480 = vrcp.f32 %v6319_v14  ;;  %v4479_v6 = vpop.eup %4478  ;;  %v3043_v31 = vmul.f32 %v4477_v62, %v3020_v48  ;;  %v2990_v37 = vadd.f32 %v2975_v49, %v4792_v18  ;;  %vm3048_vm8 = vweird.f32 %v4477_v62 }
0x11b1   :  { %4482 = vpow2.f32 %v4093_v0  ;;  %v6327_v13 = vadd.f32 1.0, %v4479_v6  ;;  %vm3049_vm10 = vmor %vm3047_vm9, %vm3048_vm8  ;;  %vm3092_vm13 = vweird.f32 %v6319_v14 }
0x11b2   :  { %4484 = vpow2.f32 %v4091_v42  ;;  %v3044_v24 = vsub.f32 1.0, %v3043_v31  ;;  %v4094_v52 = vmul.f32 -1.442695, %v2990_v37  ;;  %v4098_v37 = vmul.f32 -1.442695, %v2994_v28 }
0x11b3   :  { %4486 = vrcp.f32 %v6327_v13  ;;  %vm3122_vm9 = vweird.f32 %v6327_v13 }
0x11b4   :  { %v3045_v1 = vmul.f32 %v4477_v62, %v3044_v24  ;;  %4488 = vpow2.f32 %v4096_v22 }
0x11b5   :  { %4490 = vpow2.f32 %v4094_v52 }
0x11b6   :  { %v4481_v12 = vpop.eup %4480  ;;  %v3046_v49 = vadd.f32 %v4477_v62, %v3045_v1 }
0x11b7   :  { %v4483_v38 = vpop.eup %4482  ;;  %v3088_v58 = vmul.f32 %v4481_v12, %v6319_v14  ;;  %vm3093_vm12 = vweird.f32 %v4481_v12 }
0x11b8   :  { %v4485_v15 = vpop.eup %4484  ;;  %v6333_v0 = vadd.f32 1.0, %v4483_v38  ;;  %v3050_v52 = vsel %vm3049_vm10, %v4477_v62, %v3046_v49  ;;  %vm3094_vm14 = vmor %vm3092_vm13, %vm3093_vm12 }
0x11b9   :  { %v3089_v42 = vsub.f32 1.0, %v3088_v58  ;;  %v6335_v6 = vadd.f32 1.0, %v4485_v15  ;;  %v6337_v31 = vpop.eup %4486  ;;  %v3054_v15 = vor.u32 1.1754944e-38, %v3053_v3  ;;  %v3096_v3 = vand.u32 2147483647, %v6319_v14 }
0x11ba   :  { %v4489_v24 = vpop.eup %4488  ;;  %4492 = vrcp.f32 %v6333_v0  ;;  %v3118_v38 = vmul.f32 %v6337_v31, %v6327_v13  ;;  %vm3123_vm8 = vweird.f32 %v6337_v31 }
0x11bb   :  { %v4491_v22 = vpop.eup %4490  ;;  %v3090_v61 = vmul.f32 %v4481_v12, %v3089_v42  ;;  %4494 = vrcp.f32 %v6335_v6  ;;  %v6343_v58 = vsel %vm3052_vm11, %v3054_v15, %v3050_v52  ;;  %v6345_v48 = vadd.f32 1.0, %v4489_v24  ;;  %vm3124_vm10 = vmor %vm3122_vm9, %vm3123_vm8 }
0x11bc   :  { %4496 = vpow2.f32 %v4098_v37  ;;  %v6347_v28 = vadd.f32 1.0, %v4491_v22  ;;  %v3119_v62 = vsub.f32 1.0, %v3118_v38  ;;  %v3098_v42 = vand.u32 2147483648, %v6319_v14 }
0x11bd   :  { %v3091_v36 = vadd.f32 %v4481_v12, %v3090_v61  ;;  %4498 = vrcp.f32 %v6345_v48  ;;  %vm3097_vm15 = vcmp.eq.f32.partialorder %v3096_v3, 8.507059e+37  ;;  %v3126_v3 = vand.u32 2147483647, %v6327_v13 }
0x11be   :  { %v3120_v24 = vmul.f32 %v6337_v31, %v3119_v62  ;;  %4500 = vrcp.f32 %v6347_v28  ;;  %v3099_v52 = vor.u32 1.1754944e-38, %v3098_v42  ;;  %v3128_v62 = vand.u32 2147483648, %v6327_v13 }
0x11bf   :  { %v3095_v37 = vsel %vm3094_vm14, %v4481_v12, %v3091_v36  ;;  %vm3127_vm11 = vcmp.eq.f32.partialorder %v3126_v3, 8.507059e+37  ;;  %vm3062_vm14 = vweird.f32 %v6333_v0  ;;  %v3066_v3 = vand.u32 2147483647, %v6333_v0 }
0x11c0   :  { %v6350_v49 = vpop.eup %4492  ;;  %v6365_v38 = vsel %vm3097_vm15, %v3099_v52, %v3095_v37  ;;  %v3121_v36 = vadd.f32 %v6337_v31, %v3120_v24  ;;  %vm3032_vm8 = vweird.f32 %v6335_v6 }
0x11c1   :  { %v6353_v27 = vpop.eup %4494  ;;  %v3058_v22 = vmul.f32 %v6350_v49, %v6333_v0  ;;  %vm3063_vm12 = vweird.f32 %v6350_v49 }
0x11c2   :  { %v4497_v60 = vpop.eup %4496  ;;  %vm3033_vm13 = vweird.f32 %v6353_v27  ;;  %vm3064_vm15 = vmor %vm3062_vm14, %vm3063_vm12  ;;  %vm3107_vm14 = vweird.f32 %v6345_v48 }
0x11c3   :  { %v6367_v14 = vadd.f32 1.0, %v4497_v60  ;;  %v3059_v12 = vsub.f32 1.0, %v3058_v22  ;;  %v3125_v60 = vsel %vm3124_vm10, %v6337_v31, %v3121_v36  ;;  %v3129_v22 = vor.u32 1.1754944e-38, %v3128_v62  ;;  %vm3034_vm9 = vmor %vm3032_vm8, %vm3033_vm13 }
0x11c4   :  { %vm3067_vm10 = vcmp.eq.f32.partialorder %v3066_v3, 8.507059e+37  ;;  %v3083_v3 = vand.u32 2147483648, %v6347_v28  ;;  %vm3077_vm8 = vweird.f32 %v6347_v28 }
0x11c5   :  { %v3060_v37 = vmul.f32 %v6350_v49, %v3059_v12  ;;  %4502 = vrcp.f32 %v6367_v14  ;;  %v3068_v12 = vand.u32 2147483648, %v6333_v0 }
0x11c7   :  { %v3061_v31 = vadd.f32 %v6350_v49, %v3060_v37  ;;  %v3036_v37 = vand.u32 2147483647, %v6335_v6 }
0x11f7   :  { %v3159_v1 = vpop.permute.xlu2 %3158 }
0x11f8   :  { %v3181_v23 = vmul.f32 %v3159_v1, %v6343_v58  ;;  %v6372_v1 = vpop.eup %4498 }
0x11f9   :  { %v6375_v26 = vpop.eup %4500  ;;  %v3103_v24 = vmul.f32 %v6372_v1, %v6345_v48  ;;  %vm3108_vm12 = vweird.f32 %v6372_v1 }
0x11fa   :  { %3198 = vrot.lane.b32.xlu1 %v3181_v23, %s4597_s17  ;;  %v3028_v23 = vmul.f32 %v6353_v27, %v6335_v6  ;;  %v6396_v45 = vpop.eup %4502  ;;  %vm3078_vm13 = vweird.f32 %v6375_v26 }
0x11fb   :  { %v3104_v36 = vsub.f32 1.0, %v3103_v24  ;;  %v3065_v24 = vsel %vm3064_vm15, %v6350_v49, %v3061_v31  ;;  %v3133_v0 = vmul.f32 %v6396_v45, %v6367_v14  ;;  %vm3109_vm15 = vmor %vm3107_vm14, %vm3108_vm12  ;;  %vm3138_vm12 = vweird.f32 %v6396_v45 }
0x11fc   :  { %v3029_v42 = vsub.f32 1.0, %v3028_v23  ;;  %v3073_v23 = vmul.f32 %v6375_v26, %v6347_v28 }
0x11fe   :  { %v3030_v52 = vmul.f32 %v6353_v27, %v3029_v42  ;;  %v3074_v42 = vsub.f32 1.0, %v3073_v23 }
0x11ff   :  { %v3165_v61 = vpop.permute.xlu2 %3164 }
0x1200   :  { %v3184_v15 = vmul.f32 %v3165_v61, %v6365_v38  ;;  %v3031_v62 = vadd.f32 %v6353_v27, %v3030_v52  ;;  %v3069_v52 = vor.u32 1.1754944e-38, %v3068_v12 }
0x1202   :  { %3204 = vrot.lane.b32.xlu1 %v3184_v15, %s4597_s17  ;;  %v6388_v15 = vsel %vm3127_vm11, %v3129_v22, %v3125_v60  ;;  %v3038_v60 = vand.u32 2147483648, %v6335_v6  ;;  %v3105_v22 = vmul.f32 %v6372_v1, %v3104_v36  ;;  %v3035_v23 = vsel %vm3034_vm9, %v6353_v27, %v3031_v62  ;;  %vm3079_vm9 = vmor %vm3077_vm8, %vm3078_vm13 }
0x1203   :  { %v6410_v34 = vsel %vm3067_vm10, %v3069_v52, %v3065_v24  ;;  %vm3037_vm11 = vcmp.eq.f32.partialorder %v3036_v37, 8.507059e+37  ;;  %v3113_v6 = vand.u32 2147483648, %v6345_v48  ;;  %vm3137_vm13 = vweird.f32 %v6367_v14 }
0x1204   :  { %v3106_v27 = vadd.f32 %v6372_v1, %v3105_v22  ;;  %vm3139_vm14 = vmor %vm3137_vm13, %vm3138_vm12 }
0x1205   :  { %v3114_v24 = vor.u32 1.1754944e-38, %v3113_v6  ;;  %v3141_v6 = vand.u32 2147483647, %v6367_v14 }
0x1206   :  { %v3110_v37 = vsel %vm3109_vm15, %v6372_v1, %v3106_v27 }
0x1207   :  { %v3169_v61 = vpop.permute.xlu2 %3168  ;;  %vm3142_vm15 = vcmp.eq.f32.partialorder %v3141_v6, 8.507059e+37 }
0x1208   :  { %v3186_v13 = vmul.f32 %v3169_v61, %v6388_v15  ;;  %v3075_v61 = vmul.f32 %v6375_v26, %v3074_v42  ;;  %v3134_v42 = vsub.f32 1.0, %v3133_v0 }
0x120a   :  { %3208 = vrot.lane.b32.xlu1 %v3186_v13, %s4597_s17  ;;  %v3039_v13 = vor.u32 1.1754944e-38, %v3038_v60  ;;  %v3076_v62 = vadd.f32 %v6375_v26, %v3075_v61  ;;  %v3081_v60 = vand.u32 2147483647, %v6347_v28  ;;  %v3135_v52 = vmul.f32 %v6396_v45, %v3134_v42 }
0x120c   :  { %v6414_v36 = vsel %vm3037_vm11, %v3039_v13, %v3035_v23  ;;  %v3080_v22 = vsel %vm3079_vm9, %v6375_v26, %v3076_v62  ;;  %v3084_v23 = vor.u32 1.1754944e-38, %v3083_v3  ;;  %vm3082_vm11 = vcmp.eq.f32.partialorder %v3081_v60, 8.507059e+37 }
0x120d   :  { %v3136_v1 = vadd.f32 %v6396_v45, %v3135_v52  ;;  %v3143_v26 = vand.u32 2147483648, %v6367_v14 }
0x120f   :  { %v3161_v30 = vpop.permute.xlu0 %3160  ;;  %v3144_v27 = vor.u32 1.1754944e-38, %v3143_v26 }
0x1210   :  { %v3182_v49 = vmul.f32 %v3161_v30, %v6410_v34  ;;  %v3157_v31 = vpop.permute.xlu1 %3156  ;;  %v3111_v30 = vand.u32 2147483647, %v6345_v48 }
0x1211   :  { %v3180_v12 = vmul.f32 %v3157_v31, %v6414_v36  ;;  %v3140_v31 = vsel %vm3139_vm14, %v6396_v45, %v3136_v1 }
0x1212   :  { %3200 = vrot.lane.b32.xlu2 %v3182_v49, %s4597_s17  ;;  %vm3112_vm10 = vcmp.eq.f32.partialorder %v3111_v30, 8.507059e+37  ;;  %v6434_v49 = vsel %vm3082_vm11, %v3084_v23, %v3080_v22  ;;  %v6445_v62 = vsel %vm3142_vm15, %v3144_v27, %v3140_v31 }
0x1213   :  { %3196 = vrot.lane.b32.xlu0 %v3180_v12, %s4597_s17  ;;  %v6431_v61 = vsel %vm3112_vm10, %v3114_v24, %v3110_v37 }
0x1217   :  { %v3167_v48 = vpop.permute.xlu0 %3166 }
0x1218   :  { %v3185_v0 = vmul.f32 %v3167_v48, %v6431_v61  ;;  %v3163_v13 = vpop.permute.xlu1 %3162 }
0x1219   :  { %v3183_v28 = vmul.f32 %v3163_v13, %v6434_v49 }
0x121a   :  { %3206 = vrot.lane.b32.xlu2 %v3185_v0, %s4597_s17 }
0x121b   :  { %3202 = vrot.lane.b32.xlu0 %v3183_v28, %s4597_s17 }
0x1220   :  { %v3171_v12 = vpop.permute.xlu1 %3170 }
0x1221   :  { %v3187_v42 = vmul.f32 %v3171_v12, %v6445_v62 }
0x1223   :  { %3210 = vrot.lane.b32.xlu0 %v3187_v42, %s4597_s17 }
0x126c   :  { %v3201_v30 = vpop.permute.xlu2 %3200  ;;  %v3199_v3 = vpop.permute.xlu1 %3198 }
0x126d   :  { %v3222_v60 = vadd.f32 %v3201_v30, %v4790_v16  ;;  %v3221_v37 = vadd.f32 %v3199_v3, %v4784_v8 }
0x126f   :  { %4504 = vtanh.f32 %v3222_v60 }
0x1270   :  { %4506 = vtanh.f32 %v3221_v37 }
0x1274   :  { %v3207_v14 = vpop.permute.xlu2 %3206  ;;  %v3205_v24 = vpop.permute.xlu1 %3204 }
0x1275   :  { %v6451_v45 = vpop.eup %4504  ;;  %v3225_v22 = vadd.f32 %v3207_v14, %v4795_v21  ;;  %v3224_v52 = vadd.f32 %v3205_v24, %v4802_v33 }
0x1276   :  { %v6455_v23 = vpop.eup %4506  ;;  %v3246_v48 = vrot.slane %v6451_v45, 1 }
0x1277   :  { %v3245_v0 = vrot.slane %v6455_v23, 1  ;;  %4508 = vtanh.f32 %v3225_v22 }
0x1278   :  { %4510 = vtanh.f32 %v3224_v52  ;;  %v3262_v13 = vsub.f32 %v6266_v11, %v3246_v48 }
0x1279   :  { %v3261_v28 = vsub.f32 %v6263_v56, %v3245_v0 }
0x127a   :  { %v3278_v1 = vrot.slane %v3262_v13, 7 }
0x127b   :  { %v3277_v26 = vrot.slane %v3261_v28, 7 }
0x127c   :  { %3288 = vrot.lane.b32.xlu1 %v3278_v1, %s4599_s2  ;;  %v3209_v6 = vpop.permute.xlu1 %3208 }
0x127d   :  { %v6462_v31 = vpop.eup %4508  ;;  %v3226_v27 = vadd.f32 %v3209_v6, %v4804_v35  ;;  %3286 = vrot.lane.b32.xlu0 %v3277_v26, %s4599_s2 }
0x127e   :  { %v6466_v12 = vpop.eup %4510  ;;  %v3249_v42 = vrot.slane %v6462_v31, 1 }
0x127f   :  { %v3248_v30 = vrot.slane %v6466_v12, 1  ;;  %4512 = vtanh.f32 %v3226_v27 }
0x1280   :  { %v3265_v3 = vsub.f32 %v6287_v59, %v3249_v42 }
0x1281   :  { %v3264_v60 = vsub.f32 %v6276_v57, %v3248_v30 }
0x1282   :  { %v3281_v37 = vrot.slane %v3265_v3, 7 }
0x1283   :  { %v3280_v14 = vrot.slane %v3264_v60, 7 }
0x1284   :  { %3294 = vrot.lane.b32.xlu1 %v3281_v37, %s4599_s2 }
0x1285   :  { %v6473_v24 = vpop.eup %4512  ;;  %3292 = vrot.lane.b32.xlu0 %v3280_v14, %s4599_s2  ;;  %v3197_v22 = vpop.permute.xlu0 %3196 }
0x1286   :  { %v3250_v52 = vrot.slane %v6473_v24, 1  ;;  %v3220_v48 = vadd.f32 %v3197_v22, %v4782_v4 }
0x1288   :  { %4514 = vtanh.f32 %v3220_v48  ;;  %v3266_v0 = vsub.f32 %v6280_v19, %v3250_v52 }
0x128a   :  { %v3282_v13 = vrot.slane %v3266_v0, 7 }
0x128d   :  { %3296 = vrot.lane.b32.xlu0 %v3282_v13, %s4599_s2  ;;  %v3203_v28 = vpop.permute.xlu0 %3202 }
0x128e   :  { %v4515_v1 = vpop.eup %4514  ;;  %v3223_v26 = vadd.f32 %v3203_v28, %v4792_v18 }
0x128f   :  { %v3244_v6 = vrot.slane %v4515_v1, 1 }
0x1290   :  { %4516 = vtanh.f32 %v3223_v26 }
0x1291   :  { %v3260_v27 = vsub.f32 %v6260_v5, %v3244_v6 }
0x1293   :  { %v3276_v42 = vrot.slane %v3260_v27, 7 }
0x1295   :  { %3284 = vrot.lane.b32.xlu2 %v3276_v42, %s4599_s2  ;;  %v3211_v30 = vpop.permute.xlu0 %3210 }
0x1296   :  { %v4517_v3 = vpop.eup %4516  ;;  %v3227_v60 = vadd.f32 %v3211_v30, %v4811_v46 }
0x1297   :  { %v3247_v37 = vrot.slane %v4517_v3, 1 }
0x1298   :  { %4518 = vtanh.f32 %v3227_v60 }
0x1299   :  { %v3263_v14 = vsub.f32 %v6270_v7, %v3247_v37 }
0x129b   :  { %v3279_v22 = vrot.slane %v3263_v14, 7 }
0x129d   :  { %3290 = vrot.lane.b32.xlu2 %v3279_v22, %s4599_s2 }
0x129e   :  { %v4519_v52 = vpop.eup %4518 }
0x129f   :  { %v3251_v48 = vrot.slane %v4519_v52, 1 }
0x12a1   :  { %v3267_v0 = vsub.f32 %v6283_v41, %v3251_v48 }
0x12a3   :  { %v3283_v13 = vrot.slane %v3267_v0, 7 }
0x12a5   :  { %3298 = vrot.lane.b32.xlu2 %v3283_v13, %s4599_s2 }
0x12ee   :  { %v3289_v28 = vpop.permute.xlu1 %3288 }
0x12ef   :  { %v3310_v26 = vmul.f32 %v3289_v28, %v6410_v34  ;;  %v3285_v6 = vpop.permute.xlu2 %3284  ;;  %v3287_v27 = vpop.permute.xlu0 %3286 }
0x12f0   :  { %v3308_v42 = vmul.f32 %v3285_v6, %v6414_v36  ;;  %v3309_v30 = vmul.f32 %v3287_v27, %v6343_v58 }
0x12f1   :  { %3328 = vrot.lane.b32.xlu0 %v3310_v26, %s4600_s26 }
0x12f2   :  { %3324 = vrot.lane.b32.xlu1 %v3308_v42, %s4600_s26  ;;  %3326 = vrot.lane.b32.xlu2 %v3309_v30, %s4600_s26 }
0x12f6   :  { %v3295_v60 = vpop.permute.xlu1 %3294 }
0x12f7   :  { %v3313_v37 = vmul.f32 %v3295_v60, %v6431_v61  ;;  %v3291_v14 = vpop.permute.xlu2 %3290  ;;  %v3293_v22 = vpop.permute.xlu0 %3292 }
0x12f8   :  { %v3311_v48 = vmul.f32 %v3291_v14, %v6434_v49  ;;  %v3312_v34 = vmul.f32 %v3293_v22, %v6365_v38 }
0x12f9   :  { %3334 = vrot.lane.b32.xlu0 %v3313_v37, %s4600_s26 }
0x12fa   :  { %3330 = vrot.lane.b32.xlu1 %v3311_v48, %s4600_s26  ;;  %3332 = vrot.lane.b32.xlu2 %v3312_v34, %s4600_s26 }
0x12ff   :  { %v3299_v58 = vpop.permute.xlu2 %3298  ;;  %v3297_v36 = vpop.permute.xlu0 %3296 }
0x1300   :  { %v3315_v0 = vmul.f32 %v3299_v58, %v6445_v62  ;;  %v3314_v13 = vmul.f32 %v3297_v36, %v6388_v15 }
0x1302   :  { %3338 = vrot.lane.b32.xlu1 %v3315_v0, %s4600_s26  ;;  %3336 = vrot.lane.b32.xlu2 %v3314_v13, %s4600_s26 }
0x134c   :  { %v3327_v61 = vpop.permute.xlu2 %3326 }
0x134d   :  { %v6507_v26 = vadd.f32 %v6455_v23, %v3327_v61 }
0x134f   :  { %v3388_v15 = vrot.slane %v6507_v26, 5 }
0x1354   :  { %v3333_v27 = vpop.permute.xlu2 %3332 }
0x1355   :  { %v6515_v42 = vadd.f32 %v6466_v12, %v3333_v27 }
0x1357   :  { %v3394_v22 = vrot.slane %v6515_v42, 2 }
0x135c   :  { %v3337_v58 = vpop.permute.xlu2 %3336 }
0x135d   :  { %v6534_v61 = vadd.f32 %v6473_v24, %v3337_v58 }
0x1363   :  { %v3329_v49 = vpop.permute.xlu0 %3328 }
0x1364   :  { %v3325_v28 = vpop.permute.xlu1 %3324  ;;  %v6510_v6 = vadd.f32 %v6451_v45, %v3329_v49 }
0x1365   :  { %v6504_v38 = vadd.f32 %v4515_v1, %v3325_v28 }
0x1366   :  { %v3390_v30 = vrot.slane %v6510_v6, 4 }
0x1367   :  { %v3387_v62 = vrot.slane %v6504_v38, 6 }
0x1369   :  { %v3389_v1 = vsel %vm659_vm0, %v3388_v15, %v3387_v62 }
0x136a   :  { %v3391_v48 = vsel %vm662_vm1, %v3390_v30, %v3389_v1 }
0x136b   :  { %v3335_v37 = vpop.permute.xlu0 %3334 }
0x136c   :  { %v3331_v60 = vpop.permute.xlu1 %3330  ;;  %v6523_v45 = vadd.f32 %v6462_v31, %v3335_v37 }
0x136d   :  { %v6519_v14 = vadd.f32 %v4517_v3, %v3331_v60 }
0x136e   :  { %v3396_v36 = vrot.slane %v6523_v45, 1 }
0x136f   :  { %v3392_v23 = vrot.slane %v6519_v14, 3 }
0x1371   :  { %v3393_v12 = vsel %vm665_vm2, %v3392_v23, %v3391_v48 }
0x1372   :  { %v3395_v34 = vsel %vm668_vm3, %v3394_v22, %v3393_v12 }
0x1373   :  { %v3397_v3 = vsel %vm671_vm4, %v3396_v36, %v3395_v34 }
0x1374   :  { %v3339_v0 = vpop.permute.xlu1 %3338  ;;  %v3398_v49 = vsel %vm674_vm5, %v6534_v61, %v3397_v3 }
0x1375   :  { %v6530_v13 = vadd.f32 %v4519_v52, %v3339_v0 }
0x1377   :  { %v3399_v31 = vrot.slane %v6530_v13, 7 }
0x1379   :  { %v3400_v28 = vsel %vm677_vm6, %v3399_v31, %v3398_v49 }
0x137a   :  { %3401 = vrot.lane.b32.xlu0 %v3400_v28, %s4598_s24 }
0x13ec   :  { %v3402_v27 = vpop.permute.xlu0 %3401 }
0x13ed   :  { %4099 = vmatmul.msk.f32.vlgmr.msrb.gmra.mxu3 %vm270_vm7, %v3402_v27 }
0x1470   :  { %v3422_v62 = vpop.f32.mrf.mxu3 }
0x1471   :  { %v3601_v52 = vadd.f32 %v3422_v62, %v4765_v44  ;;  %v3428_v44 = vrot.slane %v3422_v62, 3  ;;  %v3431_v48 = vrot.slane %v3422_v62, 6  ;;  %v3426_v58 = vrot.slane %v3422_v62, 1 }
0x1472   :  { %v3429_v49 = vrot.slane %v3422_v62, 4  ;;  %v3427_v27 = vrot.slane %v3422_v62, 2 }
0x1473   :  { %v3606_v15 = vrot.slane %v3601_v52, 4  ;;  %v3605_v30 = vrot.slane %v3601_v52, 3  ;;  %v3604_v60 = vrot.slane %v3601_v52, 2  ;;  %v3609_v24 = vrot.slane %v3601_v52, 7 }
0x1474   :  { %v3608_v37 = vrot.slane %v3601_v52, 6  ;;  %v3607_v1 = vrot.slane %v3601_v52, 5  ;;  %v3603_v23 = vrot.slane %v3601_v52, 1  ;;  %v3443_v22 = vadd.f32 %v3428_v44, %v4790_v16 }
0x1475   :  { %3616 = vrot.lane.b32.xlu0 %v3606_v15, %s4598_s24  ;;  %3614 = vrot.lane.b32.xlu2 %v3605_v30, %s4598_s24  ;;  %v3446_v34 = vadd.f32 %v3431_v48, %v4795_v21  ;;  %v3441_v3 = vadd.f32 %v3426_v58, %v4782_v4  ;;  %v3444_v15 = vadd.f32 %v3429_v49, %v4792_v18 }
0x1476   :  { %3612 = vrot.lane.b32.xlu1 %v3604_v60, %s4598_s24  ;;  %v4102_v12 = vmul.f32 -1.442695, %v3443_v22  ;;  %v3442_v60 = vadd.f32 %v3427_v27, %v4784_v8 }
0x1477   :  { %v4105_v36 = vmul.f32 -1.442695, %v3446_v34  ;;  %v4100_v28 = vmul.f32 -1.442695, %v3441_v3 }
0x1478   :  { %4520 = vpow2.f32 %v4102_v12  ;;  %v4101_v44 = vmul.f32 -1.442695, %v3442_v60  ;;  %v3448_v60 = vadd.f32 %v3422_v62, %v4811_v46 }
0x1479   :  { %4522 = vpow2.f32 %v4105_v36 }
0x147d   :  { %3622 = vrot.lane.b32.xlu0 %v3609_v24, %s4598_s24  ;;  %3620 = vrot.lane.b32.xlu2 %v3608_v37, %s4598_s24  ;;  %v3432_v37 = vrot.slane %v3422_v62, 7 }
0x147e   :  { %3618 = vrot.lane.b32.xlu1 %v3607_v1, %s4598_s24  ;;  %v4521_v0 = vpop.eup %4520  ;;  %v3430_v1 = vrot.slane %v3422_v62, 5 }
0x147f   :  { %v3475_v31 = vadd.f32 1.0, %v4521_v0  ;;  %v3447_v12 = vadd.f32 %v3432_v37, %v4804_v35 }
0x1480   :  { %v3445_v34 = vadd.f32 %v3430_v1, %v4802_v33 }
0x1481   :  { %4524 = vrcp.f32 %v3475_v31  ;;  %v4106_v3 = vmul.f32 -1.442695, %v3447_v12  ;;  %vm3516_vm8 = vweird.f32 %v3475_v31  ;;  %v3520_v12 = vand.u32 2147483647, %v3475_v31 }
0x1482   :  { %4526 = vpow2.f32 %v4100_v28  ;;  %v4104_v49 = vmul.f32 -1.442695, %v3445_v34  ;;  %v4107_v34 = vmul.f32 -1.442695, %v3448_v60 }
0x1483   :  { %vm3521_vm10 = vcmp.eq.f32.partialorder %v3520_v12, 8.507059e+37 }
0x1485   :  { %3610 = vrot.lane.b32.xlu2 %v3603_v23, %s4598_s24  ;;  %v4103_v23 = vmul.f32 -1.442695, %v3444_v15 }
0x1486   :  { %3624 = vrot.lane.b32.xlu1 %v3601_v52, %s4598_s24  ;;  %v4523_v52 = vpop.eup %4522 }
0x1487   :  { %v6555_v30 = vadd.f32 1.0, %v4523_v52  ;;  %v4525_v24 = vpop.eup %4524 }
0x1488   :  { %v4527_v22 = vpop.eup %4526  ;;  %v3512_v48 = vmul.f32 %v4525_v24, %v3475_v31  ;;  %vm3517_vm7 = vweird.f32 %v4525_v24 }
0x1489   :  { %4528 = vrcp.f32 %v6555_v30  ;;  %v6561_v58 = vadd.f32 1.0, %v4527_v22  ;;  %vm3518_vm9 = vmor %vm3516_vm8, %vm3517_vm7  ;;  %vm3561_vm12 = vweird.f32 %v6555_v30 }
0x148a   :  { %4530 = vpow2.f32 %v4103_v23  ;;  %v3513_v36 = vsub.f32 1.0, %v3512_v48  ;;  %v3522_v48 = vand.u32 2147483648, %v3475_v31 }
0x148b   :  { %4532 = vpow2.f32 %v4101_v44  ;;  %vm3486_vm7 = vweird.f32 %v6561_v58 }
0x148c   :  { %4534 = vrcp.f32 %v6561_v58  ;;  %v3514_v27 = vmul.f32 %v4525_v24, %v3513_v36 }
0x148d   :  { %4536 = vpow2.f32 %v4106_v3 }
0x148e   :  { %4538 = vpow2.f32 %v4104_v49  ;;  %v3515_v1 = vadd.f32 %v4525_v24, %v3514_v27  ;;  %v3523_v27 = vor.u32 1.1754944e-38, %v3522_v48  ;;  %v3565_v48 = vand.u32 2147483647, %v6555_v30 }
0x148f   :  { %v4529_v0 = vpop.eup %4528 }
0x1490   :  { %v4531_v28 = vpop.eup %4530  ;;  %v3557_v52 = vmul.f32 %v4529_v0, %v6555_v30  ;;  %v3519_v49 = vsel %vm3518_vm9, %v4525_v24, %v3515_v1  ;;  %vm3562_vm11 = vweird.f32 %v4529_v0  ;;  %vm3566_vm14 = vcmp.eq.f32.partialorder %v3565_v48, 8.507059e+37 }
0x1491   :  { %v4533_v15 = vpop.eup %4532  ;;  %v6566_v37 = vadd.f32 1.0, %v4531_v28  ;;  %vm3563_vm13 = vmor %vm3561_vm12, %vm3562_vm11  ;;  %v3490_v48 = vand.u32 2147483647, %v6561_v58 }
0x1492   :  { %v3558_v23 = vsub.f32 1.0, %v3557_v52  ;;  %v6568_v44 = vadd.f32 1.0, %v4533_v15  ;;  %v6570_v22 = vpop.eup %4534  ;;  %v6576_v15 = vsel %vm3521_vm10, %v3523_v27, %v3519_v49 }
0x1493   :  { %v4537_v36 = vpop.eup %4536  ;;  %4540 = vrcp.f32 %v6566_v37  ;;  %v3482_v28 = vmul.f32 %v6570_v22, %v6561_v58  ;;  %vm3487_vm15 = vweird.f32 %v6570_v22  ;;  %vm3491_vm9 = vcmp.eq.f32.partialorder %v3490_v48, 8.507059e+37 }
0x1494   :  { %v4539_v3 = vpop.eup %4538  ;;  %v3559_v62 = vmul.f32 %v4529_v0, %v3558_v23  ;;  %4542 = vrcp.f32 %v6568_v44  ;;  %v6578_v31 = vadd.f32 1.0, %v4537_v36  ;;  %v3567_v23 = vand.u32 2147483648, %v6555_v30  ;;  %vm3488_vm8 = vmor %vm3486_vm7, %vm3487_vm15 }
0x1495   :  { %4544 = vpow2.f32 %v4107_v34  ;;  %v6580_v60 = vadd.f32 1.0, %v4539_v3  ;;  %v3483_v24 = vsub.f32 1.0, %v3482_v28  ;;  %vm3531_vm12 = vweird.f32 %v6566_v37 }
0x1496   :  { %v3560_v19 = vadd.f32 %v4529_v0, %v3559_v62  ;;  %4546 = vrcp.f32 %v6578_v31  ;;  %v3568_v49 = vor.u32 1.1754944e-38, %v3567_v23  ;;  %v3535_v48 = vand.u32 2147483647, %v6566_v37 }
0x1497   :  { %v3484_v36 = vmul.f32 %v6570_v22, %v3483_v24  ;;  %4548 = vrcp.f32 %v6580_v60  ;;  %v3492_v24 = vand.u32 2147483648, %v6561_v58 }
0x1498   :  { %v3564_v34 = vsel %vm3563_vm13, %v4529_v0, %v3560_v19  ;;  %vm3536_vm7 = vcmp.eq.f32.partialorder %v3535_v48, 8.507059e+37  ;;  %v3552_v48 = vand.u32 2147483648, %v6580_v60 }
0x1499   :  { %v6583_v1 = vpop.eup %4540  ;;  %v6598_v28 = vsel %vm3566_vm14, %v3568_v49, %v3564_v34  ;;  %v3485_v19 = vadd.f32 %v6570_v22, %v3484_v36  ;;  %vm3501_vm14 = vweird.f32 %v6568_v44 }
0x149a   :  { %v6586_v57 = vpop.eup %4542  ;;  %v3527_v3 = vmul.f32 %v6583_v1, %v6566_v37  ;;  %vm3532_vm10 = vweird.f32 %v6583_v1 }
0x149b   :  { %v4545_v12 = vpop.eup %4544  ;;  %vm3502_vm11 = vweird.f32 %v6586_v57  ;;  %vm3533_vm13 = vmor %vm3531_vm12, %vm3532_vm10 }
0x149c   :  { %v6600_v30 = vadd.f32 1.0, %v4545_v12  ;;  %v3528_v0 = vsub.f32 1.0, %v3527_v3  ;;  %v3489_v12 = vsel %vm3488_vm8, %v6570_v22, %v3485_v19  ;;  %v3493_v3 = vor.u32 1.1754944e-38, %v3492_v24  ;;  %vm3503_vm15 = vmor %vm3501_vm14, %vm3502_vm11 }
0x149d   :  { %vm3576_vm11 = vweird.f32 %v6578_v31 }
0x149e   :  { %v3529_v34 = vmul.f32 %v6583_v1, %v3528_v0  ;;  %4550 = vrcp.f32 %v6600_v30  ;;  %v3537_v0 = vand.u32 2147483648, %v6566_v37 }
0x14a0   :  { %v3530_v22 = vadd.f32 %v6583_v1, %v3529_v34  ;;  %v3505_v34 = vand.u32 2147483647, %v6568_v44 }
0x14a2   :  { %vm3506_vm8 = vcmp.eq.f32.partialorder %v3505_v34, 8.507059e+37 }
0x14cf   :  { %v3615_v52 = vpop.permute.xlu2 %3614 }
0x14d0   :  { %v3636_v41 = vmul.f32 %v3615_v52, %v6576_v15  ;;  %v6605_v52 = vpop.eup %4546 }
0x14d1   :  { %v6608_v59 = vpop.eup %4548  ;;  %v3572_v36 = vmul.f32 %v6605_v52, %v6578_v31 }
0x14d2   :  { %3654 = vrot.lane.b32.xlu1 %v3636_v41, %s4597_s17  ;;  %v3497_v41 = vmul.f32 %v6586_v57, %v6568_v44  ;;  %v6629_v7 = vpop.eup %4550  ;;  %vm3547_vm10 = vweird.f32 %v6608_v59 }
0x14d3   :  { %v3573_v19 = vsub.f32 1.0, %v3572_v36  ;;  %v3534_v36 = vsel %vm3533_vm13, %v6583_v1, %v3530_v22  ;;  %v3587_v37 = vmul.f32 %v6629_v7, %v6600_v30  ;;  %vm3546_vm13 = vweird.f32 %v6580_v60 }
0x14d4   :  { %v3498_v23 = vsub.f32 1.0, %v3497_v41  ;;  %v3542_v41 = vmul.f32 %v6608_v59, %v6580_v60  ;;  %vm3548_vm14 = vmor %vm3546_vm13, %vm3547_vm10  ;;  %vm1567_vm13 = vcmask 392450  }
0x14d6   :  { %v3499_v49 = vmul.f32 %v6586_v57, %v3498_v23  ;;  %v3543_v23 = vsub.f32 1.0, %v3542_v41 }
0x14d7   :  { %v3621_v62 = vpop.permute.xlu2 %3620 }
0x14d8   :  { %v3639_v27 = vmul.f32 %v3621_v62, %v6598_v28  ;;  %v3500_v24 = vadd.f32 %v6586_v57, %v3499_v49  ;;  %v3538_v49 = vor.u32 1.1754944e-38, %v3537_v0 }
0x14da   :  { %3660 = vrot.lane.b32.xlu1 %v3639_v27, %s4597_s17  ;;  %v6621_v27 = vsel %vm3491_vm9, %v3493_v3, %v3489_v12  ;;  %v3507_v12 = vand.u32 2147483648, %v6568_v44  ;;  %v3574_v3 = vmul.f32 %v6605_v52, %v3573_v19  ;;  %v3504_v41 = vsel %vm3503_vm15, %v6586_v57, %v3500_v24 }
0x14db   :  { %v6643_v11 = vsel %vm3536_vm7, %v3538_v49, %v3534_v36  ;;  %v3582_v44 = vand.u32 2147483648, %v6578_v31  ;;  %vm3577_vm9 = vweird.f32 %v6605_v52 }
0x14dc   :  { %v3575_v57 = vadd.f32 %v6605_v52, %v3574_v3  ;;  %vm3578_vm12 = vmor %vm3576_vm11, %vm3577_vm9  ;;  %vm3591_vm9 = vweird.f32 %v6600_v30 }
0x14dd   :  { %v3583_v36 = vor.u32 1.1754944e-38, %v3582_v44  ;;  %v3595_v44 = vand.u32 2147483647, %v6600_v30 }
0x14de   :  { %v3579_v34 = vsel %vm3578_vm12, %v6605_v52, %v3575_v57  ;;  %vm1117_vm12 = vcmask 261249  }
0x14df   :  { %v3611_v62 = vpop.permute.xlu2 %3610  ;;  %vm3596_vm11 = vcmp.eq.f32.partialorder %v3595_v44, 8.507059e+37 }
0x14e0   :  { %v3634_v58 = vmul.f32 %v3611_v62, %v6621_v27  ;;  %v3544_v62 = vmul.f32 %v6608_v59, %v3543_v23  ;;  %v3588_v23 = vsub.f32 1.0, %v3587_v37 }
0x14e2   :  { %3650 = vrot.lane.b32.xlu1 %v3634_v58, %s4597_s17  ;;  %v3508_v58 = vor.u32 1.1754944e-38, %v3507_v12  ;;  %v3545_v24 = vadd.f32 %v6608_v59, %v3544_v62  ;;  %v3550_v12 = vand.u32 2147483647, %v6580_v60  ;;  %v3589_v49 = vmul.f32 %v6629_v7, %v3588_v23 }
0x14e4   :  { %v6647_v19 = vsel %vm3506_vm8, %v3508_v58, %v3504_v41  ;;  %v3549_v3 = vsel %vm3548_vm14, %v6608_v59, %v3545_v24  ;;  %v3553_v41 = vor.u32 1.1754944e-38, %v3552_v48  ;;  %vm3551_vm7 = vcmp.eq.f32.partialorder %v3550_v12, 8.507059e+37 }
0x14e5   :  { %v3590_v52 = vadd.f32 %v6629_v7, %v3589_v49  ;;  %vm3592_vm8 = vweird.f32 %v6629_v7  ;;  %v3597_v59 = vand.u32 2147483648, %v6600_v30  ;;  %vm2021_vm14 = vcmask 523651  }
0x14e6   :  { %vm3593_vm10 = vmor %vm3591_vm9, %vm3592_vm8  ;;  %vm3385_vm8 = vcmask 915200   ;;  %vm3839_vm9 = vcmask 1047424  }
0x14e7   :  { %v3617_v5 = vpop.permute.xlu0 %3616  ;;  %v3598_v57 = vor.u32 1.1754944e-38, %v3597_v59 }
0x14e8   :  { %v3637_v1 = vmul.f32 %v3617_v5, %v6643_v11  ;;  %v3613_v22 = vpop.permute.xlu1 %3612  ;;  %v3580_v5 = vand.u32 2147483647, %v6578_v31 }
0x14e9   :  { %v3635_v0 = vmul.f32 %v3613_v22, %v6647_v19  ;;  %v3594_v22 = vsel %vm3593_vm10, %v6629_v7, %v3590_v52 }
0x14ea   :  { %3656 = vrot.lane.b32.xlu2 %v3637_v1, %s4597_s17  ;;  %vm3581_vm15 = vcmp.eq.f32.partialorder %v3580_v5, 8.507059e+37  ;;  %v6667_v1 = vsel %vm3551_vm7, %v3553_v41, %v3549_v3  ;;  %v6678_v24 = vsel %vm3596_vm11, %v3598_v57, %v3594_v22  ;;  %vm2931_vm7 = vcmask 782976  }
0x14eb   :  { %3652 = vrot.lane.b32.xlu0 %v3635_v0, %s4597_s17  ;;  %v6664_v62 = vsel %vm3581_vm15, %v3583_v36, %v3579_v34  ;;  %vm3383_vm15 = vcmask 917254  }
0x14ef   :  { %v3623_v31 = vpop.permute.xlu0 %3622 }
0x14f0   :  { %v3640_v37 = vmul.f32 %v3623_v31, %v6664_v62  ;;  %v3619_v58 = vpop.permute.xlu1 %3618 }
0x14f1   :  { %v3638_v60 = vmul.f32 %v3619_v58, %v6667_v1 }
0x14f2   :  { %3662 = vrot.lane.b32.xlu2 %v3640_v37, %s4597_s17 }
0x14f3   :  { %3658 = vrot.lane.b32.xlu0 %v3638_v60, %s4597_s17 }
0x14f8   :  { %v3625_v0 = vpop.permute.xlu1 %3624 }
0x14f9   :  { %v3641_v23 = vmul.f32 %v3625_v0, %v6678_v24 }
0x14fb   :  { %3664 = vrot.lane.b32.xlu0 %v3641_v23, %s4597_s17 }
0x1544   :  { %v3657_v5 = vpop.permute.xlu2 %3656  ;;  %v3655_v48 = vpop.permute.xlu1 %3654 }
0x1545   :  { %v3677_v12 = vadd.f32 %v3657_v5, %v4792_v18  ;;  %v3676_v34 = vadd.f32 %v3655_v48, %v4790_v16 }
0x1547   :  { %4552 = vtanh.f32 %v3677_v12 }
0x1548   :  { %4554 = vtanh.f32 %v3676_v34 }
0x154c   :  { %v3663_v30 = vpop.permute.xlu2 %3662  ;;  %v3661_v36 = vpop.permute.xlu1 %3660 }
0x154d   :  { %v6684_v7 = vpop.eup %4552  ;;  %v3680_v3 = vadd.f32 %v3663_v30, %v4804_v35  ;;  %v3679_v49 = vadd.f32 %v3661_v36, %v4795_v21 }
0x154e   :  { %v6688_v41 = vpop.eup %4554  ;;  %v3701_v31 = vrot.slane %v6684_v7, 1 }
0x154f   :  { %v3700_v37 = vrot.slane %v6688_v41, 1  ;;  %4556 = vtanh.f32 %v3680_v3 }
0x1550   :  { %4558 = vtanh.f32 %v3679_v49  ;;  %v3717_v16 = vsub.f32 %v6519_v14, %v3701_v31 }
0x1551   :  { %v3716_v18 = vsub.f32 %v6510_v6, %v3700_v37 }
0x1552   :  { %v3733_v58 = vrot.slane %v3717_v16, 7 }
0x1553   :  { %v3732_v60 = vrot.slane %v3716_v18, 7 }
0x1554   :  { %3744 = vrot.lane.b32.xlu1 %v3733_v58, %s4599_s2  ;;  %v3651_v52 = vpop.permute.xlu1 %3650 }
0x1555   :  { %v6695_v35 = vpop.eup %4556  ;;  %3742 = vrot.lane.b32.xlu0 %v3732_v60, %s4599_s2  ;;  %v3674_v21 = vadd.f32 %v3651_v52, %v4782_v4 }
0x1556   :  { %v6699_v59 = vpop.eup %4558  ;;  %v3704_v44 = vrot.slane %v6695_v35, 1 }
0x1557   :  { %v3703_v22 = vrot.slane %v6699_v59, 1  ;;  %4560 = vtanh.f32 %v3674_v21 }
0x1558   :  { %v3720_v57 = vsub.f32 %v6534_v61, %v3704_v44 }
0x1559   :  { %v3719_v0 = vsub.f32 %v6523_v45, %v3703_v22 }
0x155a   :  { %v3736_v23 = vrot.slane %v3720_v57, 7 }
0x155b   :  { %v3735_v5 = vrot.slane %v3719_v0, 7 }
0x155c   :  { %3750 = vrot.lane.b32.xlu1 %v3736_v23, %s4599_s2 }
0x155d   :  { %v6706_v48 = vpop.eup %4560  ;;  %3748 = vrot.lane.b32.xlu0 %v3735_v5, %s4599_s2  ;;  %v3653_v4 = vpop.permute.xlu0 %3652 }
0x155e   :  { %v3698_v12 = vrot.slane %v6706_v48, 1  ;;  %v3675_v34 = vadd.f32 %v3653_v4, %v4784_v8 }
0x1560   :  { %4562 = vtanh.f32 %v3675_v34  ;;  %v3714_v30 = vsub.f32 %v6504_v38, %v3698_v12 }
0x1562   :  { %v3730_v36 = vrot.slane %v3714_v30, 7  ;;  %v1098_v30 = vrot.slane %v5278_v50, 7 }
0x1565   :  { %v3659_v3 = vpop.permute.xlu0 %3658  ;;  %3738 = vrot.lane.b32.xlu0 %v3730_v36, %s4599_s2  ;;  %v1099_v36 = vsel %vm662_vm1, %v1098_v30, %v5271_v10  ;;  %v1104_v10 = vrot.slane %v5286_v55, 4  ;;  %v6947_v30 = vld [vmem:[#allocation21_spill] sm:$0xff] }
0x1566   :  { %v6713_v49 = vpop.eup %4562  ;;  %v3678_v31 = vadd.f32 %v3659_v3, %v4802_v33  ;;  %v1102_v3 = vrot.slane %v5280_v51, 5 }
0x1567   :  { %v3699_v37 = vrot.slane %v6713_v49, 1 }
0x1568   :  { %4564 = vtanh.f32 %v3678_v31  ;;  %v1100_v31 = vrot.slane %v5275_v25, 6  ;;  %v1108_v25 = vrot.slane %v5298_v47, 2  ;;  %v2011_v47 = vrot.slane %v5798_v2, 2 }
0x1569   :  { %v3715_v16 = vsub.f32 %v6507_v26, %v3699_v37  ;;  %v2013_v2 = vrot.slane %v5793_v32, 1  ;;  %v6945_v32 = vld [vmem:[#allocation18_spill] sm:$0xff] }
0x156a   :  { %v1101_v50 = vsel %vm665_vm2, %v1100_v31, %v1099_v36  ;;  %v2912_v36 = vrot.slane %v6947_v30, 6  ;;  %v6948_v31 = vld [vmem:[#allocation14_spill] sm:$0xff] }
0x156b   :  { %v3731_v18 = vrot.slane %v3715_v16, 7 }
0x156d   :  { %3740 = vrot.lane.b32.xlu2 %v3731_v18, %s4599_s2  ;;  %v3665_v8 = vpop.permute.xlu0 %3664 }
0x156e   :  { %v6719_v58 = vpop.eup %4564  ;;  %v3681_v60 = vadd.f32 %v3665_v8, %v4811_v46  ;;  %v1103_v8 = vsel %vm668_vm3, %v1102_v3, %v1101_v50  ;;  %v3366_v3 = vrot.slane %v6510_v6, 6  ;;  %v6951_v50 = vld [vmem:[#allocation22_spill] sm:$0xff] }
0x156f   :  { %v3702_v52 = vrot.slane %v6719_v58, 1  ;;  %v1105_v51 = vsel %vm671_vm4, %v1104_v10, %v1103_v8  ;;  %v6952_v8 = vld [vmem:[#allocation19_spill] sm:$0xff] }
0x1570   :  { %4566 = vtanh.f32 %v3681_v60  ;;  %v2467_v10 = vrot.slane %v6952_v8, 1 }
0x1571   :  { %v3718_v21 = vsub.f32 %v6515_v42, %v3702_v52  ;;  %v2002_v52 = vrot.slane %v5773_v54, 7  ;;  %v2010_v54 = vrot.slane %v5785_v17, 3 }
0x1573   :  { %v3734_v44 = vrot.slane %v3718_v21, 7 }
0x1575   :  { %3746 = vrot.lane.b32.xlu2 %v3734_v44, %s4599_s2 }
0x1576   :  { %v6725_v33 = vpop.eup %4566 }
0x1577   :  { %v3705_v22 = vrot.slane %v6725_v33, 1 }
0x1579   :  { %v3721_v57 = vsub.f32 %v6530_v13, %v3705_v22  ;;  %v2004_v22 = vrot.slane %v5776_v9, 6  ;;  %v2006_v9 = vrot.slane %v5790_v53, 5  ;;  %v6944_v53 = vld [vmem:[#allocation15_spill] sm:$0xff] }
0x157b   :  { %v3737_v0 = vrot.slane %v3721_v57, 7  ;;  %v2012_v57 = vsel %vm659_vm0, %v2011_v47, %v2010_v54  ;;  %v6955_v47 = vld [vmem:[#allocation24_spill] sm:$0xff]  ;;  %v3375_v54 = vrot.slane %v6530_v13, 1 }
0x157d   :  { %3752 = vrot.lane.b32.xlu2 %v3737_v0, %s4599_s2  ;;  %v1110_v0 = vrot.slane %v5296_v43, 1  ;;  %v2456_v43 = vrot.slane %v6944_v53, 7  ;;  %v6957_v53 = vld [vmem:[#allocation6_spill] sm:$0xff] }
0x15c6   :  { %v3745_v23 = vpop.permute.xlu1 %3744 }
0x15c7   :  { %v3741_v5 = vpop.permute.xlu2 %3740  ;;  %v3743_v46 = vpop.permute.xlu0 %3742  ;;  %v3765_v4 = vmul.f32 %v3745_v23, %v6643_v11  ;;  %v2014_v23 = vsel %vm662_vm1, %v2013_v2, %v2012_v57 }
0x15c8   :  { %v3763_v12 = vmul.f32 %v3741_v5, %v6647_v19  ;;  %v3764_v34 = vmul.f32 %v3743_v46, %v6576_v15  ;;  %v2462_v5 = vrot.slane %v6037_v20, 4  ;;  %v3367_v46 = vrot.slane %v6519_v14, 5  ;;  %v6949_v14 = vld [vmem:[#allocation17_spill] sm:$0xff] }
0x15c9   :  { %3784 = vrot.lane.b32.xlu0 %v3765_v4, %s4600_s26  ;;  %v2463_v4 = vrot.slane %v6945_v32, 3 }
0x15ca   :  { %3782 = vrot.lane.b32.xlu2 %v3764_v34, %s4600_s26  ;;  %3780 = vrot.lane.b32.xlu1 %v3763_v12, %s4600_s26  ;;  %v2910_v12 = vrot.slane %v6263_v56, 7  ;;  %v6946_v34 = vld [vmem:[#allocation16_spill] sm:$0xff]  ;;  %v3368_v56 = vsel %vm659_vm0, %v3367_v46, %v3366_v3 }
0x15cb   :  { %v2458_v20 = vrot.slane %v6946_v34, 6  ;;  %v6959_v34 = vld [vmem:[#allocation10_spill] sm:$0xff] }
0x15ce   :  { %v3751_v11 = vpop.permute.xlu1 %3750 }
0x15cf   :  { %v3747_v37 = vpop.permute.xlu2 %3746  ;;  %v3749_v19 = vpop.permute.xlu0 %3748  ;;  %v3768_v15 = vmul.f32 %v3751_v11, %v6664_v62  ;;  %v1106_v62 = vrot.slane %v5291_v40, 3  ;;  %v2003_v40 = vsel %vm668_vm3, %v2002_v52, %v5770_v29  ;;  %v2460_v11 = vrot.slane %v6949_v14, 5 }
0x15d0   :  { %v3766_v16 = vmul.f32 %v3747_v37, %v6667_v1  ;;  %v3767_v18 = vmul.f32 %v3749_v19, %v6598_v28  ;;  %v6950_v37 = vld [vmem:[#allocation20_spill] sm:$0xff] }
0x15d1   :  { %3790 = vrot.lane.b32.xlu0 %v3768_v15, %s4600_s26  ;;  %v1107_v28 = vsel %vm674_vm5, %v1106_v62, %v1105_v51  ;;  %v2911_v19 = vsel %vm674_vm5, %v2910_v12, %v6950_v37  ;;  %v2464_v15 = vsel %vm659_vm0, %v2463_v4, %v2462_v5  ;;  %v3369_v51 = vrot.slane %v6515_v42, 4  ;;  %v6954_v62 = vld [vmem:[#allocation23_spill] sm:$0xff]  ;;  %v6958_v4 = vld [vmem:[#allocation8_spill] sm:$0xff] }
0x15d2   :  { %3788 = vrot.lane.b32.xlu2 %v3767_v18, %s4600_s26  ;;  %3786 = vrot.lane.b32.xlu1 %v3766_v16, %s4600_s26  ;;  %v1109_v44 = vsel %vm677_vm6, %v1108_v25, %v1107_v28  ;;  %v2914_v16 = vrot.slane %v6951_v50, 5  ;;  %v6953_v25 = vld [vmem:[#allocation26_spill] sm:$0xff]  ;;  %v2913_v28 = vsel %vm677_vm6, %v2912_v36, %v2911_v19 }
0x15d3   :  { %v2917_v6 = vrot.slane %v6953_v25, 3 }
0x15d7   :  { %v3753_v60 = vpop.permute.xlu2 %3752  ;;  %v3739_v1 = vpop.permute.xlu0 %3738 }
0x15d8   :  { %v3769_v21 = vmul.f32 %v3753_v60, %v6678_v24  ;;  %v3762_v55 = vmul.f32 %v3739_v1, %v6621_v27  ;;  %v2008_v24 = vrot.slane %v5781_v63, 4  ;;  %v2005_v27 = vsel %vm671_vm4, %v2004_v22, %v2003_v40 }
0x15d9   :  { %1111 = vrot.lane.b32.xlu0 %v1109_v44, %s4599_s2  ;;  %v2007_v29 = vsel %vm674_vm5, %v2006_v9, %v2005_v27  ;;  %v2465_v63 = vrot.slane %v6044_v39, 2  ;;  %v2457_v39 = vsel %vm671_vm4, %v2456_v43, %v6948_v31  ;;  %v2915_v60 = vrot.slane %v6954_v62, 4  ;;  %v6956_v9 = vld [vmem:[#allocation25_spill] sm:$0xff]  ;;  %v6960_v31 = vld [vmem:[#allocation7_spill] sm:$0xff] }
0x15da   :  { %3792 = vrot.lane.b32.xlu1 %v3769_v21, %s4600_s26  ;;  %3778 = vrot.lane.b32.xlu2 %v3762_v55, %s4600_s26  ;;  %v2009_v17 = vsel %vm677_vm6, %v2008_v24, %v2007_v29  ;;  %v2459_v1 = vsel %vm674_vm5, %v2458_v20, %v2457_v39  ;;  %v3370_v55 = vsel %vm662_vm1, %v3369_v51, %v3368_v56  ;;  %v3371_v22 = vrot.slane %v6523_v45, 3 }
0x15db   :  { %v2466_v18 = vsel %vm662_vm1, %v2465_v63, %v2464_v15  ;;  %v2461_v52 = vsel %vm677_vm6, %v2460_v11, %v2459_v1  ;;  %v2916_v44 = vsel %vm659_vm0, %v2915_v60, %v2914_v16  ;;  %v2919_v40 = vrot.slane %v6955_v47, 2  ;;  %v6963_v47 = vld [vmem:[#allocation13_spill] sm:$0xff] }
0x15dc   :  { %v2468_v21 = vsel %vm665_vm2, %v2467_v10, %v2466_v18  ;;  %v2918_v42 = vsel %vm662_vm1, %v2917_v6, %v2916_v44  ;;  %v3372_v24 = vsel %vm665_vm2, %v3371_v22, %v3370_v55  ;;  %v3373_v27 = vrot.slane %v6534_v61, 2  ;;  %v6962_v18 = vld [vmem:[#allocation11_spill] sm:$0xff] }
0x15dd   :  { %v2920_v57 = vsel %vm665_vm2, %v2919_v40, %v2918_v42  ;;  %v2921_v2 = vrot.slane %v6956_v9, 1  ;;  %v3364_v45 = vrot.slane %v6507_v26, 7  ;;  %v1552_v43 = vrot.slane %v6957_v53, 7  ;;  %v4168_v42 = vld [vmem:[%s6887_s5 + $0x20] sm:$0xff] }
0x15de   :  { %v1554_v20 = vrot.slane %v6959_v34, 6  ;;  %v1556_v39 = vrot.slane %v6960_v31, 5  ;;  %v1560_v8 = vrot.slane %v6962_v18, 3  ;;  %v1562_v40 = vrot.slane %v6963_v47, 2 }
0x15df   :  { %v3365_v5 = vsel %vm677_vm6, %v3364_v45, %v6504_v38  ;;  %v1553_v38 = vsel %vm665_vm2, %v1552_v43, %v6958_v4 }
0x15e1   :  { %2017 = vrot.lane.b32.xlu0 %v2014_v23, %s4600_s26  ;;  %v2922_v23 = vsel %vm668_vm3, %v2921_v2, %v2920_v57  ;;  %v4167_v2 = vld [vmem:[%s6887_s5 + $0x18] sm:$0xff] }
0x15e2   :  { %1113 = vrot.lane.b32.xlu1 %v1110_v0, %s4599_s2  ;;  %2015 = vrot.lane.b32.xlu2 %v2009_v17, %s4600_s26  ;;  %v3374_v0 = vsel %vm668_vm3, %v3373_v27, %v3372_v24  ;;  %v6964_v24 = vld [vmem:[#allocation12_spill] sm:$0xff]  ;;  %s3930_s2 = sshll.u32 %s4604_s25, 4  ;;  %s3931_s2 = int_to_ptr.vmem [resolvable:$true] %s3930_s2 }
0x15e3   :  { %v3376_v29 = vsel %vm671_vm4, %v3375_v54, %v3374_v0 }
0x15e9   :  { %2923 = vrot.lane.b32.xlu0 %v2913_v28, %s4601_s3 }
0x15ea   :  { %2469 = vrot.lane.b32.xlu1 %v2461_v52, %s4597_s17  ;;  %2471 = vrot.lane.b32.xlu2 %v2468_v21, %s4597_s17  ;;  %s4602_s17 = smov 64   ;;  %v4169_v52 = vld [vmem:[%s6887_s5 + $0x28] sm:$0xff] }
0x15f1   :  { %3379 = vrot.lane.b32.xlu0 %v3376_v29, %s4602_s17 }
0x15f2   :  { %2925 = vrot.lane.b32.xlu1 %v2922_v23, %s4601_s3  ;;  %3377 = vrot.lane.b32.xlu2 %v3365_v5, %s4602_s17 }
0x1624   :  { %v3783_v13 = vpop.permute.xlu2 %3782 }
0x1625   :  { %v3804_v12 = vadd.f32 %v6688_v41, %v3783_v13  ;;  %v4171_v41 = vld [vmem:[%s6887_s5 + $0x38] sm:$0xff] }
0x1626   :  { %3911 = vmatpush.bf16.msra.mxu2 %v4171_v41 }
0x1627   :  { %v3819_v14 = vrot.slane %v3804_v12, 6 }
0x162c   :  { %v3789_v61 = vpop.permute.xlu2 %3788 }
0x162d   :  { %v3807_v16 = vadd.f32 %v6699_v59, %v3789_v61  ;;  %v4166_v61 = vld [vmem:[%s6887_s5 + $0x10] sm:$0xff] }
0x162f   :  { %v3825_v59 = vrot.slane %v3807_v16, 3 }
0x1634   :  { %v3779_v17 = vpop.permute.xlu2 %3778 }
0x1635   :  { %v3802_v63 = vadd.f32 %v6706_v48, %v3779_v17  ;;  %v1555_v48 = vsel %vm668_vm3, %v1554_v20, %v1553_v38  ;;  %v4165_v17 = vld [vmem:[%s6887_s5 + $0x8] sm:$0xff] }
0x1636   :  { %v1557_v15 = vsel %vm671_vm4, %v1556_v39, %v1555_v48 }
0x1637   :  { %3831 = vrot.lane.b32.xlu1 %v3802_v63, %s4603_s30  ;;  %v4164_v63 = vld [vmem:[%s6887_s5] sm:$0xff] }
0x163b   :  { %v3785_v26 = vpop.permute.xlu0 %3784 }
0x163c   :  { %v3781_v46 = vpop.permute.xlu1 %3780  ;;  %v3805_v30 = vadd.f32 %v6684_v7, %v3785_v26  ;;  %v6961_v7 = vld [vmem:[#allocation9_spill] sm:$0xff]  ;;  %v2016_v6 = vpop.permute.xlu2 %2015 }
0x163d   :  { %v3803_v32 = vadd.f32 %v6713_v49, %v3781_v46  ;;  %v1558_v50 = vrot.slane %v6961_v7, 4 }
0x163e   :  { %v3821_v37 = vrot.slane %v3805_v30, 5 }
0x163f   :  { %v3818_v36 = vrot.slane %v3803_v32, 7  ;;  %v1559_v25 = vsel %vm674_vm5, %v1558_v50, %v1557_v15  ;;  %v4183_v32 = vld [vmem:[%s6888_s6] ss:$0 sm:$0xff] }
0x1640   :  { %v1561_v28 = vsel %vm677_vm6, %v1560_v8, %v1559_v25  ;;  %vm2929_vm6 = vcmask 786053  }
0x1641   :  { %v3820_v19 = vsel %vm659_vm0, %v3819_v14, %v3818_v36 }
0x1642   :  { %v3822_v10 = vsel %vm662_vm1, %v3821_v37, %v3820_v19  ;;  %vm1119_vm1 = vcmask 254080  }
0x1643   :  { %v3791_v3 = vpop.permute.xlu0 %3790 }
0x1644   :  { %v3787_v11 = vpop.permute.xlu1 %3786  ;;  %v3808_v51 = vadd.f32 %v6695_v35, %v3791_v3  ;;  %v2472_v57 = vpop.permute.xlu2 %2471 }
0x1645   :  { %v3806_v49 = vadd.f32 %v6719_v58, %v3787_v11  ;;  %v4170_v58 = vld [vmem:[%s6887_s5 + $0x30] sm:$0xff]  ;;  %s3932_s5 = sshll.u32 %s6889_s7, 4  ;;  %s3933_s5 = int_to_ptr.hbm [resolvable:$true] %s3932_s5 }
0x1646   :  { %3912 = vmatpush.bf16.msra.mxu2 %v4170_v58  ;;  %v3827_v35 = vrot.slane %v3808_v51, 2 }
0x1647   :  { %v3823_v56 = vrot.slane %v3806_v49, 4 }
0x1649   :  { %v3824_v62 = vsel %vm665_vm2, %v3823_v56, %v3822_v10  ;;  %vm1569_vm2 = vcmask 386304  }
0x164a   :  { %v3826_v21 = vsel %vm668_vm3, %v3825_v59, %v3824_v62  ;;  %3913 = vmatpush.bf16.msra.mxu2 %v4169_v52  ;;  %vm2023_vm3 = vcmask 518528  }
0x164b   :  { %v1112_v60 = vpop.permute.xlu0 %1111  ;;  %v3828_v22 = vsel %vm671_vm4, %v3827_v35, %v3826_v21  ;;  %vm2477_vm4 = vcmask 650752  }
0x164c   :  { %v3793_v1 = vpop.permute.xlu1 %3792  ;;  %1118 = vst.msk [vmem:[#allocation2 - $0x1] sm:$0xfe] %vm1117_vm12, %v1112_v60  ;;  %v3378_v23 = vpop.permute.xlu2 %3377 }
0x164d   :  { %v3809_v55 = vadd.f32 %v6725_v33, %v3793_v1  ;;  %1568 = vst.msk [vmem:[#allocation2 - $0x2] sm:$0xfc] %vm1567_vm13, %v1561_v28  ;;  %v1563_v33 = vrot.slane %v6964_v24, 1 }
0x164e   :  { %2022 = vst.msk [vmem:[#allocation2 - $0x3] sm:$0xf8] %vm2021_vm14, %v2016_v6  ;;  %3914 = vmatpush.bf16.msra.mxu2 %v4168_v42 }
0x164f   :  { %v3829_v44 = vrot.slane %v3809_v55, 1  ;;  %v1564_v45 = vsel %vm659_vm0, %v1563_v33, %v1562_v40  ;;  %vm3837_vm0 = vcmask 1048455  }
0x1651   :  { %v3830_v54 = vsel %vm674_vm5, %v3829_v44, %v3828_v22  ;;  %vm2475_vm5 = vcmask 654852  }
0x1652   :  { %3833 = vrot.lane.b32.xlu2 %v3830_v54, %s4603_s30  ;;  %3915 = vmatpush.bf16.msra.mxu2 %v4167_v2 }
0x1653   :  { %v2018_v27 = vpop.permute.xlu0 %2017 }
0x1654   :  { %v1114_v9 = vpop.permute.xlu1 %1113 }
0x1655   :  { %1120 = vst.msk [vmem:[#allocation2 + $0x7] sm:$0x1] %vm1119_vm1, %v1114_v9 }
0x1656   :  { %1570 = vst.msk [vmem:[#allocation2 + $0x6] sm:$0x3] %vm1569_vm2, %v1564_v45  ;;  %3916 = vmatpush.bf16.msra.mxu2 %v4166_v61 }
0x1657   :  { %2024 = vst.msk [vmem:[#allocation2 + $0x5] sm:$0x7] %vm2023_vm3, %v2018_v27 }
0x1658   :  { %2478 = vst.msk [vmem:[#allocation2 + $0x4] sm:$0xf] %vm2477_vm4, %v2472_v57 }
0x165a   :  { %3917 = vmatpush.bf16.msra.mxu2 %v4165_v17 }
0x165b   :  { %v2924_v0 = vpop.permute.xlu0 %2923 }
0x165c   :  { %v2470_v29 = vpop.permute.xlu1 %2469 }
0x165d   :  { %2476 = vst.msk [vmem:[#allocation2 - $0x4] sm:$0xf0] %vm2475_vm5, %v2470_v29 }
0x165e   :  { %2930 = vst.msk [vmem:[#allocation2 - $0x5] sm:$0xe0] %vm2929_vm6, %v2924_v0  ;;  %3918 = vmatpush.bf16.msra.mxu2 %v4164_v63 }
0x165f   :  { %3384 = vst.msk [vmem:[#allocation2 - $0x6] sm:$0xc0] %vm3383_vm15, %v3378_v23 }
0x1663   :  { %v3380_v5 = vpop.permute.xlu0 %3379 }
0x1664   :  { %v2926_v13 = vpop.permute.xlu1 %2925 }
0x1665   :  { %2932 = vst.msk [vmem:[#allocation2 + $0x3] sm:$0x1f] %vm2931_vm7, %v2926_v13 }
0x1666   :  { %3386 = vst.msk [vmem:[#allocation2 + $0x2] sm:$0x3f] %vm3385_vm8, %v3380_v5 }
0x16a9   :  { %v3832_v26 = vpop.permute.xlu1 %3831 }
0x16aa   :  { %3838 = vst.msk [vmem:[#allocation2 - $0x7] sm:$0x80] %vm3837_vm0, %v3832_v26 }
0x16ac   :  { %v3834_v46 = vpop.permute.xlu2 %3833 }
0x16ad   :  { %3840 = vst.msk [vmem:[#allocation2 + $0x1] sm:$0x7f] %vm3839_vm9, %v3834_v46 }
0x16b4   :  { %v3841_v53 = vld [vmem:[#allocation2] sm:$0xff] }
0x16b5   :  { %v3842_v43 = vpack.c.bf16 %v3841_v53, %v3841_v53 }
0x16b7   :  { %3919 = vmatmul.bf16.vlgmr.msra.gmra.mxu2 %v3842_v43 }
0x173a   :  { %v3920_v4 = vpop.f32.mrf.mxu2 }
0x173b   :  { %v3921_v38 = vadd.f32 %v4183_v32, %v3920_v4 }
0x173d   :  { %3924 = vst [vmem:[#allocation3] sm:$0xff] %v3921_v38 }
0x173e   :  { %3935 = dma.vmem_to_hbm [thread:$0]  %s3931_s2, 128, %s3933_s5, [#allocation4]  }
0x1742   :  { %v3922_v12 = vpop.f32.mrf.mxu2 }
0x1743   :  { %4594 = dma.done.wait [#allocation4], 128  }
0x1744   :  { %4595 = vsyncadd [#allocation4], 4294967168 }
0x1745   :  { %3940 = vsyncpa [#allocation4], 1 }

</bundles_post_ra>
